<compile_context>
chip_gen: v5e
topology: v5e:2x2
jax: 0.10.0
libtpu: 0.0.40
codegen_flags: <defaults>
</compile_context>

<pallas_src>
import functools

import jax
import jax.numpy as jnp
from jax import lax
from jax.experimental import pallas as pl
from jax.experimental.pallas import tpu as pltpu


def gin_conv_kernel(eps_ref, xf_ref, idxt_ref, w_ref, b_ref, o_ref, *,
                    j_block: int, agg_bf16: bool):
    """Computes one (batch_tile, node_tile) output tile.

    eps_ref:  (1,)            f32      SMEM  learnable eps
    xf_ref:   (Bt, C_in, N)   f32/bf16       node features, FULL node axis
    idxt_ref: (Bt, K, Nt)     i32            neighbor indices of this tile, (K, nodes)
    w_ref:    (C_out, C_in)   f32            1x1 conv weight
    b_ref:    (C_out, 1)      f32            conv bias
    o_ref:    (Bt, C_out, Nt) f32            output tile
    """
    bt, c_in, n = xf_ref.shape
    k = idxt_ref.shape[1]
    nt = o_ref.shape[-1]
    n_jblocks = n // j_block
    count_dtype = jnp.bfloat16 if agg_bf16 else jnp.float32

    one_plus_eps = 1.0 + eps_ref[0]                        # SMEM scalar read
    w = w_ref[...]                                         # grid-invariant, hoisted
    bias = b_ref[...]
    tile_off = pl.multiple_of(pl.program_id(1) * nt, nt)   # first node of this tile

    # Small per-j-block iotas hoisted once; per-block offsets are scalar adds.
    row_iota = lax.broadcasted_iota(jnp.int32, (j_block, nt), 0)
    col_g = lax.broadcasted_iota(jnp.int32, (j_block, nt), 1) + tile_off

    def process_batch(b_i):
        idx_b = idxt_ref[b_i]                              # (K, Nt), lane-dense

        def j_body(jb_i, acc):
            # acc: (C_in, Nt) f32 running  X @ A'^T  partial sum.
            if isinstance(jb_i, int):                      # single-block static path
                j0 = jb_i * j_block
            else:
                j0 = pl.multiple_of(jb_i * j_block, j_block)
            row_g = row_iota + j0                          # global node id per row
            # Blocked adjacency-count build: A'^T[j, n] = #{k : idx[n, k] == j}.
            # The (j_block, Nt) block stays vreg-resident and feeds the MXU at once.
            at_blk = jnp.zeros((j_block, nt), count_dtype)
            for kk in range(k):                            # K small & static -> unrolled
                at_blk = at_blk + (idx_b[kk:kk + 1, :] == row_g).astype(count_dtype)
            if not agg_bf16:
                # Fold the (1 + eps) * x residual into the adjacency diagonal so it
                # rides the aggregation matmul for free (no second x operand / DMA).
                at_blk = at_blk + jnp.where(row_g == col_g, one_plus_eps, 0.0)
            x_blk = xf_ref[b_i, :, pl.ds(j0, j_block)]     # (C_in, j_block)
            return acc + jnp.dot(x_blk, at_blk, preferred_element_type=jnp.float32)

        acc0 = jnp.zeros((c_in, nt), jnp.float32)
        if n_jblocks == 1:
            acc = j_body(0, acc0)
        else:
            acc = lax.fori_loop(0, n_jblocks, j_body, acc0)

        if agg_bf16:
            # Keep the residual as a separate exact-coefficient f32 add so (1+eps)
            # is not rounded to bf16 on the adjacency diagonal.
            if nt == n:
                xt = xf_ref[b_i]
            else:
                xt = xf_ref[b_i, :, pl.ds(tile_off, nt)]
            acc = acc + one_plus_eps * xt.astype(jnp.float32)

        out = jnp.dot(w, acc, preferred_element_type=jnp.float32) + bias
        o_ref[b_i] = jnp.maximum(out, 0.0).astype(o_ref.dtype)

    if bt == 1:
        process_batch(0)                                   # static batch index
    else:
        # scf.for bounds live ranges across batch elements (a Python `for` would
        # keep all bt elements' slabs co-live and inflate spill pressure).
        pl.loop(0, bt)(process_batch)


def gin_conv2d(x_nchw, edge_index, eps, weight, bias, *,
               batch_tile=1, node_tile=None, j_block=None, agg_bf16=False):
    """GINConv2d forward.

    x_nchw:     (B, C_in, N, 1)                 node features (NCHW, W == 1)
    edge_index: (2, B, N, K)                    edge_index[0][b, n, :] = K neighbors of n
    weight:     (C_out, C_in) or (C_out, C_in, 1, 1)
    bias:       (C_out,)
    Returns:    (B, C_out, N, 1)  float32
    """
    B, C_in, N, W1 = x_nchw.shape
    assert W1 == 1
    K = edge_index.shape[-1]
    C_out = weight.shape[0]

    bt = batch_tile
    assert B % bt == 0
    if agg_bf16:
        assert K <= 256, "bf16 neighbor counts are only exact for K <= 256"

    if node_tile is None:
        # Full width for small/medium graphs; bound the (j_block, Nt) / x_full slabs
        # for large ones.  v6e/v7x MXU is 2x256x256 -> prefer 256-aligned tiles;
        # v7x VMEM is only 64 MiB -> cap at 512.
        node_tile = N
        if N > 1024:
            for cand in (512, 256):
                if N % cand == 0:
                    node_tile = cand
                    break
    nt = node_tile
    assert N % nt == 0 and (nt == N or nt % 128 == 0), \
        "node_tile must divide N and be 128-aligned (256-aligned preferred on v6e/v7x)"

    if j_block is None:
        j_block = N
        if N > 256:
            for cand in (256, 128):
                if N % cand == 0:
                    j_block = cand
                    break
    jb = j_block
    assert N % jb == 0 and (jb == N or jb % 128 == 0), \
        "j_block must divide N and be 128-aligned (or equal N)"

    x_dtype = jnp.bfloat16 if agg_bf16 else jnp.float32
    # Native NCHW layout: nodes stay on the (fast) lane axis, no feature transposes.
    x_cn = x_nchw[..., 0].astype(x_dtype)                             # (B, C_in, N)
    idx_t = jnp.swapaxes(edge_index[0], -1, -2).astype(jnp.int32)     # (B, K, N)
    w = weight.reshape(C_out, C_in).astype(jnp.float32)
    b2 = bias.reshape(C_out, 1).astype(jnp.float32)
    eps1 = jnp.asarray(eps, jnp.float32).reshape(1)

    # Explicit scoped-VMEM budget: double-buffered blocks + headroom for the blocked
    # count tile / accumulators / compiler scratch.  v5e's scoped default is 16 MiB,
    # v6e/v7x's 32 MiB, and v7x only has 64 MiB physical, so size it from the blocks.
    x_bytes = 2 if agg_bf16 else 4
    blocks_bytes = (2 * bt * C_in * N * x_bytes          # x (full node axis)
                    + 2 * bt * K * nt * 4                # neighbor indices
                    + 2 * bt * C_out * nt * 4            # output tile
                    + 2 * (C_out * C_in + C_out) * 4)    # weight + bias (tiny)
    scratch_bytes = jb * nt * 4 + (C_in + C_out) * nt * 4
    vmem_needed = int(1.5 * (blocks_bytes + scratch_bytes)) + (4 << 20)
    try:
        vmem_cap = pltpu.get_tpu_info().vmem_capacity_bytes
    except Exception:
        vmem_cap = 64 << 20                              # conservative (v7x per-TC)
    vmem_limit = min(max(32 << 20, vmem_needed), int(0.9 * vmem_cap))

    kernel = functools.partial(gin_conv_kernel, j_block=jb, agg_bf16=agg_bf16)

    out_cn = pl.pallas_call(
        kernel,
        out_shape=jax.ShapeDtypeStruct((B, C_out, N), jnp.float32),
        # Node-tile axis innermost: the full-node x block's index is constant across
        # consecutive t steps, so it is DMA'd once per batch slab, not per node tile.
        grid=(B // bt, N // nt),
        in_specs=[
            pl.BlockSpec(memory_space=pltpu.MemorySpace.SMEM),       # eps (scalar)
            pl.BlockSpec((bt, C_in, N), lambda b, t: (b, 0, 0)),     # x, full node axis
            pl.BlockSpec((bt, K, nt), lambda b, t: (b, 0, t)),       # idx^T tile
            pl.BlockSpec((C_out, C_in), lambda b, t: (0, 0)),        # conv weight
            pl.BlockSpec((C_out, 1), lambda b, t: (0, 0)),           # conv bias
        ],
        out_specs=pl.BlockSpec((bt, C_out, nt), lambda b, t: (b, 0, t)),
        compiler_params=pltpu.CompilerParams(
            dimension_semantics=("parallel", "parallel"),
            vmem_limit_bytes=vmem_limit),
    )(eps1, x_cn, idx_t, w, b2)

    return out_cn[..., None]                                          # (B, C_out, N, 1)


def gin_conv2d_ref(x, edge_index, eps, weight, bias, *, agg_bf16=False):
    """Pure-JAX reference mirroring the PyTorch forward."""
    idx = edge_index[0]                                    # (B, N, K)
    x_sq = x[..., 0].astype(jnp.float32)                   # (B, C, N)
    if agg_bf16:
        x_sq = x_sq.astype(jnp.bfloat16).astype(jnp.float32)
    x_j = jax.vmap(lambda xb, ib: xb[:, ib])(x_sq, idx)    # (B, C, N, K)
    x_j_sum = jnp.sum(x_j, axis=-1)                        # (B, C, N)
    h = (1.0 + eps) * x_sq + x_j_sum
    w2 = weight.reshape(weight.shape[0], -1)
    out = jnp.einsum('oi,bin->bon', w2, h) + bias[None, :, None]
    return jnp.maximum(out, 0.0)[..., None]                # (B, C_out, N, 1)


if __name__ == "__main__":
    B, C_in, C_out, N, K = 2, 8, 16, 256, 8
    key = jax.random.PRNGKey(0)
    k1, k2, k3, k4 = jax.random.split(key, 4)

    x = jax.random.normal(k1, (B, C_in, N, 1), jnp.float32)
    nbr_idx = jax.random.randint(k2, (B, N, K), 0, N, dtype=jnp.int32)
    center_idx = jnp.broadcast_to(
        jnp.arange(N, dtype=jnp.int32)[None, :, None], (B, N, K))
    edge_index = jnp.stack([nbr_idx, center_idx], axis=0)   # (2, B, N, K)

    # Conv2d(C_in, C_out, 1, bias=True) params; eps_init = 0.0
    weight = 0.1 * jax.random.normal(k3, (C_out, C_in), jnp.float32)
    bias = 0.1 * jax.random.normal(k4, (C_out,), jnp.float32)
    eps = jnp.float32(0.0)

    ref = gin_conv2d_ref(x, edge_index, eps, weight, bias)

    # 1) Default config: bt=1, single node tile, single j-block, f32 path.
    out = jax.block_until_ready(gin_conv2d(x, edge_index, eps, weight, bias))
    assert out.shape == (B, C_out, N, 1)
    assert jnp.allclose(out, ref, atol=5e-4, rtol=5e-4)

    # 2) Tiled config: exercises the batch loop, node tiling, the blocked adjacency
    #    build (j_block < N) and the cross-tile (1+eps) diagonal fold.
    out_t = jax.block_until_ready(
        gin_conv2d(x, edge_index, eps, weight, bias,
                   batch_tile=2, node_tile=128, j_block=128))
    assert out_t.shape == (B, C_out, N, 1)
    assert jnp.allclose(out_t, ref, atol=5e-4, rtol=5e-4)

    # 3) bf16-aggregation config (v6e/v7x fast path): bf16 x DMA + bf16 counts,
    #    f32 MXU accumulation, separate f32 residual.
    ref_bf16 = gin_conv2d_ref(x, edge_index, eps, weight, bias, agg_bf16=True)
    out_bf16 = jax.block_until_ready(
        gin_conv2d(x, edge_index, eps, weight, bias, agg_bf16=True))
    assert jnp.allclose(out_bf16, ref_bf16, atol=2e-3, rtol=2e-3)

    print("KERNEL_OK")
</pallas_src>

<mosaic_0001>
module attributes {stable_mosaic.version = 11 : i64} {
  func.func @gin_conv_kernel(%arg0: i32, %arg1: i32, %arg2: memref<1xf32, #tpu.memory_space<smem>>, %arg3: memref<1x8x256xf32, #tpu.memory_space<vmem>>, %arg4: memref<1x8x256xi32, #tpu.memory_space<vmem>>, %arg5: memref<16x8xf32, #tpu.memory_space<vmem>>, %arg6: memref<16x1xf32, #tpu.memory_space<vmem>>, %arg7: memref<1x16x256xf32, #tpu.memory_space<vmem>>) attributes {dimension_semantics = [#tpu.dimension_semantics<parallel>, #tpu.dimension_semantics<parallel>], iteration_bounds = array<i64: 2, 1>, scalar_prefetch = 0 : i64, scratch_operands = 0 : i64, tpu.core_type = #tpu.core_type<tc>, window_params = [{transform_indices = @transform_0, window_bounds = array<i64: 1>}, {transform_indices = @transform_1, window_bounds = array<i64: 1, 8, 256>}, {transform_indices = @transform_2, window_bounds = array<i64: 1, 8, 256>}, {pipeline_mode = #tpu.pipeline_mode<synchronous>, transform_indices = @transform_3, window_bounds = array<i64: 16, 8>}, {pipeline_mode = #tpu.pipeline_mode<synchronous>, transform_indices = @transform_4, window_bounds = array<i64: 16, 1>}, {transform_indices = @transform_5, window_bounds = array<i64: 1, 16, 256>}]} {
    %c0 = arith.constant 0 : index
    %0 = memref.load %arg2[%c0] : memref<1xf32, #tpu.memory_space<smem>>
    %cst = arith.constant 1.000000e+00 : f32
    %1 = arith.addf %cst, %0 : f32
    %c0_0 = arith.constant 0 : index
    %c0_1 = arith.constant 0 : index
    %2 = vector.load %arg5[%c0_0, %c0_1] : memref<16x8xf32, #tpu.memory_space<vmem>>, vector<16x8xf32>
    %c0_2 = arith.constant 0 : index
    %c0_3 = arith.constant 0 : index
    %3 = vector.load %arg6[%c0_2, %c0_3] : memref<16x1xf32, #tpu.memory_space<vmem>>, vector<16x1xf32>
    %c256_i32 = arith.constant 256 : i32
    %4 = arith.muli %arg1, %c256_i32 : i32
    %5 = tpu.assume_multiple %4, 256 : i32
    %6 = tpu.iota {dimensions = array<i32: 0>} : vector<256x256xi32>
    %7 = tpu.iota {dimensions = array<i32: 1>} : vector<256x256xi32>
    %8 = vector.broadcast %5 : i32 to vector<256x256xi32>
    %9 = arith.addi %7, %8 : vector<256x256xi32>
    %c0_4 = arith.constant 0 : index
    %c0_5 = arith.constant 0 : index
    %c0_6 = arith.constant 0 : index
    %10 = vector.load %arg4[%c0_4, %c0_5, %c0_6] : memref<1x8x256xi32, #tpu.memory_space<vmem>>, vector<1x8x256xi32>
    %11 = vector.shape_cast %10 : vector<1x8x256xi32> to vector<8x256xi32>
    %cst_7 = arith.constant 0.000000e+00 : f32
    %12 = vector.broadcast %cst_7 : f32 to vector<8x256xf32>
    %c0_i32 = arith.constant 0 : i32
    %13 = vector.broadcast %c0_i32 : i32 to vector<256x256xi32>
    %14 = arith.addi %6, %13 : vector<256x256xi32>
    %cst_8 = arith.constant 0.000000e+00 : f32
    %15 = vector.broadcast %cst_8 : f32 to vector<256x256xf32>
    %16 = vector.extract_strided_slice %11 {offsets = [0, 0], sizes = [1, 256], strides = [1, 1]} : vector<8x256xi32> to vector<1x256xi32>
    %17 = vector.broadcast %16 : vector<1x256xi32> to vector<256x256xi32>
    %18 = arith.cmpi eq, %17, %14 : vector<256x256xi32>
    %19 = arith.extui %18 : vector<256x256xi1> to vector<256x256xi32>
    %20 = arith.sitofp %19 : vector<256x256xi32> to vector<256x256xf32>
    %21 = arith.addf %15, %20 : vector<256x256xf32>
    %22 = vector.extract_strided_slice %11 {offsets = [1, 0], sizes = [1, 256], strides = [1, 1]} : vector<8x256xi32> to vector<1x256xi32>
    %23 = vector.broadcast %22 : vector<1x256xi32> to vector<256x256xi32>
    %24 = arith.cmpi eq, %23, %14 : vector<256x256xi32>
    %25 = arith.extui %24 : vector<256x256xi1> to vector<256x256xi32>
    %26 = arith.sitofp %25 : vector<256x256xi32> to vector<256x256xf32>
    %27 = arith.addf %21, %26 : vector<256x256xf32>
    %28 = vector.extract_strided_slice %11 {offsets = [2, 0], sizes = [1, 256], strides = [1, 1]} : vector<8x256xi32> to vector<1x256xi32>
    %29 = vector.broadcast %28 : vector<1x256xi32> to vector<256x256xi32>
    %30 = arith.cmpi eq, %29, %14 : vector<256x256xi32>
    %31 = arith.extui %30 : vector<256x256xi1> to vector<256x256xi32>
    %32 = arith.sitofp %31 : vector<256x256xi32> to vector<256x256xf32>
    %33 = arith.addf %27, %32 : vector<256x256xf32>
    %34 = vector.extract_strided_slice %11 {offsets = [3, 0], sizes = [1, 256], strides = [1, 1]} : vector<8x256xi32> to vector<1x256xi32>
    %35 = vector.broadcast %34 : vector<1x256xi32> to vector<256x256xi32>
    %36 = arith.cmpi eq, %35, %14 : vector<256x256xi32>
    %37 = arith.extui %36 : vector<256x256xi1> to vector<256x256xi32>
    %38 = arith.sitofp %37 : vector<256x256xi32> to vector<256x256xf32>
    %39 = arith.addf %33, %38 : vector<256x256xf32>
    %40 = vector.extract_strided_slice %11 {offsets = [4, 0], sizes = [1, 256], strides = [1, 1]} : vector<8x256xi32> to vector<1x256xi32>
    %41 = vector.broadcast %40 : vector<1x256xi32> to vector<256x256xi32>
    %42 = arith.cmpi eq, %41, %14 : vector<256x256xi32>
    %43 = arith.extui %42 : vector<256x256xi1> to vector<256x256xi32>
    %44 = arith.sitofp %43 : vector<256x256xi32> to vector<256x256xf32>
    %45 = arith.addf %39, %44 : vector<256x256xf32>
    %46 = vector.extract_strided_slice %11 {offsets = [5, 0], sizes = [1, 256], strides = [1, 1]} : vector<8x256xi32> to vector<1x256xi32>
    %47 = vector.broadcast %46 : vector<1x256xi32> to vector<256x256xi32>
    %48 = arith.cmpi eq, %47, %14 : vector<256x256xi32>
    %49 = arith.extui %48 : vector<256x256xi1> to vector<256x256xi32>
    %50 = arith.sitofp %49 : vector<256x256xi32> to vector<256x256xf32>
    %51 = arith.addf %45, %50 : vector<256x256xf32>
    %52 = vector.extract_strided_slice %11 {offsets = [6, 0], sizes = [1, 256], strides = [1, 1]} : vector<8x256xi32> to vector<1x256xi32>
    %53 = vector.broadcast %52 : vector<1x256xi32> to vector<256x256xi32>
    %54 = arith.cmpi eq, %53, %14 : vector<256x256xi32>
    %55 = arith.extui %54 : vector<256x256xi1> to vector<256x256xi32>
    %56 = arith.sitofp %55 : vector<256x256xi32> to vector<256x256xf32>
    %57 = arith.addf %51, %56 : vector<256x256xf32>
    %58 = vector.extract_strided_slice %11 {offsets = [7, 0], sizes = [1, 256], strides = [1, 1]} : vector<8x256xi32> to vector<1x256xi32>
    %59 = vector.broadcast %58 : vector<1x256xi32> to vector<256x256xi32>
    %60 = arith.cmpi eq, %59, %14 : vector<256x256xi32>
    %61 = arith.extui %60 : vector<256x256xi1> to vector<256x256xi32>
    %62 = arith.sitofp %61 : vector<256x256xi32> to vector<256x256xf32>
    %63 = arith.addf %57, %62 : vector<256x256xf32>
    %64 = arith.cmpi eq, %14, %9 : vector<256x256xi32>
    %cst_9 = arith.constant 0.000000e+00 : f32
    %65 = vector.broadcast %1 : f32 to vector<256x256xf32>
    %66 = vector.broadcast %cst_9 : f32 to vector<256x256xf32>
    %67 = arith.select %64, %65, %66 : vector<256x256xi1>, vector<256x256xf32>
    %68 = arith.addf %63, %67 : vector<256x256xf32>
    %c0_10 = arith.constant 0 : index
    %c0_11 = arith.constant 0 : index
    %c0_12 = arith.constant 0 : index
    %69 = vector.load %arg3[%c0_10, %c0_11, %c0_12] : memref<1x8x256xf32, #tpu.memory_space<vmem>>, vector<1x8x256xf32>
    %70 = vector.shape_cast %69 : vector<1x8x256xf32> to vector<8x256xf32>
    %cst_13 = arith.constant dense<0.000000e+00> : vector<8x256xf32>
    %71 = tpu.matmul %70, %68, %cst_13 {dimension_numbers = #tpu.dot_dimension_numbers<[1], [0], [0], [1], [0, 0, 1, 1], [], []>} : vector<8x256xf32>, vector<256x256xf32>, vector<8x256xf32> -> vector<8x256xf32>
    %72 = arith.addf %12, %71 : vector<8x256xf32>
    %cst_14 = arith.constant dense<0.000000e+00> : vector<16x256xf32>
    %73 = tpu.matmul %2, %72, %cst_14 {dimension_numbers = #tpu.dot_dimension_numbers<[1], [0], [0], [1], [0, 0, 1, 1], [], []>} : vector<16x8xf32>, vector<8x256xf32>, vector<16x256xf32> -> vector<16x256xf32>
    %74 = vector.broadcast %3 : vector<16x1xf32> to vector<16x256xf32>
    %75 = arith.addf %73, %74 : vector<16x256xf32>
    %cst_15 = arith.constant 0.000000e+00 : f32
    %76 = vector.broadcast %cst_15 : f32 to vector<16x256xf32>
    %77 = arith.maximumf %75, %76 : vector<16x256xf32>
    %c0_16 = arith.constant 0 : index
    %c0_17 = arith.constant 0 : index
    %c0_18 = arith.constant 0 : index
    %78 = vector.load %arg7[%c0_16, %c0_17, %c0_18] : memref<1x16x256xf32, #tpu.memory_space<vmem>>, vector<1x16x256xf32>
    %79 = vector.shape_cast %78 : vector<1x16x256xf32> to vector<16x256xf32>
    %80 = vector.shape_cast %77 : vector<16x256xf32> to vector<1x16x256xf32>
    tpu.vector_store %arg7[%c0_16, %c0_17, %c0_18], %80 {strides = array<i32>} : memref<1x16x256xf32, #tpu.memory_space<vmem>>, vector<1x16x256xf32>,
    return
  }
  func.func @transform_0(%arg0: i32, %arg1: i32) -> i32 {
    %c0_i32 = arith.constant 0 : i32
    %c0_i32_0 = arith.constant 0 : i32
    return %c0_i32 : i32
  }
  func.func @transform_1(%arg0: i32, %arg1: i32) -> (i32, i32, i32) {
    %c0_i32 = arith.constant 0 : i32
    %c0_i32_0 = arith.constant 0 : i32
    %c0_i32_1 = arith.constant 0 : i32
    return %arg0, %c0_i32, %c0_i32_0 : i32, i32, i32
  }
  func.func @transform_2(%arg0: i32, %arg1: i32) -> (i32, i32, i32) {
    %c0_i32 = arith.constant 0 : i32
    %c0_i32_0 = arith.constant 0 : i32
    return %arg0, %c0_i32, %arg1 : i32, i32, i32
  }
  func.func @transform_3(%arg0: i32, %arg1: i32) -> (i32, i32) {
    %c0_i32 = arith.constant 0 : i32
    %c0_i32_0 = arith.constant 0 : i32
    %c0_i32_1 = arith.constant 0 : i32
    return %c0_i32, %c0_i32_0 : i32, i32
  }
  func.func @transform_4(%arg0: i32, %arg1: i32) -> (i32, i32) {
    %c0_i32 = arith.constant 0 : i32
    %c0_i32_0 = arith.constant 0 : i32
    %c0_i32_1 = arith.constant 0 : i32
    return %c0_i32, %c0_i32_0 : i32, i32
  }
  func.func @transform_5(%arg0: i32, %arg1: i32) -> (i32, i32, i32) {
    %c0_i32 = arith.constant 0 : i32
    %c0_i32_0 = arith.constant 0 : i32
    return %arg0, %c0_i32, %arg1 : i32, i32, i32
  }
}

</mosaic_0001>

<bundles_post_ra>
// kernel: tpu_custom_call.1
= control target key start
LH: loop header
LB: loop body
LE: loop exit
PB: predicated region body
PF: predicated region fallthrough
CT: control target
= control target key end

     0   :  { %s5723_s0 = inlined_call_operand.<no memory space> [shape: f32[1], index: 0, kind: input, shape index: {}]   ;;  %s5724_s1 = inlined_call_operand.vmem [shape: f32[2,8,256], index: 1, kind: input, shape index: {}]   ;;  %s5725_s2 = inlined_call_operand.hbm [shape: s32[2,8,256], index: 2, kind: input, shape index: {}]   ;;  %s5726_s3 = inlined_call_operand.vmem [shape: f32[16,8], index: 3, kind: input, shape index: {}]   ;;  %s5727_s4 = inlined_call_operand.vmem [shape: f32[16,1], index: 4, kind: input, shape index: {}]   ;;  %s5728_s5 = inlined_call_operand.hbm [shape: f32[2,16,256], index: 5, kind: output, shape index: {}]  }
   0x1   :  { %10 = sst [smem:[#allocation2]] %s5723_s0 }
   0x2   :  { %11 = vsyncpa [#allocation4], 0 }
   0x3   :  { %13 = vsyncpa [#allocation4 + $0x1], 0 }
   0x4   :  { %14 = vsyncpa [#allocation5], 0 }
   0x5   :  { %16 = vsyncpa [#allocation5 + $0x1], 0  ;;  %s3615_s20 = smov 0   ;;  %s3617_s21 = smov 0  }
   0x6   :  { %s3619_s22 = smov 0   ;;  %s3621_s23 = smov 0  }
   0x7   :  { %s3623_s24 = smov 0   ;;  %s3625_s25 = smov 0  }
   0x8 LB: > { %s2859_s0 = sadd.s32 4294967295, %s3576_s25   ;;  %s2860_s26 = sadd.s32 4294967294, %s3576_s25   ;;  %s3576_s25 = sphi %s3625_s25, %s22_s25   ;;  %s3572_s24 = sphi %s3623_s24, %s5737_s24   ;;  %s3568_s23 = sphi %s3621_s23, %s5736_s23   ;;  %s3564_s22 = sphi %s3619_s22, %s5735_s22   ;;  %s3560_s21 = sphi %s3617_s21, %s5734_s21   ;;  %s3556_s20 = sphi %s3615_s20, %s5733_s20  }
   0x9   : > { %s34_s27 = sadd.s32 1, %s3572_s24  ;;  %s90_s28 = sadd.s32 1, %s3564_s22 }
   0xa   : > { %p36_p0 = scmp.ge.s32.totalorder %s34_s27, 2  ;;  %p97_p1 = scmp.ne.s32.totalorder %s3564_s22, %s3560_s21 }
   0xb   : > { %p98_p2 = scmp.eq.s32.totalorder %s3576_s25, 0  ;;  %p103_p3 = scmp.ne.s32.totalorder %s3560_s21, %s3556_s20 }
   0xc   : > { %s5739_s27 = smov (%p36_p0, %s34_s27), 0  ;;  %p104_p5 = scmp.eq.s32.totalorder %s2859_s0, 0 }
   0xd   : > { %p3656_p4 = por %p98_p2, %p97_p1  ;;  %s85_s30 = ssub.s32 %s3572_s24, %s5739_s27 }
   0xe   : > { %p171_p6 = scmp.eq.s32.totalorder %s2859_s0, 1  ;;  %p88_p7 = scmp.eq.s32.totalorder %s85_s30, 0 }
   0xf   : > { %p3662_p8 = por %p104_p5, %p103_p3  ;;  %p177_p10 = scmp.eq.s32.totalorder %s2860_s26, 1 }
  0x10   : > { %p3666_p9 = por %p171_p6, %p97_p1  ;;  %p2862_p12 = scmp.ge.s32.totalorder %s3576_s25, 2 }
  0x11   : > { %s3671_s8 = scalar_select %p88_p7, %s3564_s22, %s90_s28  }
  0x12   : > { %p3673_p11 = por %p177_p10, %p103_p3  ;;  %p3409_p13 = scmp.lt.s32.totalorder %s3576_s25, 2 }
  0x13   : > { %s214_s10 = sand.u32 1, %s3564_s22   ;;  %s3392_s12 = sshll.u32 %s3572_s24, 4 }
  0x14   : > { %s2863_s11 = sshll.u32 %s214_s10, 4  ;;  %s225_s15 = scalar_lea.hbm %s5725_s2, %s3392_s12 }
  0x15   : > { %s218_s16 = scalar_lea.vmem [#allocation3], %s2863_s11  ;;  %s227_s18 = sshll.u32 %s225_s15, 4  ;;  %s228_s18 = int_to_ptr.hbm [resolvable:$true] %s227_s18 }
  0x16   : > { %s229_s17 = sshll.u32 %s218_s16, 4  ;;  %p3402_p0 = pnand %p3409_p13, %p3656_p4  ;;  %s230_s17 = int_to_ptr.vmem [resolvable:$true] %s229_s17 }
  0x17   : > { %p2866_p1 = scmp.ge.s32.totalorder %s3576_s25, 1  ;;  %p234_p2 = scmp.lt.s32.totalorder %s3576_s25, 3 }
  0x18   : > { %s215_s19 = scalar_lea.sflag [#allocation4], %s214_s10 }
  0x19   : > { %3404 = dma.hbm_to_vmem [thread:$0]  (!%p3402_p0), %s228_s18, 256, %s230_s17, %s215_s19  }
  0x1a   : > { %p235_p3 = pnand %p2866_p1, %p234_p2 }
  0x1b   : > { %s3689_s0 = sand.u32 (!%p235_p3), 1, %s3560_s21  }
  0x1c   : > { %238 = sbr.rel (%p235_p3) target bundleno = 717 (0x2cd), region = 40  ;;  %s2867_s26 = sshll.u32 (!%p235_p3), %s3689_s0, 4 }
  0x1d   : > { %s241_s28 = scalar_lea.sflag (!%p235_p3), [#allocation4], %s3689_s0  ;;  %s244_s30 = scalar_lea.vmem (!%p235_p3), [#allocation3], %s2867_s26 }
  0x21   : > { %3547 = dma.done.wait (%p3662_p8), %s241_s28, 256  }
  0x22   : > { %3549 = vsyncadd (%p3662_p8), %s241_s28, 4294967040  ;;  %v291_v0 = vlaneseq  ;;  %s3697_s29 = sld [smem:[#allocation2]]  ;;  %v3706_v4 = vld [vmem:[%s244_s30] sm:$0xff]  ;;  %v331_v5 = vld [vmem:[%s244_s30 + $0x8] sm:$0xff]  ;;  %v3578_v27 = vmov 0.0   ;;  %p277_p4 = scmp.lt.s32.totalorder %s3568_s23, 1 }
  0x23   : > { %v3721_v10 = vperm.slane %v3706_v4, 0  ;;  %v3723_v11 = vperm.slane %v331_v5, 0  ;;  %v3732_v14 = vperm.slane %v3706_v4, 1  ;;  %v3734_v15 = vperm.slane %v331_v5, 1  ;;  %s2743_s16 = scalar_lea.sflag [#allocation5], %s3689_s0  ;;  %s3514_s26 = scalar_lea.hbm %s5728_s5, 64 }
  0x24   : > { %v3699_v1 = vshrl.u32 %v291_v0, 7  ;;  %v3701_v2 = vand.u32 127, %v291_v0  ;;  %v3737_v16 = vperm.slane %v3706_v4, 2  ;;  %v3739_v17 = vperm.slane %v331_v5, 2  ;;  %s5434_s10 = scalar_select %p277_p4, %s3568_s23, 1 }
  0x25   : > { %v3743_v18 = vperm.slane %v3706_v4, 3  ;;  %v3745_v19 = vperm.slane %v331_v5, 3  ;;  %v3748_v20 = vperm.slane %v3706_v4, 4  ;;  %v3750_v21 = vperm.slane %v331_v5, 4 }
  0x26   : > { %v3704_v3 = vadd.s32 120, %v3699_v1  ;;  %v3709_v6 = vadd.s32 248, %v3699_v1  ;;  %v3712_v7 = vadd.s32 128, %v3701_v2  ;;  %v3715_v8 = vadd.s32 112, %v3699_v1  ;;  %s3393_s11 = sshll.u32 %s5434_s10, 4  ;;  %s3394_s10 = sshll.u32 %s3568_s23, 5 }
  0x27   : > { %v3718_v9 = vadd.s32 240, %v3699_v1  ;;  %v3726_v12 = vadd.s32 104, %v3699_v1  ;;  %v3729_v13 = vadd.s32 232, %v3699_v1  ;;  %v3753_v22 = vperm.slane %v3706_v4, 5  ;;  %s5483_s14 = scalar_lea.vmem %s5724_s1, %s3393_s11  ;;  %s2756_s13 = scalar_lea.hbm %s5728_s5, %s3394_s10 }
  0x28   : > { %s285_s6 = sadd.f32 1.0, %s3697_s29  ;;  %v3755_v23 = vperm.slane %v331_v5, 5  ;;  %v3758_v24 = vperm.slane %v3706_v4, 6  ;;  %v3760_v25 = vperm.slane %v331_v5, 6  ;;  %vm2459_vm0 = vcmp.eq.s32.totalorder %v3709_v6, %v3712_v7  ;;  %s2868_s29 = sshll.u32 %s3689_s0, 5 }
  0x29   : > { %v3764_v26 = vperm.slane %v331_v5, 7  ;;  %vm365_vm1 = vcmp.eq.s32.totalorder %v3723_v11, %v3704_v3  ;;  %vm623_vm2 = vcmp.eq.s32.totalorder %v3734_v15, %v3704_v3  ;;  %vm881_vm3 = vcmp.eq.s32.totalorder %v3739_v17, %v3704_v3  ;;  %s2759_s15 = sshll.u32 %s2756_s13, 4  ;;  %s2760_s15 = int_to_ptr.hbm [resolvable:$true] %s2759_s15 }
  0x2a   : > { %v2902_v28 = vsel %vm365_vm1, 1.0, %v3578_v27  ;;  %v2966_v29 = vsel %vm623_vm2, 1.0, %v3578_v27  ;;  %v3030_v30 = vsel %vm881_vm3, 1.0, %v3578_v27  ;;  %vm1139_vm4 = vcmp.eq.s32.totalorder %v3745_v19, %v3704_v3  ;;  %s3508_s17 = sshra.s32 %s2760_s15, 4  ;;  %s3509_s17 = int_to_ptr.hbm [resolvable:$true] %s3508_s17 }
  0x2b   : > { %v3777_v31 = vstv %s285_s6  ;;  %v815_v32 = vadd.f32 %v2966_v29, %v2902_v28  ;;  %vm1397_vm5 = vcmp.eq.s32.totalorder %v3750_v21, %v3704_v3  ;;  %vm1655_vm6 = vcmp.eq.s32.totalorder %v3755_v23, %v3704_v3  ;;  %s276_s6 = scalar_lea.vmem [#allocation6], %s2868_s29  ;;  %s3510_s23 = scalar_lea.hbm %s3509_s17, 32 }
  0x2c   : > { %v3094_v33 = vsel %vm1139_vm4, 1.0, %v3578_v27  ;;  %v3158_v34 = vsel %vm1397_vm5, 1.0, %v3578_v27  ;;  %vm1913_vm7 = vcmp.eq.s32.totalorder %v3760_v25, %v3704_v3  ;;  %vm2171_vm8 = vcmp.eq.s32.totalorder %v3764_v26, %v3704_v3  ;;  %p3511_p5 = scmp.ne.s32.totalorder %s3509_s17, %s3510_s23  ;;  %p3515_p8 = scmp.lt.s32.totalorder %s3509_s17, %s5728_s5 }
  0x2d   : > { %v1073_v35 = vadd.f32 %v3030_v30, %v815_v32  ;;  %v3222_v36 = vsel %vm1655_vm6, 1.0, %v3578_v27  ;;  %v3286_v37 = vsel %vm1913_vm7, 1.0, %v3578_v27  ;;  %vm397_vm9 = vcmp.eq.s32.totalorder %v3723_v11, %v3709_v6  ;;  %p3516_p10 = scmp.lt.s32.totalorder %s3514_s26, %s3510_s23 }
  0x2e   : > { %v2934_v38 = vsel %vm397_vm9, 1.0, %v3578_v27  ;;  %vm655_vm10 = vcmp.eq.s32.totalorder %v3734_v15, %v3709_v6  ;;  %vm913_vm11 = vcmp.eq.s32.totalorder %v3739_v17, %v3709_v6  ;;  %vm1171_vm12 = vcmp.eq.s32.totalorder %v3745_v19, %v3709_v6  ;;  %p3512_p6 = pnand %p3511_p5, %p3666_p9 }
  0x2f   : > { %v1331_v39 = vadd.f32 %v3094_v33, %v1073_v35  ;;  %v3350_v40 = vsel %vm2171_vm8, 1.0, %v3578_v27  ;;  %v2998_v41 = vsel %vm655_vm10, 1.0, %v3578_v27  ;;  %v3062_v42 = vsel %vm913_vm11, 1.0, %v3578_v27  ;;  %p3517_p13 = por %p3516_p10, %p3515_p8 }
  0x30   : > { %v847_v43 = vadd.f32 %v2998_v41, %v2934_v38  ;;  %vm1429_vm13 = vcmp.eq.s32.totalorder %v3750_v21, %v3709_v6  ;;  %vm1687_vm14 = vcmp.eq.s32.totalorder %v3755_v23, %v3709_v6  ;;  %vm1945_vm15 = vcmp.eq.s32.totalorder %v3760_v25, %v3709_v6  ;;  %p3513_p7 = pneg %p3512_p6 }
  0x31   : > { %v1589_v44 = vadd.f32 %v3158_v34, %v1331_v39  ;;  %v3126_v45 = vsel %vm1171_vm12, 1.0, %v3578_v27  ;;  %v3190_v46 = vsel %vm1429_vm13, 1.0, %v3578_v27  ;;  %v3254_v47 = vsel %vm1687_vm14, 1.0, %v3578_v27 }
  0x32   : > { %v1105_v48 = vadd.f32 %v3062_v42, %v847_v43  ;;  %v3318_v49 = vsel %vm1945_vm15, 1.0, %v3578_v27  ;;  %vm2203_vm1 = vcmp.eq.s32.totalorder %v3764_v26, %v3709_v6  ;;  %vm363_vm2 = vcmp.eq.s32.totalorder %v3723_v11, %v3715_v8  ;;  %p3518_p0 = pnand %p3517_p13, %p3513_p7 }
  0x33   : > { %v1847_v50 = vadd.f32 %v3222_v36, %v1589_v44  ;;  %v2524_v51 = vsel %vm2459_vm0, %v3777_v31, 0.0  ;;  %v2900_v52 = vsel %vm363_vm2, 1.0, %v3578_v27  ;;  %vm621_vm3 = vcmp.eq.s32.totalorder %v3734_v15, %v3715_v8 }
  0x34   : > { %v1363_v53 = vadd.f32 %v3126_v45, %v1105_v48  ;;  %v2964_v54 = vsel %vm621_vm3, 1.0, %v3578_v27  ;;  %vm879_vm4 = vcmp.eq.s32.totalorder %v3739_v17, %v3715_v8  ;;  %vm1137_vm5 = vcmp.eq.s32.totalorder %v3745_v19, %v3715_v8 }
  0x35   : > { %v2105_v55 = vadd.f32 %v3286_v37, %v1847_v50  ;;  %v813_v56 = vadd.f32 %v2964_v54, %v2900_v52  ;;  %v3028_v57 = vsel %vm879_vm4, 1.0, %v3578_v27  ;;  %v3092_v58 = vsel %vm1137_vm5, 1.0, %v3578_v27 }
  0x36   : > { %v1621_v59 = vadd.f32 %v3190_v46, %v1363_v53  ;;  %vm1395_vm0 = vcmp.eq.s32.totalorder %v3750_v21, %v3715_v8  ;;  %vm1653_vm6 = vcmp.eq.s32.totalorder %v3755_v23, %v3715_v8  ;;  %vm1911_vm7 = vcmp.eq.s32.totalorder %v3760_v25, %v3715_v8 }
  0x37   : > { %v2363_v60 = vadd.f32 %v3350_v40, %v2105_v55  ;;  %v3382_v61 = vsel %vm2203_vm1, 1.0, %v3578_v27  ;;  %v1071_v62 = vadd.f32 %v3028_v57, %v813_v56  ;;  %v3156_v63 = vsel %vm1395_vm0, 1.0, %v3578_v27 }
  0x38   : > { %v1879_v0 = vadd.f32 %v3254_v47, %v1621_v59  ;;  %v3220_v5 = vsel %vm1653_vm6, 1.0, %v3578_v27  ;;  %v3284_v28 = vsel %vm1911_vm7, 1.0, %v3578_v27  ;;  %vm395_vm8 = vcmp.eq.s32.totalorder %v3723_v11, %v3718_v9 }
  0x39   : > { %2631 = vmatpush.msra.mxu2 %v2363_v60  ;;  %v1329_v29 = vadd.f32 %v3092_v58, %v1071_v62  ;;  %vm2169_vm9 = vcmp.eq.s32.totalorder %v3764_v26, %v3715_v8  ;;  %v2932_v30 = vsel %vm395_vm8, 1.0, %v3578_v27  ;;  %vm653_vm10 = vcmp.eq.s32.totalorder %v3734_v15, %v3718_v9 }
  0x3a   : > { %v2137_v32 = vadd.f32 %v3318_v49, %v1879_v0  ;;  %v2996_v33 = vsel %vm653_vm10, 1.0, %v3578_v27  ;;  %vm911_vm11 = vcmp.eq.s32.totalorder %v3739_v17, %v3718_v9  ;;  %vm1169_vm12 = vcmp.eq.s32.totalorder %v3745_v19, %v3718_v9 }
  0x3b   : > { %v1587_v34 = vadd.f32 %v3156_v63, %v1329_v29  ;;  %v845_v35 = vadd.f32 %v2996_v33, %v2932_v30  ;;  %v3060_v36 = vsel %vm911_vm11, 1.0, %v3578_v27  ;;  %v3124_v37 = vsel %vm1169_vm12, 1.0, %v3578_v27 }
  0x3c   : > { %v2395_v38 = vadd.f32 %v3382_v61, %v2137_v32  ;;  %vm1427_vm13 = vcmp.eq.s32.totalorder %v3750_v21, %v3718_v9  ;;  %vm1685_vm14 = vcmp.eq.s32.totalorder %v3755_v23, %v3718_v9  ;;  %vm1943_vm15 = vcmp.eq.s32.totalorder %v3760_v25, %v3718_v9 }
  0x3d   : > { %v3865_v39 = vperm.slane %v3706_v4, 7  ;;  %v1845_v40 = vadd.f32 %v3220_v5, %v1587_v34  ;;  %v3348_v41 = vsel %vm2169_vm9, 1.0, %v3578_v27  ;;  %v1103_v42 = vadd.f32 %v3060_v36, %v845_v35 }
  0x3e   : > { %v2588_v43 = vadd.f32 %v2524_v51, %v2395_v38  ;;  %v3188_v44 = vsel %vm1427_vm13, 1.0, %v3578_v27  ;;  %v3252_v45 = vsel %vm1685_vm14, 1.0, %v3578_v27  ;;  %v3316_v46 = vsel %vm1943_vm15, 1.0, %v3578_v27 }
  0x3f   : > { %v2103_v47 = vadd.f32 %v3284_v28, %v1845_v40  ;;  %v1361_v48 = vadd.f32 %v3124_v37, %v1103_v42  ;;  %vm2201_vm1 = vcmp.eq.s32.totalorder %v3764_v26, %v3718_v9  ;;  %vm2457_vm2 = vcmp.eq.s32.totalorder %v3718_v9, %v3712_v7 }
  0x40   : > { %2651 = vmatpush.msra.mxu3 %v2588_v43  ;;  %vm361_vm3 = vcmp.eq.s32.totalorder %v3723_v11, %v3726_v12  ;;  %vm619_vm4 = vcmp.eq.s32.totalorder %v3734_v15, %v3726_v12  ;;  %vm877_vm5 = vcmp.eq.s32.totalorder %v3739_v17, %v3726_v12  ;;  %vm1135_vm0 = vcmp.eq.s32.totalorder %v3745_v19, %v3726_v12 }
  0x41   : > { %v2361_v4 = vadd.f32 %v3348_v41, %v2103_v47  ;;  %v1619_v49 = vadd.f32 %v3188_v44, %v1361_v48  ;;  %v2898_v50 = vsel %vm361_vm3, 1.0, %v3578_v27  ;;  %v2962_v51 = vsel %vm619_vm4, 1.0, %v3578_v27 }
  0x42   : > { %v3380_v52 = vsel %vm2201_vm1, 1.0, %v3578_v27  ;;  %v811_v53 = vadd.f32 %v2962_v51, %v2898_v50  ;;  %v3026_v54 = vsel %vm877_vm5, 1.0, %v3578_v27  ;;  %vm1393_vm6 = vcmp.eq.s32.totalorder %v3750_v21, %v3726_v12 }
  0x43   : > { %2632 = vmatpush.msra.mxu2 %v2361_v4  ;;  %v1877_v55 = vadd.f32 %v3252_v45, %v1619_v49  ;;  %v2522_v56 = vsel %vm2457_vm2, %v3777_v31, 0.0  ;;  %v3090_v57 = vsel %vm1135_vm0, 1.0, %v3578_v27  ;;  %vm1651_vm7 = vcmp.eq.s32.totalorder %v3755_v23, %v3726_v12 }
  0x44   : > { %v1069_v58 = vadd.f32 %v3026_v54, %v811_v53  ;;  %v3154_v59 = vsel %vm1393_vm6, 1.0, %v3578_v27  ;;  %v3218_v60 = vsel %vm1651_vm7, 1.0, %v3578_v27  ;;  %vm1909_vm8 = vcmp.eq.s32.totalorder %v3760_v25, %v3726_v12 }
  0x45   : > { %v2135_v61 = vadd.f32 %v3316_v46, %v1877_v55  ;;  %vm2167_vm9 = vcmp.eq.s32.totalorder %v3764_v26, %v3726_v12  ;;  %vm393_vm10 = vcmp.eq.s32.totalorder %v3723_v11, %v3729_v13  ;;  %vm651_vm11 = vcmp.eq.s32.totalorder %v3734_v15, %v3729_v13 }
  0x46   : > { %v1327_v62 = vadd.f32 %v3090_v57, %v1069_v58  ;;  %v2930_v63 = vsel %vm393_vm10, 1.0, %v3578_v27  ;;  %v2994_v0 = vsel %vm651_vm11, 1.0, %v3578_v27  ;;  %vm909_vm12 = vcmp.eq.s32.totalorder %v3739_v17, %v3729_v13 }
  0x47   : > { %v2393_v5 = vadd.f32 %v3380_v52, %v2135_v61  ;;  %v843_v28 = vadd.f32 %v2994_v0, %v2930_v63  ;;  %v3058_v29 = vsel %vm909_vm12, 1.0, %v3578_v27  ;;  %vm1167_vm13 = vcmp.eq.s32.totalorder %v3745_v19, %v3729_v13 }
  0x48   : > { %v1585_v30 = vadd.f32 %v3154_v59, %v1327_v62  ;;  %v3122_v32 = vsel %vm1167_vm13, 1.0, %v3578_v27  ;;  %vm1425_vm14 = vcmp.eq.s32.totalorder %v3750_v21, %v3729_v13  ;;  %vm1683_vm15 = vcmp.eq.s32.totalorder %v3755_v23, %v3729_v13 }
  0x49   : > { %v2586_v33 = vadd.f32 %v2522_v56, %v2393_v5  ;;  %v3282_v34 = vsel %vm1909_vm8, 1.0, %v3578_v27  ;;  %v3346_v35 = vsel %vm2167_vm9, 1.0, %v3578_v27  ;;  %v1101_v36 = vadd.f32 %v3058_v29, %v843_v28 }
  0x4a   : > { %v1843_v37 = vadd.f32 %v3218_v60, %v1585_v30  ;;  %v3186_v38 = vsel %vm1425_vm14, 1.0, %v3578_v27  ;;  %v3250_v40 = vsel %vm1683_vm15, 1.0, %v3578_v27  ;;  %vm1941_vm1 = vcmp.eq.s32.totalorder %v3760_v25, %v3729_v13 }
  0x4b   : > { %2652 = vmatpush.msra.mxu3 %v2586_v33  ;;  %v1359_v41 = vadd.f32 %v3122_v32, %v1101_v36  ;;  %v3314_v42 = vsel %vm1941_vm1, 1.0, %v3578_v27  ;;  %vm2199_vm2 = vcmp.eq.s32.totalorder %v3764_v26, %v3729_v13  ;;  %vm2455_vm3 = vcmp.eq.s32.totalorder %v3729_v13, %v3712_v7 }
  0x4c   : > { %v2101_v43 = vadd.f32 %v3282_v34, %v1843_v37  ;;  %vm364_vm4 = vcmp.eq.s32.totalorder %v3721_v10, %v3704_v3  ;;  %vm622_vm5 = vcmp.eq.s32.totalorder %v3732_v14, %v3704_v3  ;;  %vm880_vm0 = vcmp.eq.s32.totalorder %v3737_v16, %v3704_v3 }
  0x4d   : > { %v1617_v44 = vadd.f32 %v3186_v38, %v1359_v41  ;;  %v2901_v45 = vsel %vm364_vm4, 1.0, %v3578_v27  ;;  %v2965_v46 = vsel %vm622_vm5, 1.0, %v3578_v27  ;;  %v3029_v47 = vsel %vm880_vm0, 1.0, %v3578_v27 }
  0x4e   : > { %v2359_v48 = vadd.f32 %v3346_v35, %v2101_v43  ;;  %v814_v4 = vadd.f32 %v2965_v46, %v2901_v45  ;;  %vm1138_vm6 = vcmp.eq.s32.totalorder %v3743_v18, %v3704_v3  ;;  %vm1396_vm7 = vcmp.eq.s32.totalorder %v3748_v20, %v3704_v3 }
  0x4f   : > { %v1875_v49 = vadd.f32 %v3250_v40, %v1617_v44  ;;  %v3378_v50 = vsel %vm2199_vm2, 1.0, %v3578_v27  ;;  %v3093_v51 = vsel %vm1138_vm6, 1.0, %v3578_v27  ;;  %vm1654_vm8 = vcmp.eq.s32.totalorder %v3753_v22, %v3704_v3 }
  0x50   : > { %2633 = vmatpush.msra.mxu2 %v2359_v48  ;;  %v2520_v52 = vsel %vm2455_vm3, %v3777_v31, 0.0  ;;  %v1072_v53 = vadd.f32 %v3029_v47, %v814_v4  ;;  %v3157_v54 = vsel %vm1396_vm7, 1.0, %v3578_v27  ;;  %vm1912_vm9 = vcmp.eq.s32.totalorder %v3758_v24, %v3704_v3 }
  0x51   : > { %v2133_v55 = vadd.f32 %v3314_v42, %v1875_v49  ;;  %v3221_v56 = vsel %vm1654_vm8, 1.0, %v3578_v27  ;;  %v3285_v57 = vsel %vm1912_vm9, 1.0, %v3578_v27  ;;  %vm2170_vm10 = vcmp.eq.s32.totalorder %v3865_v39, %v3704_v3 }
  0x52   : > { %v1330_v58 = vadd.f32 %v3093_v51, %v1072_v53  ;;  %vm2426_vm11 = vcmp.eq.s32.totalorder %v3704_v3, %v3701_v2  ;;  %vm396_vm12 = vcmp.eq.s32.totalorder %v3721_v10, %v3709_v6  ;;  %vm654_vm13 = vcmp.eq.s32.totalorder %v3732_v14, %v3709_v6 }
  0x53   : > { %v2391_v59 = vadd.f32 %v3378_v50, %v2133_v55  ;;  %v2933_v60 = vsel %vm396_vm12, 1.0, %v3578_v27  ;;  %v2997_v61 = vsel %vm654_vm13, 1.0, %v3578_v27  ;;  %vm912_vm14 = vcmp.eq.s32.totalorder %v3737_v16, %v3709_v6 }
  0x54   : > { %v1588_v62 = vadd.f32 %v3157_v54, %v1330_v58  ;;  %v846_v63 = vadd.f32 %v2997_v61, %v2933_v60  ;;  %v3061_v0 = vsel %vm912_vm14, 1.0, %v3578_v27  ;;  %vm1170_vm15 = vcmp.eq.s32.totalorder %v3743_v18, %v3709_v6 }
  0x55   : > { %v2584_v5 = vadd.f32 %v2520_v52, %v2391_v59  ;;  %v3125_v28 = vsel %vm1170_vm15, 1.0, %v3578_v27  ;;  %vm1428_vm1 = vcmp.eq.s32.totalorder %v3748_v20, %v3709_v6  ;;  %vm1686_vm2 = vcmp.eq.s32.totalorder %v3753_v22, %v3709_v6 }
  0x56   : > { %v1846_v29 = vadd.f32 %v3221_v56, %v1588_v62  ;;  %v3349_v30 = vsel %vm2170_vm10, 1.0, %v3578_v27  ;;  %v2491_v32 = vsel %vm2426_vm11, %v3777_v31, 0.0  ;;  %v1104_v33 = vadd.f32 %v3061_v0, %v846_v63 }
  0x57   : > { %2653 = vmatpush.msra.mxu3 %v2584_v5  ;;  %v3189_v34 = vsel %vm1428_vm1, 1.0, %v3578_v27  ;;  %v3253_v35 = vsel %vm1686_vm2, 1.0, %v3578_v27  ;;  %vm1944_vm3 = vcmp.eq.s32.totalorder %v3758_v24, %v3709_v6  ;;  %v3997_v36 = vadd.s32 96, %v3699_v1 }
  0x58   : > { %v2104_v37 = vadd.f32 %v3285_v57, %v1846_v29  ;;  %v1362_v38 = vadd.f32 %v3125_v28, %v1104_v33  ;;  %vm2202_vm4 = vcmp.eq.s32.totalorder %v3865_v39, %v3709_v6  ;;  %v4002_v3 = vadd.s32 224, %v3699_v1 }
  0x59   : > { %vm359_vm5 = vcmp.eq.s32.totalorder %v3723_v11, %v3997_v36  ;;  %vm617_vm0 = vcmp.eq.s32.totalorder %v3734_v15, %v3997_v36  ;;  %vm875_vm6 = vcmp.eq.s32.totalorder %v3739_v17, %v3997_v36  ;;  %vm1133_vm7 = vcmp.eq.s32.totalorder %v3745_v19, %v3997_v36 }
  0x5a   : > { %v2362_v40 = vadd.f32 %v3349_v30, %v2104_v37  ;;  %v1620_v41 = vadd.f32 %v3189_v34, %v1362_v38  ;;  %v2896_v42 = vsel %vm359_vm5, 1.0, %v3578_v27  ;;  %v2960_v43 = vsel %vm617_vm0, 1.0, %v3578_v27 }
  0x5b   : > { %v3317_v44 = vsel %vm1944_vm3, 1.0, %v3578_v27  ;;  %v809_v45 = vadd.f32 %v2960_v43, %v2896_v42  ;;  %v3024_v46 = vsel %vm875_vm6, 1.0, %v3578_v27  ;;  %vm1391_vm8 = vcmp.eq.s32.totalorder %v3750_v21, %v3997_v36 }
  0x5c   : > { %v2555_v47 = vadd.f32 %v2491_v32, %v2362_v40  ;;  %v1878_v48 = vadd.f32 %v3253_v35, %v1620_v41  ;;  %v3088_v4 = vsel %vm1133_vm7, 1.0, %v3578_v27  ;;  %vm1649_vm9 = vcmp.eq.s32.totalorder %v3755_v23, %v3997_v36 }
  0x5d   : > { %v3381_v49 = vsel %vm2202_vm4, 1.0, %v3578_v27  ;;  %v1067_v50 = vadd.f32 %v3024_v46, %v809_v45  ;;  %v3152_v51 = vsel %vm1391_vm8, 1.0, %v3578_v27  ;;  %v3216_v52 = vsel %vm1649_vm9, 1.0, %v3578_v27 }
  0x5e   : > { %2591 = vmatpush.msra.mxu0 %v2555_v47  ;;  %v2136_v53 = vadd.f32 %v3317_v44, %v1878_v48  ;;  %vm1907_vm10 = vcmp.eq.s32.totalorder %v3760_v25, %v3997_v36  ;;  %vm2165_vm11 = vcmp.eq.s32.totalorder %v3764_v26, %v3997_v36  ;;  %vm391_vm12 = vcmp.eq.s32.totalorder %v3723_v11, %v4002_v3 }
  0x5f   : > { %v1325_v54 = vadd.f32 %v3088_v4, %v1067_v50  ;;  %v2928_v6 = vsel %vm391_vm12, 1.0, %v3578_v27  ;;  %vm649_vm13 = vcmp.eq.s32.totalorder %v3734_v15, %v4002_v3  ;;  %vm907_vm14 = vcmp.eq.s32.totalorder %v3739_v17, %v4002_v3 }
  0x60   : > { %v2394_v55 = vadd.f32 %v3381_v49, %v2136_v53  ;;  %v2992_v56 = vsel %vm649_vm13, 1.0, %v3578_v27  ;;  %v3056_v57 = vsel %vm907_vm14, 1.0, %v3578_v27  ;;  %vm1165_vm15 = vcmp.eq.s32.totalorder %v3745_v19, %v4002_v3 }
  0x61   : > { %v1583_v58 = vadd.f32 %v3152_v51, %v1325_v54  ;;  %v3280_v59 = vsel %vm1907_vm10, 1.0, %v3578_v27  ;;  %v841_v60 = vadd.f32 %v2992_v56, %v2928_v6  ;;  %vm1423_vm1 = vcmp.eq.s32.totalorder %v3750_v21, %v4002_v3 }
  0x62   : > { %2611 = vmatpush.msra.mxu1 %v2394_v55  ;;  %v3344_v61 = vsel %vm2165_vm11, 1.0, %v3578_v27  ;;  %v3120_v62 = vsel %vm1165_vm15, 1.0, %v3578_v27  ;;  %vm1681_vm2 = vcmp.eq.s32.totalorder %v3755_v23, %v4002_v3  ;;  %vm1939_vm3 = vcmp.eq.s32.totalorder %v3760_v25, %v4002_v3 }
  0x63   : > { %v1841_v63 = vadd.f32 %v3216_v52, %v1583_v58  ;;  %v1099_v0 = vadd.f32 %v3056_v57, %v841_v60  ;;  %v3184_v5 = vsel %vm1423_vm1, 1.0, %v3578_v27  ;;  %vm2197_vm4 = vcmp.eq.s32.totalorder %v3764_v26, %v4002_v3 }
  0x64   : > { %v3248_v28 = vsel %vm1681_vm2, 1.0, %v3578_v27  ;;  %v3312_v29 = vsel %vm1939_vm3, 1.0, %v3578_v27  ;;  %vm362_vm5 = vcmp.eq.s32.totalorder %v3721_v10, %v3715_v8  ;;  %vm620_vm0 = vcmp.eq.s32.totalorder %v3732_v14, %v3715_v8 }
  0x65   : > { %v2099_v30 = vadd.f32 %v3280_v59, %v1841_v63  ;;  %v1357_v32 = vadd.f32 %v3120_v62, %v1099_v0  ;;  %vm2453_vm6 = vcmp.eq.s32.totalorder %v4002_v3, %v3712_v7  ;;  %v2899_v33 = vsel %vm362_vm5, 1.0, %v3578_v27 }
  0x66   : > { %v2963_v34 = vsel %vm620_vm0, 1.0, %v3578_v27  ;;  %vm878_vm7 = vcmp.eq.s32.totalorder %v3737_v16, %v3715_v8  ;;  %vm1136_vm8 = vcmp.eq.s32.totalorder %v3743_v18, %v3715_v8  ;;  %vm1394_vm9 = vcmp.eq.s32.totalorder %v3748_v20, %v3715_v8 }
  0x67   : > { %v2357_v35 = vadd.f32 %v3344_v61, %v2099_v30  ;;  %v1615_v37 = vadd.f32 %v3184_v5, %v1357_v32  ;;  %v812_v38 = vadd.f32 %v2963_v34, %v2899_v33  ;;  %v3027_v40 = vsel %vm878_vm7, 1.0, %v3578_v27 }
  0x68   : > { %v3376_v41 = vsel %vm2197_vm4, 1.0, %v3578_v27  ;;  %v3091_v42 = vsel %vm1136_vm8, 1.0, %v3578_v27  ;;  %vm1652_vm10 = vcmp.eq.s32.totalorder %v3753_v22, %v3715_v8  ;;  %vm1910_vm11 = vcmp.eq.s32.totalorder %v3758_v24, %v3715_v8 }
  0x69   : > { %2634 = vmatpush.msra.mxu2 %v2357_v35  ;;  %v1873_v43 = vadd.f32 %v3248_v28, %v1615_v37  ;;  %v2518_v44 = vsel %vm2453_vm6, %v3777_v31, 0.0  ;;  %v1070_v45 = vadd.f32 %v3027_v40, %v812_v38  ;;  %v3155_v46 = vsel %vm1394_vm9, 1.0, %v3578_v27 }
  0x6a   : > { %v3219_v47 = vsel %vm1652_vm10, 1.0, %v3578_v27  ;;  %v3283_v48 = vsel %vm1910_vm11, 1.0, %v3578_v27  ;;  %vm394_vm12 = vcmp.eq.s32.totalorder %v3721_v10, %v3718_v9  ;;  %vm652_vm13 = vcmp.eq.s32.totalorder %v3732_v14, %v3718_v9 }
  0x6b   : > { %v2131_v4 = vadd.f32 %v3312_v29, %v1873_v43  ;;  %v1328_v49 = vadd.f32 %v3091_v42, %v1070_v45  ;;  %vm2168_vm14 = vcmp.eq.s32.totalorder %v3865_v39, %v3715_v8  ;;  %vm2424_vm15 = vcmp.eq.s32.totalorder %v3715_v8, %v3701_v2 }
  0x6c   : > { %v2931_v50 = vsel %vm394_vm12, 1.0, %v3578_v27  ;;  %v2995_v51 = vsel %vm652_vm13, 1.0, %v3578_v27  ;;  %vm910_vm1 = vcmp.eq.s32.totalorder %v3737_v16, %v3718_v9  ;;  %vm1168_vm2 = vcmp.eq.s32.totalorder %v3743_v18, %v3718_v9 }
  0x6d   : > { %v2389_v52 = vadd.f32 %v3376_v41, %v2131_v4  ;;  %v1586_v53 = vadd.f32 %v3155_v46, %v1328_v49  ;;  %v844_v54 = vadd.f32 %v2995_v51, %v2931_v50  ;;  %v3059_v6 = vsel %vm910_vm1, 1.0, %v3578_v27 }
  0x6e   : > { %v3347_v55 = vsel %vm2168_vm14, 1.0, %v3578_v27  ;;  %v3123_v56 = vsel %vm1168_vm2, 1.0, %v3578_v27  ;;  %vm1426_vm3 = vcmp.eq.s32.totalorder %v3748_v20, %v3718_v9  ;;  %vm1684_vm4 = vcmp.eq.s32.totalorder %v3753_v22, %v3718_v9 }
  0x6f   : > { %v2582_v8 = vadd.f32 %v2518_v44, %v2389_v52  ;;  %v1844_v57 = vadd.f32 %v3219_v47, %v1586_v53  ;;  %v2489_v58 = vsel %vm2424_vm15, %v3777_v31, 0.0  ;;  %v1102_v59 = vadd.f32 %v3059_v6, %v844_v54 }
  0x70   : > { %v3187_v60 = vsel %vm1426_vm3, 1.0, %v3578_v27  ;;  %v3251_v61 = vsel %vm1684_vm4, 1.0, %v3578_v27  ;;  %vm1942_vm5 = vcmp.eq.s32.totalorder %v3758_v24, %v3718_v9  ;;  %v4114_v62 = vadd.s32 88, %v3699_v1 }
  0x71   : > { %2654 = vmatpush.msra.mxu3 %v2582_v8  ;;  %v2102_v63 = vadd.f32 %v3283_v48, %v1844_v57  ;;  %v1360_v0 = vadd.f32 %v3123_v56, %v1102_v59  ;;  %vm2200_vm0 = vcmp.eq.s32.totalorder %v3865_v39, %v3718_v9  ;;  %v4119_v5 = vadd.s32 216, %v3699_v1 }
  0x72   : > { %vm357_vm6 = vcmp.eq.s32.totalorder %v3723_v11, %v4114_v62  ;;  %vm615_vm7 = vcmp.eq.s32.totalorder %v3734_v15, %v4114_v62  ;;  %vm873_vm8 = vcmp.eq.s32.totalorder %v3739_v17, %v4114_v62  ;;  %vm1131_vm9 = vcmp.eq.s32.totalorder %v3745_v19, %v4114_v62 }
  0x73   : > { %v2360_v28 = vadd.f32 %v3347_v55, %v2102_v63  ;;  %v1618_v29 = vadd.f32 %v3187_v60, %v1360_v0  ;;  %v2894_v30 = vsel %vm357_vm6, 1.0, %v3578_v27  ;;  %v2958_v32 = vsel %vm615_vm7, 1.0, %v3578_v27 }
  0x74   : > { %v3315_v33 = vsel %vm1942_vm5, 1.0, %v3578_v27  ;;  %v807_v34 = vadd.f32 %v2958_v32, %v2894_v30  ;;  %v3022_v35 = vsel %vm873_vm8, 1.0, %v3578_v27  ;;  %vm1389_vm10 = vcmp.eq.s32.totalorder %v3750_v21, %v4114_v62 }
  0x75   : > { %v2553_v37 = vadd.f32 %v2489_v58, %v2360_v28  ;;  %v1876_v38 = vadd.f32 %v3251_v61, %v1618_v29  ;;  %v3086_v40 = vsel %vm1131_vm9, 1.0, %v3578_v27  ;;  %vm1647_vm11 = vcmp.eq.s32.totalorder %v3755_v23, %v4114_v62 }
  0x76   : > { %v3379_v41 = vsel %vm2200_vm0, 1.0, %v3578_v27  ;;  %v1065_v42 = vadd.f32 %v3022_v35, %v807_v34  ;;  %v3150_v43 = vsel %vm1389_vm10, 1.0, %v3578_v27  ;;  %v3214_v44 = vsel %vm1647_vm11, 1.0, %v3578_v27 }
  0x77   : > { %2592 = vmatpush.msra.mxu0 %v2553_v37  ;;  %v2134_v45 = vadd.f32 %v3315_v33, %v1876_v38  ;;  %vm1905_vm12 = vcmp.eq.s32.totalorder %v3760_v25, %v4114_v62  ;;  %vm2163_vm13 = vcmp.eq.s32.totalorder %v3764_v26, %v4114_v62  ;;  %vm389_vm14 = vcmp.eq.s32.totalorder %v3723_v11, %v4119_v5 }
  0x78   : > { %v1323_v46 = vadd.f32 %v3086_v40, %v1065_v42  ;;  %v2926_v9 = vsel %vm389_vm14, 1.0, %v3578_v27  ;;  %vm647_vm15 = vcmp.eq.s32.totalorder %v3734_v15, %v4119_v5  ;;  %vm905_vm1 = vcmp.eq.s32.totalorder %v3739_v17, %v4119_v5 }
  0x79   : > { %v2392_v47 = vadd.f32 %v3379_v41, %v2134_v45  ;;  %v2990_v48 = vsel %vm647_vm15, 1.0, %v3578_v27  ;;  %v3054_v4 = vsel %vm905_vm1, 1.0, %v3578_v27  ;;  %vm1163_vm2 = vcmp.eq.s32.totalorder %v3745_v19, %v4119_v5 }
  0x7a   : > { %v1581_v49 = vadd.f32 %v3150_v43, %v1323_v46  ;;  %v3278_v50 = vsel %vm1905_vm12, 1.0, %v3578_v27  ;;  %v839_v51 = vadd.f32 %v2990_v48, %v2926_v9  ;;  %vm1421_vm3 = vcmp.eq.s32.totalorder %v3750_v21, %v4119_v5 }
  0x7b   : > { %2612 = vmatpush.msra.mxu1 %v2392_v47  ;;  %v3342_v52 = vsel %vm2163_vm13, 1.0, %v3578_v27  ;;  %v3118_v53 = vsel %vm1163_vm2, 1.0, %v3578_v27  ;;  %vm1679_vm4 = vcmp.eq.s32.totalorder %v3755_v23, %v4119_v5  ;;  %vm1937_vm5 = vcmp.eq.s32.totalorder %v3760_v25, %v4119_v5 }
  0x7c   : > { %v1839_v54 = vadd.f32 %v3214_v44, %v1581_v49  ;;  %v1097_v6 = vadd.f32 %v3054_v4, %v839_v51  ;;  %v3182_v55 = vsel %vm1421_vm3, 1.0, %v3578_v27  ;;  %vm2195_vm0 = vcmp.eq.s32.totalorder %v3764_v26, %v4119_v5 }
  0x7d   : > { %v3246_v56 = vsel %vm1679_vm4, 1.0, %v3578_v27  ;;  %v3310_v8 = vsel %vm1937_vm5, 1.0, %v3578_v27  ;;  %vm360_vm6 = vcmp.eq.s32.totalorder %v3721_v10, %v3726_v12  ;;  %vm618_vm7 = vcmp.eq.s32.totalorder %v3732_v14, %v3726_v12 }
  0x7e   : > { %v2097_v57 = vadd.f32 %v3278_v50, %v1839_v54  ;;  %v1355_v58 = vadd.f32 %v3118_v53, %v1097_v6  ;;  %vm2451_vm8 = vcmp.eq.s32.totalorder %v4119_v5, %v3712_v7  ;;  %v2897_v59 = vsel %vm360_vm6, 1.0, %v3578_v27 }
  0x7f   : > { %v2961_v60 = vsel %vm618_vm7, 1.0, %v3578_v27  ;;  %vm876_vm9 = vcmp.eq.s32.totalorder %v3737_v16, %v3726_v12  ;;  %vm1134_vm10 = vcmp.eq.s32.totalorder %v3743_v18, %v3726_v12  ;;  %vm1392_vm11 = vcmp.eq.s32.totalorder %v3748_v20, %v3726_v12 }
  0x80   : > { %v2355_v61 = vadd.f32 %v3342_v52, %v2097_v57  ;;  %v1613_v63 = vadd.f32 %v3182_v55, %v1355_v58  ;;  %v810_v0 = vadd.f32 %v2961_v60, %v2897_v59  ;;  %v3025_v28 = vsel %vm876_vm9, 1.0, %v3578_v27 }
  0x81   : > { %v3374_v29 = vsel %vm2195_vm0, 1.0, %v3578_v27  ;;  %v3089_v30 = vsel %vm1134_vm10, 1.0, %v3578_v27  ;;  %vm1650_vm12 = vcmp.eq.s32.totalorder %v3753_v22, %v3726_v12  ;;  %vm1908_vm13 = vcmp.eq.s32.totalorder %v3758_v24, %v3726_v12 }
  0x82   : > { %2635 = vmatpush.msra.mxu2 %v2355_v61  ;;  %v1871_v32 = vadd.f32 %v3246_v56, %v1613_v63  ;;  %v2516_v33 = vsel %vm2451_vm8, %v3777_v31, 0.0  ;;  %v1068_v34 = vadd.f32 %v3025_v28, %v810_v0  ;;  %v3153_v35 = vsel %vm1392_vm11, 1.0, %v3578_v27 }
  0x83   : > { %v3217_v37 = vsel %vm1650_vm12, 1.0, %v3578_v27  ;;  %v3281_v38 = vsel %vm1908_vm13, 1.0, %v3578_v27  ;;  %vm392_vm14 = vcmp.eq.s32.totalorder %v3721_v10, %v3729_v13  ;;  %vm650_vm15 = vcmp.eq.s32.totalorder %v3732_v14, %v3729_v13 }
  0x84   : > { %v2129_v40 = vadd.f32 %v3310_v8, %v1871_v32  ;;  %v1326_v41 = vadd.f32 %v3089_v30, %v1068_v34  ;;  %vm2166_vm1 = vcmp.eq.s32.totalorder %v3865_v39, %v3726_v12  ;;  %vm2422_vm2 = vcmp.eq.s32.totalorder %v3726_v12, %v3701_v2 }
  0x85   : > { %v2929_v42 = vsel %vm392_vm14, 1.0, %v3578_v27  ;;  %v2993_v43 = vsel %vm650_vm15, 1.0, %v3578_v27  ;;  %vm908_vm3 = vcmp.eq.s32.totalorder %v3737_v16, %v3729_v13  ;;  %vm1166_vm4 = vcmp.eq.s32.totalorder %v3743_v18, %v3729_v13 }
  0x86   : > { %v2387_v44 = vadd.f32 %v3374_v29, %v2129_v40  ;;  %v1584_v45 = vadd.f32 %v3153_v35, %v1326_v41  ;;  %v842_v46 = vadd.f32 %v2993_v43, %v2929_v42  ;;  %v3057_v9 = vsel %vm908_vm3, 1.0, %v3578_v27 }
  0x87   : > { %v3345_v47 = vsel %vm2166_vm1, 1.0, %v3578_v27  ;;  %v3121_v48 = vsel %vm1166_vm4, 1.0, %v3578_v27  ;;  %vm1424_vm5 = vcmp.eq.s32.totalorder %v3748_v20, %v3729_v13  ;;  %vm1682_vm0 = vcmp.eq.s32.totalorder %v3753_v22, %v3729_v13 }
  0x88   : > { %v2580_v12 = vadd.f32 %v2516_v33, %v2387_v44  ;;  %v1842_v4 = vadd.f32 %v3217_v37, %v1584_v45  ;;  %v2487_v49 = vsel %vm2422_vm2, %v3777_v31, 0.0  ;;  %v1100_v50 = vadd.f32 %v3057_v9, %v842_v46 }
  0x89   : > { %v3185_v51 = vsel %vm1424_vm5, 1.0, %v3578_v27  ;;  %v3249_v52 = vsel %vm1682_vm0, 1.0, %v3578_v27  ;;  %vm1940_vm6 = vcmp.eq.s32.totalorder %v3758_v24, %v3729_v13  ;;  %v4231_v53 = vadd.s32 80, %v3699_v1 }
  0x8a   : > { %2655 = vmatpush.msra.mxu3 %v2580_v12  ;;  %v2100_v54 = vadd.f32 %v3281_v38, %v1842_v4  ;;  %v1358_v6 = vadd.f32 %v3121_v48, %v1100_v50  ;;  %vm2198_vm7 = vcmp.eq.s32.totalorder %v3865_v39, %v3729_v13  ;;  %v4236_v55 = vadd.s32 208, %v3699_v1 }
  0x8b   : > { %vm355_vm8 = vcmp.eq.s32.totalorder %v3723_v11, %v4231_v53  ;;  %vm613_vm9 = vcmp.eq.s32.totalorder %v3734_v15, %v4231_v53  ;;  %vm871_vm10 = vcmp.eq.s32.totalorder %v3739_v17, %v4231_v53  ;;  %vm1129_vm11 = vcmp.eq.s32.totalorder %v3745_v19, %v4231_v53 }
  0x8c   : > { %v2358_v56 = vadd.f32 %v3345_v47, %v2100_v54  ;;  %v1616_v8 = vadd.f32 %v3185_v51, %v1358_v6  ;;  %v2892_v57 = vsel %vm355_vm8, 1.0, %v3578_v27  ;;  %v2956_v58 = vsel %vm613_vm9, 1.0, %v3578_v27 }
  0x8d   : > { %v3313_v59 = vsel %vm1940_vm6, 1.0, %v3578_v27  ;;  %v805_v60 = vadd.f32 %v2956_v58, %v2892_v57  ;;  %v3020_v61 = vsel %vm871_vm10, 1.0, %v3578_v27  ;;  %vm1387_vm12 = vcmp.eq.s32.totalorder %v3750_v21, %v4231_v53 }
  0x8e   : > { %v2551_v63 = vadd.f32 %v2487_v49, %v2358_v56  ;;  %v1874_v0 = vadd.f32 %v3249_v52, %v1616_v8  ;;  %v3084_v28 = vsel %vm1129_vm11, 1.0, %v3578_v27  ;;  %vm1645_vm13 = vcmp.eq.s32.totalorder %v3755_v23, %v4231_v53 }
  0x8f   : > { %v3377_v29 = vsel %vm2198_vm7, 1.0, %v3578_v27  ;;  %v1063_v30 = vadd.f32 %v3020_v61, %v805_v60  ;;  %v3148_v32 = vsel %vm1387_vm12, 1.0, %v3578_v27  ;;  %v3212_v33 = vsel %vm1645_vm13, 1.0, %v3578_v27 }
  0x90   : > { %2593 = vmatpush.msra.mxu0 %v2551_v63  ;;  %v2132_v34 = vadd.f32 %v3313_v59, %v1874_v0  ;;  %vm1903_vm14 = vcmp.eq.s32.totalorder %v3760_v25, %v4231_v53  ;;  %vm2161_vm15 = vcmp.eq.s32.totalorder %v3764_v26, %v4231_v53  ;;  %vm387_vm1 = vcmp.eq.s32.totalorder %v3723_v11, %v4236_v55 }
  0x91   : > { %v1321_v35 = vadd.f32 %v3084_v28, %v1063_v30  ;;  %v2924_v13 = vsel %vm387_vm1, 1.0, %v3578_v27  ;;  %vm645_vm2 = vcmp.eq.s32.totalorder %v3734_v15, %v4236_v55  ;;  %vm903_vm3 = vcmp.eq.s32.totalorder %v3739_v17, %v4236_v55 }
  0x92   : > { %v2390_v37 = vadd.f32 %v3377_v29, %v2132_v34  ;;  %v2988_v38 = vsel %vm645_vm2, 1.0, %v3578_v27  ;;  %v3052_v40 = vsel %vm903_vm3, 1.0, %v3578_v27  ;;  %vm1161_vm4 = vcmp.eq.s32.totalorder %v3745_v19, %v4236_v55 }
  0x93   : > { %v1579_v41 = vadd.f32 %v3148_v32, %v1321_v35  ;;  %v3276_v42 = vsel %vm1903_vm14, 1.0, %v3578_v27  ;;  %v837_v43 = vadd.f32 %v2988_v38, %v2924_v13  ;;  %vm1419_vm5 = vcmp.eq.s32.totalorder %v3750_v21, %v4236_v55 }
  0x94   : > { %2613 = vmatpush.msra.mxu1 %v2390_v37  ;;  %v3340_v44 = vsel %vm2161_vm15, 1.0, %v3578_v27  ;;  %v3116_v45 = vsel %vm1161_vm4, 1.0, %v3578_v27  ;;  %vm1677_vm0 = vcmp.eq.s32.totalorder %v3755_v23, %v4236_v55  ;;  %vm1935_vm6 = vcmp.eq.s32.totalorder %v3760_v25, %v4236_v55 }
  0x95   : > { %v1837_v46 = vadd.f32 %v3212_v33, %v1579_v41  ;;  %v1095_v9 = vadd.f32 %v3052_v40, %v837_v43  ;;  %v3180_v47 = vsel %vm1419_vm5, 1.0, %v3578_v27  ;;  %vm2193_vm7 = vcmp.eq.s32.totalorder %v3764_v26, %v4236_v55 }
  0x96   : > { %v3244_v48 = vsel %vm1677_vm0, 1.0, %v3578_v27  ;;  %v3308_v12 = vsel %vm1935_vm6, 1.0, %v3578_v27  ;;  %vm358_vm8 = vcmp.eq.s32.totalorder %v3721_v10, %v3997_v36  ;;  %vm616_vm9 = vcmp.eq.s32.totalorder %v3732_v14, %v3997_v36 }
  0x97   : > { %v2095_v4 = vadd.f32 %v3276_v42, %v1837_v46  ;;  %v1353_v49 = vadd.f32 %v3116_v45, %v1095_v9  ;;  %vm2449_vm10 = vcmp.eq.s32.totalorder %v4236_v55, %v3712_v7  ;;  %v2895_v50 = vsel %vm358_vm8, 1.0, %v3578_v27 }
  0x98   : > { %v2959_v51 = vsel %vm616_vm9, 1.0, %v3578_v27  ;;  %vm874_vm11 = vcmp.eq.s32.totalorder %v3737_v16, %v3997_v36  ;;  %vm1132_vm12 = vcmp.eq.s32.totalorder %v3743_v18, %v3997_v36  ;;  %vm1390_vm13 = vcmp.eq.s32.totalorder %v3748_v20, %v3997_v36 }
  0x99   : > { %v2353_v52 = vadd.f32 %v3340_v44, %v2095_v4  ;;  %v1611_v54 = vadd.f32 %v3180_v47, %v1353_v49  ;;  %v808_v6 = vadd.f32 %v2959_v51, %v2895_v50  ;;  %v3023_v56 = vsel %vm874_vm11, 1.0, %v3578_v27 }
  0x9a   : > { %v3372_v8 = vsel %vm2193_vm7, 1.0, %v3578_v27  ;;  %v3087_v57 = vsel %vm1132_vm12, 1.0, %v3578_v27  ;;  %vm1648_vm14 = vcmp.eq.s32.totalorder %v3753_v22, %v3997_v36  ;;  %vm1906_vm15 = vcmp.eq.s32.totalorder %v3758_v24, %v3997_v36 }
  0x9b   : > { %2636 = vmatpush.msra.mxu2 %v2353_v52  ;;  %v1869_v58 = vadd.f32 %v3244_v48, %v1611_v54  ;;  %v2514_v59 = vsel %vm2449_vm10, %v3777_v31, 0.0  ;;  %v1066_v60 = vadd.f32 %v3023_v56, %v808_v6  ;;  %v3151_v61 = vsel %vm1390_vm13, 1.0, %v3578_v27 }
  0x9c   : > { %v3215_v63 = vsel %vm1648_vm14, 1.0, %v3578_v27  ;;  %v3279_v0 = vsel %vm1906_vm15, 1.0, %v3578_v27  ;;  %vm390_vm1 = vcmp.eq.s32.totalorder %v3721_v10, %v4002_v3  ;;  %vm648_vm2 = vcmp.eq.s32.totalorder %v3732_v14, %v4002_v3 }
  0x9d   : > { %v2127_v28 = vadd.f32 %v3308_v12, %v1869_v58  ;;  %v1324_v29 = vadd.f32 %v3087_v57, %v1066_v60  ;;  %vm2164_vm3 = vcmp.eq.s32.totalorder %v3865_v39, %v3997_v36  ;;  %vm2420_vm4 = vcmp.eq.s32.totalorder %v3997_v36, %v3701_v2 }
  0x9e   : > { %v2927_v30 = vsel %vm390_vm1, 1.0, %v3578_v27  ;;  %v2991_v32 = vsel %vm648_vm2, 1.0, %v3578_v27  ;;  %vm906_vm5 = vcmp.eq.s32.totalorder %v3737_v16, %v4002_v3  ;;  %vm1164_vm0 = vcmp.eq.s32.totalorder %v3743_v18, %v4002_v3 }
  0x9f   : > { %v2385_v33 = vadd.f32 %v3372_v8, %v2127_v28  ;;  %v1582_v34 = vadd.f32 %v3151_v61, %v1324_v29  ;;  %v840_v35 = vadd.f32 %v2991_v32, %v2927_v30  ;;  %v3055_v13 = vsel %vm906_vm5, 1.0, %v3578_v27 }
  0xa0   : > { %v3343_v37 = vsel %vm2164_vm3, 1.0, %v3578_v27  ;;  %v3119_v38 = vsel %vm1164_vm0, 1.0, %v3578_v27  ;;  %vm1422_vm6 = vcmp.eq.s32.totalorder %v3748_v20, %v4002_v3  ;;  %vm1680_vm7 = vcmp.eq.s32.totalorder %v3753_v22, %v4002_v3 }
  0xa1   : > { %v2578_v36 = vadd.f32 %v2514_v59, %v2385_v33  ;;  %v1840_v40 = vadd.f32 %v3215_v63, %v1582_v34  ;;  %v2485_v41 = vsel %vm2420_vm4, %v3777_v31, 0.0  ;;  %v1098_v42 = vadd.f32 %v3055_v13, %v840_v35 }
  0xa2   : > { %v3183_v43 = vsel %vm1422_vm6, 1.0, %v3578_v27  ;;  %v3247_v44 = vsel %vm1680_vm7, 1.0, %v3578_v27  ;;  %vm1938_vm8 = vcmp.eq.s32.totalorder %v3758_v24, %v4002_v3  ;;  %v4348_v45 = vadd.s32 72, %v3699_v1 }
  0xa3   : > { %2656 = vmatpush.msra.mxu3 %v2578_v36  ;;  %v2098_v46 = vadd.f32 %v3279_v0, %v1840_v40  ;;  %v1356_v9 = vadd.f32 %v3119_v38, %v1098_v42  ;;  %vm2196_vm9 = vcmp.eq.s32.totalorder %v3865_v39, %v4002_v3  ;;  %v4353_v47 = vadd.s32 200, %v3699_v1 }
  0xa4   : > { %vm353_vm10 = vcmp.eq.s32.totalorder %v3723_v11, %v4348_v45  ;;  %vm611_vm11 = vcmp.eq.s32.totalorder %v3734_v15, %v4348_v45  ;;  %vm869_vm12 = vcmp.eq.s32.totalorder %v3739_v17, %v4348_v45  ;;  %vm1127_vm13 = vcmp.eq.s32.totalorder %v3745_v19, %v4348_v45 }
  0xa5   : > { %v2356_v48 = vadd.f32 %v3343_v37, %v2098_v46  ;;  %v1614_v12 = vadd.f32 %v3183_v43, %v1356_v9  ;;  %v2890_v4 = vsel %vm353_vm10, 1.0, %v3578_v27  ;;  %v2954_v49 = vsel %vm611_vm11, 1.0, %v3578_v27 }
  0xa6   : > { %v3311_v50 = vsel %vm1938_vm8, 1.0, %v3578_v27  ;;  %v803_v51 = vadd.f32 %v2954_v49, %v2890_v4  ;;  %v3018_v52 = vsel %vm869_vm12, 1.0, %v3578_v27  ;;  %vm1385_vm14 = vcmp.eq.s32.totalorder %v3750_v21, %v4348_v45 }
  0xa7   : > { %v2549_v54 = vadd.f32 %v2485_v41, %v2356_v48  ;;  %v1872_v6 = vadd.f32 %v3247_v44, %v1614_v12  ;;  %v3082_v56 = vsel %vm1127_vm13, 1.0, %v3578_v27  ;;  %vm1643_vm15 = vcmp.eq.s32.totalorder %v3755_v23, %v4348_v45 }
  0xa8   : > { %v3375_v8 = vsel %vm2196_vm9, 1.0, %v3578_v27  ;;  %v1061_v57 = vadd.f32 %v3018_v52, %v803_v51  ;;  %v3146_v58 = vsel %vm1385_vm14, 1.0, %v3578_v27  ;;  %v3210_v59 = vsel %vm1643_vm15, 1.0, %v3578_v27 }
  0xa9   : > { %2594 = vmatpush.msra.mxu0 %v2549_v54  ;;  %v2130_v60 = vadd.f32 %v3311_v50, %v1872_v6  ;;  %vm1901_vm1 = vcmp.eq.s32.totalorder %v3760_v25, %v4348_v45  ;;  %vm2159_vm2 = vcmp.eq.s32.totalorder %v3764_v26, %v4348_v45  ;;  %vm385_vm3 = vcmp.eq.s32.totalorder %v3723_v11, %v4353_v47 }
  0xaa   : > { %v1319_v61 = vadd.f32 %v3082_v56, %v1061_v57  ;;  %v2922_v3 = vsel %vm385_vm3, 1.0, %v3578_v27  ;;  %vm643_vm4 = vcmp.eq.s32.totalorder %v3734_v15, %v4353_v47  ;;  %vm901_vm5 = vcmp.eq.s32.totalorder %v3739_v17, %v4353_v47 }
  0xab   : > { %v2388_v63 = vadd.f32 %v3375_v8, %v2130_v60  ;;  %v2986_v0 = vsel %vm643_vm4, 1.0, %v3578_v27  ;;  %v3050_v28 = vsel %vm901_vm5, 1.0, %v3578_v27  ;;  %vm1159_vm0 = vcmp.eq.s32.totalorder %v3745_v19, %v4353_v47 }
  0xac   : > { %v1577_v29 = vadd.f32 %v3146_v58, %v1319_v61  ;;  %v3274_v30 = vsel %vm1901_vm1, 1.0, %v3578_v27  ;;  %v835_v32 = vadd.f32 %v2986_v0, %v2922_v3  ;;  %vm1417_vm6 = vcmp.eq.s32.totalorder %v3750_v21, %v4353_v47 }
  0xad   : > { %2614 = vmatpush.msra.mxu1 %v2388_v63  ;;  %v3338_v33 = vsel %vm2159_vm2, 1.0, %v3578_v27  ;;  %v3114_v34 = vsel %vm1159_vm0, 1.0, %v3578_v27  ;;  %vm1675_vm7 = vcmp.eq.s32.totalorder %v3755_v23, %v4353_v47  ;;  %vm1933_vm8 = vcmp.eq.s32.totalorder %v3760_v25, %v4353_v47 }
  0xae   : > { %v1835_v35 = vadd.f32 %v3210_v59, %v1577_v29  ;;  %v1093_v13 = vadd.f32 %v3050_v28, %v835_v32  ;;  %v3178_v37 = vsel %vm1417_vm6, 1.0, %v3578_v27  ;;  %vm2191_vm9 = vcmp.eq.s32.totalorder %v3764_v26, %v4353_v47 }
  0xaf   : > { %v3242_v38 = vsel %vm1675_vm7, 1.0, %v3578_v27  ;;  %v3306_v36 = vsel %vm1933_vm8, 1.0, %v3578_v27  ;;  %vm356_vm10 = vcmp.eq.s32.totalorder %v3721_v10, %v4114_v62  ;;  %vm614_vm11 = vcmp.eq.s32.totalorder %v3732_v14, %v4114_v62 }
  0xb0   : > { %v2093_v40 = vadd.f32 %v3274_v30, %v1835_v35  ;;  %v1351_v41 = vadd.f32 %v3114_v34, %v1093_v13  ;;  %vm2447_vm12 = vcmp.eq.s32.totalorder %v4353_v47, %v3712_v7  ;;  %v2893_v42 = vsel %vm356_vm10, 1.0, %v3578_v27 }
  0xb1   : > { %v2957_v43 = vsel %vm614_vm11, 1.0, %v3578_v27  ;;  %vm872_vm13 = vcmp.eq.s32.totalorder %v3737_v16, %v4114_v62  ;;  %vm1130_vm14 = vcmp.eq.s32.totalorder %v3743_v18, %v4114_v62  ;;  %vm1388_vm15 = vcmp.eq.s32.totalorder %v3748_v20, %v4114_v62 }
  0xb2   : > { %v2351_v44 = vadd.f32 %v3338_v33, %v2093_v40  ;;  %v1609_v46 = vadd.f32 %v3178_v37, %v1351_v41  ;;  %v806_v9 = vadd.f32 %v2957_v43, %v2893_v42  ;;  %v3021_v48 = vsel %vm872_vm13, 1.0, %v3578_v27 }
  0xb3   : > { %v3370_v12 = vsel %vm2191_vm9, 1.0, %v3578_v27  ;;  %v3085_v4 = vsel %vm1130_vm14, 1.0, %v3578_v27  ;;  %vm1646_vm1 = vcmp.eq.s32.totalorder %v3753_v22, %v4114_v62  ;;  %vm1904_vm2 = vcmp.eq.s32.totalorder %v3758_v24, %v4114_v62 }
  0xb4   : > { %2637 = vmatpush.msra.mxu2 %v2351_v44  ;;  %v1867_v49 = vadd.f32 %v3242_v38, %v1609_v46  ;;  %v2512_v50 = vsel %vm2447_vm12, %v3777_v31, 0.0  ;;  %v1064_v51 = vadd.f32 %v3021_v48, %v806_v9  ;;  %v3149_v52 = vsel %vm1388_vm15, 1.0, %v3578_v27 }
  0xb5   : > { %v3213_v54 = vsel %vm1646_vm1, 1.0, %v3578_v27  ;;  %v3277_v6 = vsel %vm1904_vm2, 1.0, %v3578_v27  ;;  %vm388_vm3 = vcmp.eq.s32.totalorder %v3721_v10, %v4119_v5  ;;  %vm646_vm4 = vcmp.eq.s32.totalorder %v3732_v14, %v4119_v5 }
  0xb6   : > { %v2125_v56 = vadd.f32 %v3306_v36, %v1867_v49  ;;  %v1322_v8 = vadd.f32 %v3085_v4, %v1064_v51  ;;  %vm2162_vm5 = vcmp.eq.s32.totalorder %v3865_v39, %v4114_v62  ;;  %vm2418_vm0 = vcmp.eq.s32.totalorder %v4114_v62, %v3701_v2 }
  0xb7   : > { %v2925_v57 = vsel %vm388_vm3, 1.0, %v3578_v27  ;;  %v2989_v58 = vsel %vm646_vm4, 1.0, %v3578_v27  ;;  %vm904_vm6 = vcmp.eq.s32.totalorder %v3737_v16, %v4119_v5  ;;  %vm1162_vm7 = vcmp.eq.s32.totalorder %v3743_v18, %v4119_v5 }
  0xb8   : > { %v2383_v59 = vadd.f32 %v3370_v12, %v2125_v56  ;;  %v1580_v60 = vadd.f32 %v3149_v52, %v1322_v8  ;;  %v838_v61 = vadd.f32 %v2989_v58, %v2925_v57  ;;  %v3053_v3 = vsel %vm904_vm6, 1.0, %v3578_v27 }
  0xb9   : > { %v3341_v63 = vsel %vm2162_vm5, 1.0, %v3578_v27  ;;  %v3117_v0 = vsel %vm1162_vm7, 1.0, %v3578_v27  ;;  %vm1420_vm8 = vcmp.eq.s32.totalorder %v3748_v20, %v4119_v5  ;;  %vm1678_vm9 = vcmp.eq.s32.totalorder %v3753_v22, %v4119_v5 }
  0xba   : > { %v2576_v62 = vadd.f32 %v2512_v50, %v2383_v59  ;;  %v1838_v28 = vadd.f32 %v3213_v54, %v1580_v60  ;;  %v2483_v29 = vsel %vm2418_vm0, %v3777_v31, 0.0  ;;  %v1096_v30 = vadd.f32 %v3053_v3, %v838_v61 }
  0xbb   : > { %v3181_v32 = vsel %vm1420_vm8, 1.0, %v3578_v27  ;;  %v3245_v33 = vsel %vm1678_vm9, 1.0, %v3578_v27  ;;  %vm1936_vm10 = vcmp.eq.s32.totalorder %v3758_v24, %v4119_v5  ;;  %v4465_v34 = vadd.s32 64, %v3699_v1 }
  0xbc   : > { %2657 = vmatpush.msra.mxu3 %v2576_v62  ;;  %v2096_v35 = vadd.f32 %v3277_v6, %v1838_v28  ;;  %v1354_v13 = vadd.f32 %v3117_v0, %v1096_v30  ;;  %vm2194_vm11 = vcmp.eq.s32.totalorder %v3865_v39, %v4119_v5  ;;  %v4470_v37 = vadd.s32 192, %v3699_v1 }
  0xbd   : > { %vm351_vm12 = vcmp.eq.s32.totalorder %v3723_v11, %v4465_v34  ;;  %vm609_vm13 = vcmp.eq.s32.totalorder %v3734_v15, %v4465_v34  ;;  %vm867_vm14 = vcmp.eq.s32.totalorder %v3739_v17, %v4465_v34  ;;  %vm1125_vm15 = vcmp.eq.s32.totalorder %v3745_v19, %v4465_v34 }
  0xbe   : > { %v2354_v38 = vadd.f32 %v3341_v63, %v2096_v35  ;;  %v1612_v36 = vadd.f32 %v3181_v32, %v1354_v13  ;;  %v2888_v40 = vsel %vm351_vm12, 1.0, %v3578_v27  ;;  %v2952_v41 = vsel %vm609_vm13, 1.0, %v3578_v27 }
  0xbf   : > { %v3309_v42 = vsel %vm1936_vm10, 1.0, %v3578_v27  ;;  %v801_v43 = vadd.f32 %v2952_v41, %v2888_v40  ;;  %v3016_v44 = vsel %vm867_vm14, 1.0, %v3578_v27  ;;  %vm1383_vm1 = vcmp.eq.s32.totalorder %v3750_v21, %v4465_v34 }
  0xc0   : > { %v2547_v46 = vadd.f32 %v2483_v29, %v2354_v38  ;;  %v1870_v9 = vadd.f32 %v3245_v33, %v1612_v36  ;;  %v3080_v48 = vsel %vm1125_vm15, 1.0, %v3578_v27  ;;  %vm1641_vm2 = vcmp.eq.s32.totalorder %v3755_v23, %v4465_v34 }
  0xc1   : > { %v3373_v12 = vsel %vm2194_vm11, 1.0, %v3578_v27  ;;  %v1059_v4 = vadd.f32 %v3016_v44, %v801_v43  ;;  %v3144_v49 = vsel %vm1383_vm1, 1.0, %v3578_v27  ;;  %v3208_v50 = vsel %vm1641_vm2, 1.0, %v3578_v27 }
  0xc2   : > { %2595 = vmatpush.msra.mxu0 %v2547_v46  ;;  %v2128_v51 = vadd.f32 %v3309_v42, %v1870_v9  ;;  %vm1899_vm3 = vcmp.eq.s32.totalorder %v3760_v25, %v4465_v34  ;;  %vm2157_vm4 = vcmp.eq.s32.totalorder %v3764_v26, %v4465_v34  ;;  %vm383_vm5 = vcmp.eq.s32.totalorder %v3723_v11, %v4470_v37 }
  0xc3   : > { %v1317_v52 = vadd.f32 %v3080_v48, %v1059_v4  ;;  %v2920_v5 = vsel %vm383_vm5, 1.0, %v3578_v27  ;;  %vm641_vm0 = vcmp.eq.s32.totalorder %v3734_v15, %v4470_v37  ;;  %vm899_vm6 = vcmp.eq.s32.totalorder %v3739_v17, %v4470_v37 }
  0xc4   : > { %v2386_v54 = vadd.f32 %v3373_v12, %v2128_v51  ;;  %v2984_v6 = vsel %vm641_vm0, 1.0, %v3578_v27  ;;  %v3048_v56 = vsel %vm899_vm6, 1.0, %v3578_v27  ;;  %vm1157_vm7 = vcmp.eq.s32.totalorder %v3745_v19, %v4470_v37 }
  0xc5   : > { %v1575_v8 = vadd.f32 %v3144_v49, %v1317_v52  ;;  %v3272_v57 = vsel %vm1899_vm3, 1.0, %v3578_v27  ;;  %v833_v58 = vadd.f32 %v2984_v6, %v2920_v5  ;;  %vm1415_vm8 = vcmp.eq.s32.totalorder %v3750_v21, %v4470_v37 }
  0xc6   : > { %2615 = vmatpush.msra.mxu1 %v2386_v54  ;;  %v3336_v59 = vsel %vm2157_vm4, 1.0, %v3578_v27  ;;  %v3112_v60 = vsel %vm1157_vm7, 1.0, %v3578_v27  ;;  %vm1673_vm9 = vcmp.eq.s32.totalorder %v3755_v23, %v4470_v37  ;;  %vm1931_vm10 = vcmp.eq.s32.totalorder %v3760_v25, %v4470_v37 }
  0xc7   : > { %v1833_v61 = vadd.f32 %v3208_v50, %v1575_v8  ;;  %v1091_v3 = vadd.f32 %v3048_v56, %v833_v58  ;;  %v3176_v63 = vsel %vm1415_vm8, 1.0, %v3578_v27  ;;  %vm2189_vm11 = vcmp.eq.s32.totalorder %v3764_v26, %v4470_v37 }
  0xc8   : > { %v3240_v0 = vsel %vm1673_vm9, 1.0, %v3578_v27  ;;  %v3304_v62 = vsel %vm1931_vm10, 1.0, %v3578_v27  ;;  %vm354_vm12 = vcmp.eq.s32.totalorder %v3721_v10, %v4231_v53  ;;  %vm612_vm13 = vcmp.eq.s32.totalorder %v3732_v14, %v4231_v53 }
  0xc9   : > { %v2091_v28 = vadd.f32 %v3272_v57, %v1833_v61  ;;  %v1349_v29 = vadd.f32 %v3112_v60, %v1091_v3  ;;  %vm2445_vm14 = vcmp.eq.s32.totalorder %v4470_v37, %v3712_v7  ;;  %v2891_v30 = vsel %vm354_vm12, 1.0, %v3578_v27 }
  0xca   : > { %v2955_v32 = vsel %vm612_vm13, 1.0, %v3578_v27  ;;  %vm870_vm15 = vcmp.eq.s32.totalorder %v3737_v16, %v4231_v53  ;;  %vm1128_vm1 = vcmp.eq.s32.totalorder %v3743_v18, %v4231_v53  ;;  %vm1386_vm2 = vcmp.eq.s32.totalorder %v3748_v20, %v4231_v53 }
  0xcb   : > { %v2349_v33 = vadd.f32 %v3336_v59, %v2091_v28  ;;  %v1607_v35 = vadd.f32 %v3176_v63, %v1349_v29  ;;  %v804_v13 = vadd.f32 %v2955_v32, %v2891_v30  ;;  %v3019_v38 = vsel %vm870_vm15, 1.0, %v3578_v27 }
  0xcc   : > { %v3368_v36 = vsel %vm2189_vm11, 1.0, %v3578_v27  ;;  %v3083_v40 = vsel %vm1128_vm1, 1.0, %v3578_v27  ;;  %vm1644_vm3 = vcmp.eq.s32.totalorder %v3753_v22, %v4231_v53  ;;  %vm1902_vm4 = vcmp.eq.s32.totalorder %v3758_v24, %v4231_v53 }
  0xcd   : > { %2638 = vmatpush.msra.mxu2 %v2349_v33  ;;  %v1865_v41 = vadd.f32 %v3240_v0, %v1607_v35  ;;  %v2510_v42 = vsel %vm2445_vm14, %v3777_v31, 0.0  ;;  %v1062_v43 = vadd.f32 %v3019_v38, %v804_v13  ;;  %v3147_v44 = vsel %vm1386_vm2, 1.0, %v3578_v27 }
  0xce   : > { %v3211_v46 = vsel %vm1644_vm3, 1.0, %v3578_v27  ;;  %v3275_v9 = vsel %vm1902_vm4, 1.0, %v3578_v27  ;;  %vm386_vm5 = vcmp.eq.s32.totalorder %v3721_v10, %v4236_v55  ;;  %vm644_vm0 = vcmp.eq.s32.totalorder %v3732_v14, %v4236_v55 }
  0xcf   : > { %v2123_v48 = vadd.f32 %v3304_v62, %v1865_v41  ;;  %v1320_v12 = vadd.f32 %v3083_v40, %v1062_v43  ;;  %vm2160_vm6 = vcmp.eq.s32.totalorder %v3865_v39, %v4231_v53  ;;  %vm2416_vm7 = vcmp.eq.s32.totalorder %v4231_v53, %v3701_v2 }
  0xd0   : > { %v2923_v4 = vsel %vm386_vm5, 1.0, %v3578_v27  ;;  %v2987_v49 = vsel %vm644_vm0, 1.0, %v3578_v27  ;;  %vm902_vm8 = vcmp.eq.s32.totalorder %v3737_v16, %v4236_v55  ;;  %vm1160_vm9 = vcmp.eq.s32.totalorder %v3743_v18, %v4236_v55 }
  0xd1   : > { %v2381_v50 = vadd.f32 %v3368_v36, %v2123_v48  ;;  %v1578_v51 = vadd.f32 %v3147_v44, %v1320_v12  ;;  %v836_v52 = vadd.f32 %v2987_v49, %v2923_v4  ;;  %v3051_v5 = vsel %vm902_vm8, 1.0, %v3578_v27 }
  0xd2   : > { %v3339_v54 = vsel %vm2160_vm6, 1.0, %v3578_v27  ;;  %v3115_v6 = vsel %vm1160_vm9, 1.0, %v3578_v27  ;;  %vm1418_vm10 = vcmp.eq.s32.totalorder %v3748_v20, %v4236_v55  ;;  %vm1676_vm11 = vcmp.eq.s32.totalorder %v3753_v22, %v4236_v55 }
  0xd3   : > { %v2574_v53 = vadd.f32 %v2510_v42, %v2381_v50  ;;  %v1836_v56 = vadd.f32 %v3211_v46, %v1578_v51  ;;  %v2481_v8 = vsel %vm2416_vm7, %v3777_v31, 0.0  ;;  %v1094_v57 = vadd.f32 %v3051_v5, %v836_v52 }
  0xd4   : > { %v3179_v58 = vsel %vm1418_vm10, 1.0, %v3578_v27  ;;  %v3243_v59 = vsel %vm1676_vm11, 1.0, %v3578_v27  ;;  %vm1934_vm12 = vcmp.eq.s32.totalorder %v3758_v24, %v4236_v55  ;;  %v4582_v60 = vadd.s32 56, %v3699_v1 }
  0xd5   : > { %2658 = vmatpush.msra.mxu3 %v2574_v53  ;;  %v2094_v61 = vadd.f32 %v3275_v9, %v1836_v56  ;;  %v1352_v3 = vadd.f32 %v3115_v6, %v1094_v57  ;;  %vm2192_vm13 = vcmp.eq.s32.totalorder %v3865_v39, %v4236_v55  ;;  %v4587_v63 = vadd.s32 184, %v3699_v1 }
  0xd6   : > { %vm349_vm14 = vcmp.eq.s32.totalorder %v3723_v11, %v4582_v60  ;;  %vm607_vm15 = vcmp.eq.s32.totalorder %v3734_v15, %v4582_v60  ;;  %vm865_vm1 = vcmp.eq.s32.totalorder %v3739_v17, %v4582_v60  ;;  %vm1123_vm2 = vcmp.eq.s32.totalorder %v3745_v19, %v4582_v60 }
  0xd7   : > { %v2352_v0 = vadd.f32 %v3339_v54, %v2094_v61  ;;  %v1610_v62 = vadd.f32 %v3179_v58, %v1352_v3  ;;  %v2886_v28 = vsel %vm349_vm14, 1.0, %v3578_v27  ;;  %v2950_v29 = vsel %vm607_vm15, 1.0, %v3578_v27 }
  0xd8   : > { %v3307_v30 = vsel %vm1934_vm12, 1.0, %v3578_v27  ;;  %v799_v32 = vadd.f32 %v2950_v29, %v2886_v28  ;;  %v3014_v33 = vsel %vm865_vm1, 1.0, %v3578_v27  ;;  %vm1381_vm3 = vcmp.eq.s32.totalorder %v3750_v21, %v4582_v60 }
  0xd9   : > { %v2545_v35 = vadd.f32 %v2481_v8, %v2352_v0  ;;  %v1868_v13 = vadd.f32 %v3243_v59, %v1610_v62  ;;  %v3078_v38 = vsel %vm1123_vm2, 1.0, %v3578_v27  ;;  %vm1639_vm4 = vcmp.eq.s32.totalorder %v3755_v23, %v4582_v60 }
  0xda   : > { %v3371_v36 = vsel %vm2192_vm13, 1.0, %v3578_v27  ;;  %v1057_v40 = vadd.f32 %v3014_v33, %v799_v32  ;;  %v3142_v41 = vsel %vm1381_vm3, 1.0, %v3578_v27  ;;  %v3206_v42 = vsel %vm1639_vm4, 1.0, %v3578_v27 }
  0xdb   : > { %2596 = vmatpush.msra.mxu0 %v2545_v35  ;;  %v2126_v43 = vadd.f32 %v3307_v30, %v1868_v13  ;;  %vm1897_vm5 = vcmp.eq.s32.totalorder %v3760_v25, %v4582_v60  ;;  %vm2155_vm0 = vcmp.eq.s32.totalorder %v3764_v26, %v4582_v60  ;;  %vm381_vm6 = vcmp.eq.s32.totalorder %v3723_v11, %v4587_v63 }
  0xdc   : > { %v1315_v44 = vadd.f32 %v3078_v38, %v1057_v40  ;;  %v2918_v55 = vsel %vm381_vm6, 1.0, %v3578_v27  ;;  %vm639_vm7 = vcmp.eq.s32.totalorder %v3734_v15, %v4587_v63  ;;  %vm897_vm8 = vcmp.eq.s32.totalorder %v3739_v17, %v4587_v63 }
  0xdd   : > { %v2384_v46 = vadd.f32 %v3371_v36, %v2126_v43  ;;  %v2982_v9 = vsel %vm639_vm7, 1.0, %v3578_v27  ;;  %v3046_v48 = vsel %vm897_vm8, 1.0, %v3578_v27  ;;  %vm1155_vm9 = vcmp.eq.s32.totalorder %v3745_v19, %v4587_v63 }
  0xde   : > { %v1573_v12 = vadd.f32 %v3142_v41, %v1315_v44  ;;  %v3270_v4 = vsel %vm1897_vm5, 1.0, %v3578_v27  ;;  %v831_v49 = vadd.f32 %v2982_v9, %v2918_v55  ;;  %vm1413_vm10 = vcmp.eq.s32.totalorder %v3750_v21, %v4587_v63 }
  0xdf   : > { %2616 = vmatpush.msra.mxu1 %v2384_v46  ;;  %v3334_v50 = vsel %vm2155_vm0, 1.0, %v3578_v27  ;;  %v3110_v51 = vsel %vm1155_vm9, 1.0, %v3578_v27  ;;  %vm1671_vm11 = vcmp.eq.s32.totalorder %v3755_v23, %v4587_v63  ;;  %vm1929_vm12 = vcmp.eq.s32.totalorder %v3760_v25, %v4587_v63 }
  0xe0   : > { %v1831_v52 = vadd.f32 %v3206_v42, %v1573_v12  ;;  %v1089_v5 = vadd.f32 %v3046_v48, %v831_v49  ;;  %v3174_v54 = vsel %vm1413_vm10, 1.0, %v3578_v27  ;;  %vm2187_vm13 = vcmp.eq.s32.totalorder %v3764_v26, %v4587_v63 }
  0xe1   : > { %v3238_v6 = vsel %vm1671_vm11, 1.0, %v3578_v27  ;;  %v3302_v53 = vsel %vm1929_vm12, 1.0, %v3578_v27  ;;  %vm352_vm14 = vcmp.eq.s32.totalorder %v3721_v10, %v4348_v45  ;;  %vm610_vm15 = vcmp.eq.s32.totalorder %v3732_v14, %v4348_v45 }
  0xe2   : > { %v2089_v56 = vadd.f32 %v3270_v4, %v1831_v52  ;;  %v1347_v8 = vadd.f32 %v3110_v51, %v1089_v5  ;;  %vm2443_vm1 = vcmp.eq.s32.totalorder %v4587_v63, %v3712_v7  ;;  %v2889_v57 = vsel %vm352_vm14, 1.0, %v3578_v27 }
  0xe3   : > { %v2953_v58 = vsel %vm610_vm15, 1.0, %v3578_v27  ;;  %vm868_vm2 = vcmp.eq.s32.totalorder %v3737_v16, %v4348_v45  ;;  %vm1126_vm3 = vcmp.eq.s32.totalorder %v3743_v18, %v4348_v45  ;;  %vm1384_vm4 = vcmp.eq.s32.totalorder %v3748_v20, %v4348_v45 }
  0xe4   : > { %v2347_v59 = vadd.f32 %v3334_v50, %v2089_v56  ;;  %v1605_v61 = vadd.f32 %v3174_v54, %v1347_v8  ;;  %v802_v3 = vadd.f32 %v2953_v58, %v2889_v57  ;;  %v3017_v0 = vsel %vm868_vm2, 1.0, %v3578_v27 }
  0xe5   : > { %v3366_v62 = vsel %vm2187_vm13, 1.0, %v3578_v27  ;;  %v3081_v28 = vsel %vm1126_vm3, 1.0, %v3578_v27  ;;  %vm1642_vm5 = vcmp.eq.s32.totalorder %v3753_v22, %v4348_v45  ;;  %vm1900_vm0 = vcmp.eq.s32.totalorder %v3758_v24, %v4348_v45 }
  0xe6   : > { %2639 = vmatpush.msra.mxu2 %v2347_v59  ;;  %v1863_v29 = vadd.f32 %v3238_v6, %v1605_v61  ;;  %v2508_v30 = vsel %vm2443_vm1, %v3777_v31, 0.0  ;;  %v1060_v32 = vadd.f32 %v3017_v0, %v802_v3  ;;  %v3145_v33 = vsel %vm1384_vm4, 1.0, %v3578_v27 }
  0xe7   : > { %v3209_v35 = vsel %vm1642_vm5, 1.0, %v3578_v27  ;;  %v3273_v13 = vsel %vm1900_vm0, 1.0, %v3578_v27  ;;  %vm384_vm6 = vcmp.eq.s32.totalorder %v3721_v10, %v4353_v47  ;;  %vm642_vm7 = vcmp.eq.s32.totalorder %v3732_v14, %v4353_v47 }
  0xe8   : > { %v2121_v38 = vadd.f32 %v3302_v53, %v1863_v29  ;;  %v1318_v36 = vadd.f32 %v3081_v28, %v1060_v32  ;;  %vm2158_vm8 = vcmp.eq.s32.totalorder %v3865_v39, %v4348_v45  ;;  %vm2414_vm9 = vcmp.eq.s32.totalorder %v4348_v45, %v3701_v2 }
  0xe9   : > { %v2921_v40 = vsel %vm384_vm6, 1.0, %v3578_v27  ;;  %v2985_v41 = vsel %vm642_vm7, 1.0, %v3578_v27  ;;  %vm900_vm10 = vcmp.eq.s32.totalorder %v3737_v16, %v4353_v47  ;;  %vm1158_vm11 = vcmp.eq.s32.totalorder %v3743_v18, %v4353_v47 }
  0xea   : > { %v2379_v42 = vadd.f32 %v3366_v62, %v2121_v38  ;;  %v1576_v43 = vadd.f32 %v3145_v33, %v1318_v36  ;;  %v834_v44 = vadd.f32 %v2985_v41, %v2921_v40  ;;  %v3049_v55 = vsel %vm900_vm10, 1.0, %v3578_v27 }
  0xeb   : > { %v3337_v46 = vsel %vm2158_vm8, 1.0, %v3578_v27  ;;  %v3113_v9 = vsel %vm1158_vm11, 1.0, %v3578_v27  ;;  %vm1416_vm12 = vcmp.eq.s32.totalorder %v3748_v20, %v4353_v47  ;;  %vm1674_vm13 = vcmp.eq.s32.totalorder %v3753_v22, %v4353_v47 }
  0xec   : > { %v2572_v45 = vadd.f32 %v2508_v30, %v2379_v42  ;;  %v1834_v48 = vadd.f32 %v3209_v35, %v1576_v43  ;;  %v2479_v12 = vsel %vm2414_vm9, %v3777_v31, 0.0  ;;  %v1092_v4 = vadd.f32 %v3049_v55, %v834_v44 }
  0xed   : > { %v3177_v49 = vsel %vm1416_vm12, 1.0, %v3578_v27  ;;  %v3241_v50 = vsel %vm1674_vm13, 1.0, %v3578_v27  ;;  %vm1932_vm14 = vcmp.eq.s32.totalorder %v3758_v24, %v4353_v47  ;;  %v4699_v51 = vadd.s32 48, %v3699_v1 }
  0xee   : > { %2659 = vmatpush.msra.mxu3 %v2572_v45  ;;  %v2092_v52 = vadd.f32 %v3273_v13, %v1834_v48  ;;  %v1350_v5 = vadd.f32 %v3113_v9, %v1092_v4  ;;  %vm2190_vm15 = vcmp.eq.s32.totalorder %v3865_v39, %v4353_v47  ;;  %v4704_v54 = vadd.s32 176, %v3699_v1 }
  0xef   : > { %vm347_vm1 = vcmp.eq.s32.totalorder %v3723_v11, %v4699_v51  ;;  %vm605_vm2 = vcmp.eq.s32.totalorder %v3734_v15, %v4699_v51  ;;  %vm863_vm3 = vcmp.eq.s32.totalorder %v3739_v17, %v4699_v51  ;;  %vm1121_vm4 = vcmp.eq.s32.totalorder %v3745_v19, %v4699_v51 }
  0xf0   : > { %v2350_v6 = vadd.f32 %v3337_v46, %v2092_v52  ;;  %v1608_v53 = vadd.f32 %v3177_v49, %v1350_v5  ;;  %v2884_v56 = vsel %vm347_vm1, 1.0, %v3578_v27  ;;  %v2948_v8 = vsel %vm605_vm2, 1.0, %v3578_v27 }
  0xf1   : > { %v3305_v57 = vsel %vm1932_vm14, 1.0, %v3578_v27  ;;  %v797_v58 = vadd.f32 %v2948_v8, %v2884_v56  ;;  %v3012_v59 = vsel %vm863_vm3, 1.0, %v3578_v27  ;;  %vm1379_vm5 = vcmp.eq.s32.totalorder %v3750_v21, %v4699_v51 }
  0xf2   : > { %v2543_v61 = vadd.f32 %v2479_v12, %v2350_v6  ;;  %v1866_v3 = vadd.f32 %v3241_v50, %v1608_v53  ;;  %v3076_v0 = vsel %vm1121_vm4, 1.0, %v3578_v27  ;;  %vm1637_vm0 = vcmp.eq.s32.totalorder %v3755_v23, %v4699_v51 }
  0xf3   : > { %v3369_v62 = vsel %vm2190_vm15, 1.0, %v3578_v27  ;;  %v1055_v28 = vadd.f32 %v3012_v59, %v797_v58  ;;  %v3140_v29 = vsel %vm1379_vm5, 1.0, %v3578_v27  ;;  %v3204_v30 = vsel %vm1637_vm0, 1.0, %v3578_v27 }
  0xf4   : > { %2597 = vmatpush.msra.mxu0 %v2543_v61  ;;  %v2124_v32 = vadd.f32 %v3305_v57, %v1866_v3  ;;  %vm1895_vm6 = vcmp.eq.s32.totalorder %v3760_v25, %v4699_v51  ;;  %vm2153_vm7 = vcmp.eq.s32.totalorder %v3764_v26, %v4699_v51  ;;  %vm379_vm8 = vcmp.eq.s32.totalorder %v3723_v11, %v4704_v54 }
  0xf5   : > { %v1313_v33 = vadd.f32 %v3076_v0, %v1055_v28  ;;  %v2916_v47 = vsel %vm379_vm8, 1.0, %v3578_v27  ;;  %vm637_vm9 = vcmp.eq.s32.totalorder %v3734_v15, %v4704_v54  ;;  %vm895_vm10 = vcmp.eq.s32.totalorder %v3739_v17, %v4704_v54 }
  0xf6   : > { %v2382_v35 = vadd.f32 %v3369_v62, %v2124_v32  ;;  %v2980_v13 = vsel %vm637_vm9, 1.0, %v3578_v27  ;;  %v3044_v38 = vsel %vm895_vm10, 1.0, %v3578_v27  ;;  %vm1153_vm11 = vcmp.eq.s32.totalorder %v3745_v19, %v4704_v54 }
  0xf7   : > { %v1571_v36 = vadd.f32 %v3140_v29, %v1313_v33  ;;  %v3268_v40 = vsel %vm1895_vm6, 1.0, %v3578_v27  ;;  %v829_v41 = vadd.f32 %v2980_v13, %v2916_v47  ;;  %vm1411_vm12 = vcmp.eq.s32.totalorder %v3750_v21, %v4704_v54 }
  0xf8   : > { %2617 = vmatpush.msra.mxu1 %v2382_v35  ;;  %v3332_v42 = vsel %vm2153_vm7, 1.0, %v3578_v27  ;;  %v3108_v43 = vsel %vm1153_vm11, 1.0, %v3578_v27  ;;  %vm1669_vm13 = vcmp.eq.s32.totalorder %v3755_v23, %v4704_v54  ;;  %vm1927_vm14 = vcmp.eq.s32.totalorder %v3760_v25, %v4704_v54 }
  0xf9   : > { %v1829_v44 = vadd.f32 %v3204_v30, %v1571_v36  ;;  %v1087_v55 = vadd.f32 %v3044_v38, %v829_v41  ;;  %v3172_v46 = vsel %vm1411_vm12, 1.0, %v3578_v27  ;;  %vm2185_vm15 = vcmp.eq.s32.totalorder %v3764_v26, %v4704_v54 }
  0xfa   : > { %v3236_v9 = vsel %vm1669_vm13, 1.0, %v3578_v27  ;;  %v3300_v45 = vsel %vm1927_vm14, 1.0, %v3578_v27  ;;  %vm350_vm1 = vcmp.eq.s32.totalorder %v3721_v10, %v4465_v34  ;;  %vm608_vm2 = vcmp.eq.s32.totalorder %v3732_v14, %v4465_v34 }
  0xfb   : > { %v2087_v48 = vadd.f32 %v3268_v40, %v1829_v44  ;;  %v1345_v12 = vadd.f32 %v3108_v43, %v1087_v55  ;;  %vm2441_vm3 = vcmp.eq.s32.totalorder %v4704_v54, %v3712_v7  ;;  %v2887_v4 = vsel %vm350_vm1, 1.0, %v3578_v27 }
  0xfc   : > { %v2951_v49 = vsel %vm608_vm2, 1.0, %v3578_v27  ;;  %vm866_vm4 = vcmp.eq.s32.totalorder %v3737_v16, %v4465_v34  ;;  %vm1124_vm5 = vcmp.eq.s32.totalorder %v3743_v18, %v4465_v34  ;;  %vm1382_vm0 = vcmp.eq.s32.totalorder %v3748_v20, %v4465_v34 }
  0xfd   : > { %v2345_v50 = vadd.f32 %v3332_v42, %v2087_v48  ;;  %v1603_v52 = vadd.f32 %v3172_v46, %v1345_v12  ;;  %v800_v5 = vadd.f32 %v2951_v49, %v2887_v4  ;;  %v3015_v6 = vsel %vm866_vm4, 1.0, %v3578_v27 }
  0xfe   : > { %v3364_v53 = vsel %vm2185_vm15, 1.0, %v3578_v27  ;;  %v3079_v56 = vsel %vm1124_vm5, 1.0, %v3578_v27  ;;  %vm1640_vm6 = vcmp.eq.s32.totalorder %v3753_v22, %v4465_v34  ;;  %vm1898_vm7 = vcmp.eq.s32.totalorder %v3758_v24, %v4465_v34 }
  0xff   : > { %2640 = vmatpush.msra.mxu2 %v2345_v50  ;;  %v1861_v8 = vadd.f32 %v3236_v9, %v1603_v52  ;;  %v2506_v57 = vsel %vm2441_vm3, %v3777_v31, 0.0  ;;  %v1058_v58 = vadd.f32 %v3015_v6, %v800_v5  ;;  %v3143_v59 = vsel %vm1382_vm0, 1.0, %v3578_v27 }
 0x100   : > { %v3207_v61 = vsel %vm1640_vm6, 1.0, %v3578_v27  ;;  %v3271_v3 = vsel %vm1898_vm7, 1.0, %v3578_v27  ;;  %vm382_vm8 = vcmp.eq.s32.totalorder %v3721_v10, %v4470_v37  ;;  %vm640_vm9 = vcmp.eq.s32.totalorder %v3732_v14, %v4470_v37 }
 0x101   : > { %v2119_v0 = vadd.f32 %v3300_v45, %v1861_v8  ;;  %v1316_v62 = vadd.f32 %v3079_v56, %v1058_v58  ;;  %vm2156_vm10 = vcmp.eq.s32.totalorder %v3865_v39, %v4465_v34  ;;  %vm2412_vm11 = vcmp.eq.s32.totalorder %v4465_v34, %v3701_v2 }
 0x102   : > { %v2919_v28 = vsel %vm382_vm8, 1.0, %v3578_v27  ;;  %v2983_v29 = vsel %vm640_vm9, 1.0, %v3578_v27  ;;  %vm898_vm12 = vcmp.eq.s32.totalorder %v3737_v16, %v4470_v37  ;;  %vm1156_vm13 = vcmp.eq.s32.totalorder %v3743_v18, %v4470_v37 }
 0x103   : > { %v2377_v30 = vadd.f32 %v3364_v53, %v2119_v0  ;;  %v1574_v32 = vadd.f32 %v3143_v59, %v1316_v62  ;;  %v832_v33 = vadd.f32 %v2983_v29, %v2919_v28  ;;  %v3047_v47 = vsel %vm898_vm12, 1.0, %v3578_v27 }
 0x104   : > { %v3335_v35 = vsel %vm2156_vm10, 1.0, %v3578_v27  ;;  %v3111_v13 = vsel %vm1156_vm13, 1.0, %v3578_v27  ;;  %vm1414_vm14 = vcmp.eq.s32.totalorder %v3748_v20, %v4470_v37  ;;  %vm1672_vm15 = vcmp.eq.s32.totalorder %v3753_v22, %v4470_v37 }
 0x105   : > { %v2570_v34 = vadd.f32 %v2506_v57, %v2377_v30  ;;  %v1832_v38 = vadd.f32 %v3207_v61, %v1574_v32  ;;  %v2477_v36 = vsel %vm2412_vm11, %v3777_v31, 0.0  ;;  %v1090_v40 = vadd.f32 %v3047_v47, %v832_v33 }
 0x106   : > { %v3175_v41 = vsel %vm1414_vm14, 1.0, %v3578_v27  ;;  %v3239_v42 = vsel %vm1672_vm15, 1.0, %v3578_v27  ;;  %vm1930_vm1 = vcmp.eq.s32.totalorder %v3758_v24, %v4470_v37  ;;  %v4816_v43 = vadd.s32 40, %v3699_v1 }
 0x107   : > { %2660 = vmatpush.msra.mxu3 %v2570_v34  ;;  %v2090_v44 = vadd.f32 %v3271_v3, %v1832_v38  ;;  %v1348_v55 = vadd.f32 %v3111_v13, %v1090_v40  ;;  %vm2188_vm2 = vcmp.eq.s32.totalorder %v3865_v39, %v4470_v37  ;;  %v4821_v46 = vadd.s32 168, %v3699_v1 }
 0x108   : > { %vm345_vm3 = vcmp.eq.s32.totalorder %v3723_v11, %v4816_v43  ;;  %vm603_vm4 = vcmp.eq.s32.totalorder %v3734_v15, %v4816_v43  ;;  %vm861_vm5 = vcmp.eq.s32.totalorder %v3739_v17, %v4816_v43  ;;  %vm1119_vm0 = vcmp.eq.s32.totalorder %v3745_v19, %v4816_v43 }
 0x109   : > { %v2348_v9 = vadd.f32 %v3335_v35, %v2090_v44  ;;  %v1606_v45 = vadd.f32 %v3175_v41, %v1348_v55  ;;  %v2882_v48 = vsel %vm345_vm3, 1.0, %v3578_v27  ;;  %v2946_v12 = vsel %vm603_vm4, 1.0, %v3578_v27 }
 0x10a   : > { %v3303_v4 = vsel %vm1930_vm1, 1.0, %v3578_v27  ;;  %v795_v49 = vadd.f32 %v2946_v12, %v2882_v48  ;;  %v3010_v50 = vsel %vm861_vm5, 1.0, %v3578_v27  ;;  %vm1377_vm6 = vcmp.eq.s32.totalorder %v3750_v21, %v4816_v43 }
 0x10b   : > { %v2541_v52 = vadd.f32 %v2477_v36, %v2348_v9  ;;  %v1864_v5 = vadd.f32 %v3239_v42, %v1606_v45  ;;  %v3074_v6 = vsel %vm1119_vm0, 1.0, %v3578_v27  ;;  %vm1635_vm7 = vcmp.eq.s32.totalorder %v3755_v23, %v4816_v43 }
 0x10c   : > { %v3367_v53 = vsel %vm2188_vm2, 1.0, %v3578_v27  ;;  %v1053_v56 = vadd.f32 %v3010_v50, %v795_v49  ;;  %v3138_v8 = vsel %vm1377_vm6, 1.0, %v3578_v27  ;;  %v3202_v57 = vsel %vm1635_vm7, 1.0, %v3578_v27 }
 0x10d   : > { %2598 = vmatpush.msra.mxu0 %v2541_v52  ;;  %v2122_v58 = vadd.f32 %v3303_v4, %v1864_v5  ;;  %vm1893_vm8 = vcmp.eq.s32.totalorder %v3760_v25, %v4816_v43  ;;  %vm2151_vm9 = vcmp.eq.s32.totalorder %v3764_v26, %v4816_v43  ;;  %vm377_vm10 = vcmp.eq.s32.totalorder %v3723_v11, %v4821_v46 }
 0x10e   : > { %v1311_v59 = vadd.f32 %v3074_v6, %v1053_v56  ;;  %v2914_v37 = vsel %vm377_vm10, 1.0, %v3578_v27  ;;  %vm635_vm11 = vcmp.eq.s32.totalorder %v3734_v15, %v4821_v46  ;;  %vm893_vm12 = vcmp.eq.s32.totalorder %v3739_v17, %v4821_v46 }
 0x10f   : > { %v2380_v61 = vadd.f32 %v3367_v53, %v2122_v58  ;;  %v2978_v3 = vsel %vm635_vm11, 1.0, %v3578_v27  ;;  %v3042_v0 = vsel %vm893_vm12, 1.0, %v3578_v27  ;;  %vm1151_vm13 = vcmp.eq.s32.totalorder %v3745_v19, %v4821_v46 }
 0x110   : > { %v1569_v62 = vadd.f32 %v3138_v8, %v1311_v59  ;;  %v3266_v28 = vsel %vm1893_vm8, 1.0, %v3578_v27  ;;  %v827_v29 = vadd.f32 %v2978_v3, %v2914_v37  ;;  %vm1409_vm14 = vcmp.eq.s32.totalorder %v3750_v21, %v4821_v46 }
 0x111   : > { %2618 = vmatpush.msra.mxu1 %v2380_v61  ;;  %v3330_v30 = vsel %vm2151_vm9, 1.0, %v3578_v27  ;;  %v3106_v32 = vsel %vm1151_vm13, 1.0, %v3578_v27  ;;  %vm1667_vm15 = vcmp.eq.s32.totalorder %v3755_v23, %v4821_v46  ;;  %vm1925_vm1 = vcmp.eq.s32.totalorder %v3760_v25, %v4821_v46 }
 0x112   : > { %v1827_v33 = vadd.f32 %v3202_v57, %v1569_v62  ;;  %v1085_v47 = vadd.f32 %v3042_v0, %v827_v29  ;;  %v3170_v35 = vsel %vm1409_vm14, 1.0, %v3578_v27  ;;  %vm2183_vm2 = vcmp.eq.s32.totalorder %v3764_v26, %v4821_v46 }
 0x113   : > { %v3234_v13 = vsel %vm1667_vm15, 1.0, %v3578_v27  ;;  %v3298_v34 = vsel %vm1925_vm1, 1.0, %v3578_v27  ;;  %vm348_vm3 = vcmp.eq.s32.totalorder %v3721_v10, %v4582_v60  ;;  %vm606_vm4 = vcmp.eq.s32.totalorder %v3732_v14, %v4582_v60 }
 0x114   : > { %v2085_v38 = vadd.f32 %v3266_v28, %v1827_v33  ;;  %v1343_v36 = vadd.f32 %v3106_v32, %v1085_v47  ;;  %vm2439_vm5 = vcmp.eq.s32.totalorder %v4821_v46, %v3712_v7  ;;  %v2885_v40 = vsel %vm348_vm3, 1.0, %v3578_v27 }
 0x115   : > { %v2949_v41 = vsel %vm606_vm4, 1.0, %v3578_v27  ;;  %vm864_vm0 = vcmp.eq.s32.totalorder %v3737_v16, %v4582_v60  ;;  %vm1122_vm6 = vcmp.eq.s32.totalorder %v3743_v18, %v4582_v60  ;;  %vm1380_vm7 = vcmp.eq.s32.totalorder %v3748_v20, %v4582_v60 }
 0x116   : > { %v2343_v42 = vadd.f32 %v3330_v30, %v2085_v38  ;;  %v1601_v44 = vadd.f32 %v3170_v35, %v1343_v36  ;;  %v798_v55 = vadd.f32 %v2949_v41, %v2885_v40  ;;  %v3013_v9 = vsel %vm864_vm0, 1.0, %v3578_v27 }
 0x117   : > { %v3362_v45 = vsel %vm2183_vm2, 1.0, %v3578_v27  ;;  %v3077_v48 = vsel %vm1122_vm6, 1.0, %v3578_v27  ;;  %vm1638_vm8 = vcmp.eq.s32.totalorder %v3753_v22, %v4582_v60  ;;  %vm1896_vm9 = vcmp.eq.s32.totalorder %v3758_v24, %v4582_v60 }
 0x118   : > { %2641 = vmatpush.msra.mxu2 %v2343_v42  ;;  %v1859_v12 = vadd.f32 %v3234_v13, %v1601_v44  ;;  %v2504_v4 = vsel %vm2439_vm5, %v3777_v31, 0.0  ;;  %v1056_v49 = vadd.f32 %v3013_v9, %v798_v55  ;;  %v3141_v50 = vsel %vm1380_vm7, 1.0, %v3578_v27 }
 0x119   : > { %v3205_v52 = vsel %vm1638_vm8, 1.0, %v3578_v27  ;;  %v3269_v5 = vsel %vm1896_vm9, 1.0, %v3578_v27  ;;  %vm380_vm10 = vcmp.eq.s32.totalorder %v3721_v10, %v4587_v63  ;;  %vm638_vm11 = vcmp.eq.s32.totalorder %v3732_v14, %v4587_v63 }
 0x11a   : > { %v2117_v6 = vadd.f32 %v3298_v34, %v1859_v12  ;;  %v1314_v53 = vadd.f32 %v3077_v48, %v1056_v49  ;;  %vm2154_vm12 = vcmp.eq.s32.totalorder %v3865_v39, %v4582_v60  ;;  %vm2410_vm13 = vcmp.eq.s32.totalorder %v4582_v60, %v3701_v2 }
 0x11b   : > { %v2917_v56 = vsel %vm380_vm10, 1.0, %v3578_v27  ;;  %v2981_v8 = vsel %vm638_vm11, 1.0, %v3578_v27  ;;  %vm896_vm14 = vcmp.eq.s32.totalorder %v3737_v16, %v4587_v63  ;;  %vm1154_vm15 = vcmp.eq.s32.totalorder %v3743_v18, %v4587_v63 }
 0x11c   : > { %v2375_v57 = vadd.f32 %v3362_v45, %v2117_v6  ;;  %v1572_v58 = vadd.f32 %v3141_v50, %v1314_v53  ;;  %v830_v59 = vadd.f32 %v2981_v8, %v2917_v56  ;;  %v3045_v37 = vsel %vm896_vm14, 1.0, %v3578_v27 }
 0x11d   : > { %v3333_v61 = vsel %vm2154_vm12, 1.0, %v3578_v27  ;;  %v3109_v3 = vsel %vm1154_vm15, 1.0, %v3578_v27  ;;  %vm1412_vm1 = vcmp.eq.s32.totalorder %v3748_v20, %v4587_v63  ;;  %vm1670_vm2 = vcmp.eq.s32.totalorder %v3753_v22, %v4587_v63 }
 0x11e   : > { %v2568_v60 = vadd.f32 %v2504_v4, %v2375_v57  ;;  %v1830_v0 = vadd.f32 %v3205_v52, %v1572_v58  ;;  %v2475_v62 = vsel %vm2410_vm13, %v3777_v31, 0.0  ;;  %v1088_v28 = vadd.f32 %v3045_v37, %v830_v59 }
 0x11f   : > { %v3173_v29 = vsel %vm1412_vm1, 1.0, %v3578_v27  ;;  %v3237_v30 = vsel %vm1670_vm2, 1.0, %v3578_v27  ;;  %vm1928_vm3 = vcmp.eq.s32.totalorder %v3758_v24, %v4587_v63  ;;  %v4933_v32 = vadd.s32 32, %v3699_v1 }
 0x120   : > { %2661 = vmatpush.msra.mxu3 %v2568_v60  ;;  %v2088_v33 = vadd.f32 %v3269_v5, %v1830_v0  ;;  %v1346_v47 = vadd.f32 %v3109_v3, %v1088_v28  ;;  %vm2186_vm4 = vcmp.eq.s32.totalorder %v3865_v39, %v4587_v63  ;;  %v4938_v35 = vadd.s32 160, %v3699_v1 }
 0x121   : > { %vm343_vm5 = vcmp.eq.s32.totalorder %v3723_v11, %v4933_v32  ;;  %vm601_vm0 = vcmp.eq.s32.totalorder %v3734_v15, %v4933_v32  ;;  %vm859_vm6 = vcmp.eq.s32.totalorder %v3739_v17, %v4933_v32  ;;  %vm1117_vm7 = vcmp.eq.s32.totalorder %v3745_v19, %v4933_v32 }
 0x122   : > { %v2346_v13 = vadd.f32 %v3333_v61, %v2088_v33  ;;  %v1604_v34 = vadd.f32 %v3173_v29, %v1346_v47  ;;  %v2880_v38 = vsel %vm343_vm5, 1.0, %v3578_v27  ;;  %v2944_v36 = vsel %vm601_vm0, 1.0, %v3578_v27 }
 0x123   : > { %v3301_v40 = vsel %vm1928_vm3, 1.0, %v3578_v27  ;;  %v793_v41 = vadd.f32 %v2944_v36, %v2880_v38  ;;  %v3008_v42 = vsel %vm859_vm6, 1.0, %v3578_v27  ;;  %vm1375_vm8 = vcmp.eq.s32.totalorder %v3750_v21, %v4933_v32 }
 0x124   : > { %v2539_v44 = vadd.f32 %v2475_v62, %v2346_v13  ;;  %v1862_v55 = vadd.f32 %v3237_v30, %v1604_v34  ;;  %v3072_v9 = vsel %vm1117_vm7, 1.0, %v3578_v27  ;;  %vm1633_vm9 = vcmp.eq.s32.totalorder %v3755_v23, %v4933_v32 }
 0x125   : > { %v3365_v45 = vsel %vm2186_vm4, 1.0, %v3578_v27  ;;  %v1051_v48 = vadd.f32 %v3008_v42, %v793_v41  ;;  %v3136_v12 = vsel %vm1375_vm8, 1.0, %v3578_v27  ;;  %v3200_v4 = vsel %vm1633_vm9, 1.0, %v3578_v27 }
 0x126   : > { %2599 = vmatpush.msra.mxu0 %v2539_v44  ;;  %v2120_v49 = vadd.f32 %v3301_v40, %v1862_v55  ;;  %vm1891_vm10 = vcmp.eq.s32.totalorder %v3760_v25, %v4933_v32  ;;  %vm2149_vm11 = vcmp.eq.s32.totalorder %v3764_v26, %v4933_v32  ;;  %vm375_vm12 = vcmp.eq.s32.totalorder %v3723_v11, %v4938_v35 }
 0x127   : > { %v1309_v50 = vadd.f32 %v3072_v9, %v1051_v48  ;;  %v2912_v63 = vsel %vm375_vm12, 1.0, %v3578_v27  ;;  %vm633_vm13 = vcmp.eq.s32.totalorder %v3734_v15, %v4938_v35  ;;  %vm891_vm14 = vcmp.eq.s32.totalorder %v3739_v17, %v4938_v35 }
 0x128   : > { %v2378_v52 = vadd.f32 %v3365_v45, %v2120_v49  ;;  %v2976_v5 = vsel %vm633_vm13, 1.0, %v3578_v27  ;;  %v3040_v6 = vsel %vm891_vm14, 1.0, %v3578_v27  ;;  %vm1149_vm15 = vcmp.eq.s32.totalorder %v3745_v19, %v4938_v35 }
 0x129   : > { %v1567_v53 = vadd.f32 %v3136_v12, %v1309_v50  ;;  %v3264_v56 = vsel %vm1891_vm10, 1.0, %v3578_v27  ;;  %v825_v8 = vadd.f32 %v2976_v5, %v2912_v63  ;;  %vm1407_vm1 = vcmp.eq.s32.totalorder %v3750_v21, %v4938_v35 }
 0x12a   : > { %2619 = vmatpush.msra.mxu1 %v2378_v52  ;;  %v3328_v57 = vsel %vm2149_vm11, 1.0, %v3578_v27  ;;  %v3104_v58 = vsel %vm1149_vm15, 1.0, %v3578_v27  ;;  %vm1665_vm2 = vcmp.eq.s32.totalorder %v3755_v23, %v4938_v35  ;;  %vm1923_vm3 = vcmp.eq.s32.totalorder %v3760_v25, %v4938_v35 }
 0x12b   : > { %v1825_v59 = vadd.f32 %v3200_v4, %v1567_v53  ;;  %v1083_v37 = vadd.f32 %v3040_v6, %v825_v8  ;;  %v3168_v61 = vsel %vm1407_vm1, 1.0, %v3578_v27  ;;  %vm2181_vm4 = vcmp.eq.s32.totalorder %v3764_v26, %v4938_v35 }
 0x12c   : > { %v3232_v3 = vsel %vm1665_vm2, 1.0, %v3578_v27  ;;  %v3296_v60 = vsel %vm1923_vm3, 1.0, %v3578_v27  ;;  %vm346_vm5 = vcmp.eq.s32.totalorder %v3721_v10, %v4699_v51  ;;  %vm604_vm0 = vcmp.eq.s32.totalorder %v3732_v14, %v4699_v51 }
 0x12d   : > { %v2083_v0 = vadd.f32 %v3264_v56, %v1825_v59  ;;  %v1341_v62 = vadd.f32 %v3104_v58, %v1083_v37  ;;  %vm2437_vm6 = vcmp.eq.s32.totalorder %v4938_v35, %v3712_v7  ;;  %v2883_v28 = vsel %vm346_vm5, 1.0, %v3578_v27 }
 0x12e   : > { %v2947_v29 = vsel %vm604_vm0, 1.0, %v3578_v27  ;;  %vm862_vm7 = vcmp.eq.s32.totalorder %v3737_v16, %v4699_v51  ;;  %vm1120_vm8 = vcmp.eq.s32.totalorder %v3743_v18, %v4699_v51  ;;  %vm1378_vm9 = vcmp.eq.s32.totalorder %v3748_v20, %v4699_v51 }
 0x12f   : > { %v2341_v30 = vadd.f32 %v3328_v57, %v2083_v0  ;;  %v1599_v33 = vadd.f32 %v3168_v61, %v1341_v62  ;;  %v796_v47 = vadd.f32 %v2947_v29, %v2883_v28  ;;  %v3011_v13 = vsel %vm862_vm7, 1.0, %v3578_v27 }
 0x130   : > { %v3360_v34 = vsel %vm2181_vm4, 1.0, %v3578_v27  ;;  %v3075_v38 = vsel %vm1120_vm8, 1.0, %v3578_v27  ;;  %vm1636_vm10 = vcmp.eq.s32.totalorder %v3753_v22, %v4699_v51  ;;  %vm1894_vm11 = vcmp.eq.s32.totalorder %v3758_v24, %v4699_v51 }
 0x131   : > { %2642 = vmatpush.msra.mxu2 %v2341_v30  ;;  %v1857_v36 = vadd.f32 %v3232_v3, %v1599_v33  ;;  %v2502_v40 = vsel %vm2437_vm6, %v3777_v31, 0.0  ;;  %v1054_v41 = vadd.f32 %v3011_v13, %v796_v47  ;;  %v3139_v42 = vsel %vm1378_vm9, 1.0, %v3578_v27 }
 0x132   : > { %v3203_v44 = vsel %vm1636_vm10, 1.0, %v3578_v27  ;;  %v3267_v55 = vsel %vm1894_vm11, 1.0, %v3578_v27  ;;  %vm378_vm12 = vcmp.eq.s32.totalorder %v3721_v10, %v4704_v54  ;;  %vm636_vm13 = vcmp.eq.s32.totalorder %v3732_v14, %v4704_v54 }
 0x133   : > { %v2115_v9 = vadd.f32 %v3296_v60, %v1857_v36  ;;  %v1312_v45 = vadd.f32 %v3075_v38, %v1054_v41  ;;  %vm2152_vm14 = vcmp.eq.s32.totalorder %v3865_v39, %v4699_v51  ;;  %vm2408_vm15 = vcmp.eq.s32.totalorder %v4699_v51, %v3701_v2 }
 0x134   : > { %v2915_v48 = vsel %vm378_vm12, 1.0, %v3578_v27  ;;  %v2979_v12 = vsel %vm636_vm13, 1.0, %v3578_v27  ;;  %vm894_vm1 = vcmp.eq.s32.totalorder %v3737_v16, %v4704_v54  ;;  %vm1152_vm2 = vcmp.eq.s32.totalorder %v3743_v18, %v4704_v54 }
 0x135   : > { %v2373_v4 = vadd.f32 %v3360_v34, %v2115_v9  ;;  %v1570_v49 = vadd.f32 %v3139_v42, %v1312_v45  ;;  %v828_v50 = vadd.f32 %v2979_v12, %v2915_v48  ;;  %v3043_v63 = vsel %vm894_vm1, 1.0, %v3578_v27 }
 0x136   : > { %v3331_v52 = vsel %vm2152_vm14, 1.0, %v3578_v27  ;;  %v3107_v5 = vsel %vm1152_vm2, 1.0, %v3578_v27  ;;  %vm1410_vm3 = vcmp.eq.s32.totalorder %v3748_v20, %v4704_v54  ;;  %vm1668_vm4 = vcmp.eq.s32.totalorder %v3753_v22, %v4704_v54 }
 0x137   : > { %v2566_v51 = vadd.f32 %v2502_v40, %v2373_v4  ;;  %v1828_v6 = vadd.f32 %v3203_v44, %v1570_v49  ;;  %v2473_v53 = vsel %vm2408_vm15, %v3777_v31, 0.0  ;;  %v1086_v56 = vadd.f32 %v3043_v63, %v828_v50 }
 0x138   : > { %v3171_v8 = vsel %vm1410_vm3, 1.0, %v3578_v27  ;;  %v3235_v57 = vsel %vm1668_vm4, 1.0, %v3578_v27  ;;  %vm1926_vm5 = vcmp.eq.s32.totalorder %v3758_v24, %v4704_v54  ;;  %v5050_v58 = vadd.s32 24, %v3699_v1 }
 0x139   : > { %2662 = vmatpush.msra.mxu3 %v2566_v51  ;;  %v2086_v59 = vadd.f32 %v3267_v55, %v1828_v6  ;;  %v1344_v37 = vadd.f32 %v3107_v5, %v1086_v56  ;;  %vm2184_vm0 = vcmp.eq.s32.totalorder %v3865_v39, %v4704_v54  ;;  %v5055_v61 = vadd.s32 152, %v3699_v1 }
 0x13a   : > { %vm341_vm6 = vcmp.eq.s32.totalorder %v3723_v11, %v5050_v58  ;;  %vm599_vm7 = vcmp.eq.s32.totalorder %v3734_v15, %v5050_v58  ;;  %vm857_vm8 = vcmp.eq.s32.totalorder %v3739_v17, %v5050_v58  ;;  %vm1115_vm9 = vcmp.eq.s32.totalorder %v3745_v19, %v5050_v58 }
 0x13b   : > { %v2344_v3 = vadd.f32 %v3331_v52, %v2086_v59  ;;  %v1602_v60 = vadd.f32 %v3171_v8, %v1344_v37  ;;  %v2878_v0 = vsel %vm341_vm6, 1.0, %v3578_v27  ;;  %v2942_v62 = vsel %vm599_vm7, 1.0, %v3578_v27 }
 0x13c   : > { %v3299_v28 = vsel %vm1926_vm5, 1.0, %v3578_v27  ;;  %v791_v29 = vadd.f32 %v2942_v62, %v2878_v0  ;;  %v3006_v30 = vsel %vm857_vm8, 1.0, %v3578_v27  ;;  %vm1373_vm10 = vcmp.eq.s32.totalorder %v3750_v21, %v5050_v58 }
 0x13d   : > { %v2537_v33 = vadd.f32 %v2473_v53, %v2344_v3  ;;  %v1860_v47 = vadd.f32 %v3235_v57, %v1602_v60  ;;  %v3070_v13 = vsel %vm1115_vm9, 1.0, %v3578_v27  ;;  %vm1631_vm11 = vcmp.eq.s32.totalorder %v3755_v23, %v5050_v58 }
 0x13e   : > { %v3363_v34 = vsel %vm2184_vm0, 1.0, %v3578_v27  ;;  %v1049_v38 = vadd.f32 %v3006_v30, %v791_v29  ;;  %v3134_v36 = vsel %vm1373_vm10, 1.0, %v3578_v27  ;;  %v3198_v40 = vsel %vm1631_vm11, 1.0, %v3578_v27 }
 0x13f   : > { %2600 = vmatpush.msra.mxu0 %v2537_v33  ;;  %v2118_v41 = vadd.f32 %v3299_v28, %v1860_v47  ;;  %vm1889_vm12 = vcmp.eq.s32.totalorder %v3760_v25, %v5050_v58  ;;  %vm2147_vm13 = vcmp.eq.s32.totalorder %v3764_v26, %v5050_v58  ;;  %vm373_vm14 = vcmp.eq.s32.totalorder %v3723_v11, %v5055_v61 }
 0x140   : > { %v1307_v42 = vadd.f32 %v3070_v13, %v1049_v38  ;;  %v2910_v54 = vsel %vm373_vm14, 1.0, %v3578_v27  ;;  %vm631_vm15 = vcmp.eq.s32.totalorder %v3734_v15, %v5055_v61  ;;  %vm889_vm1 = vcmp.eq.s32.totalorder %v3739_v17, %v5055_v61 }
 0x141   : > { %v2376_v44 = vadd.f32 %v3363_v34, %v2118_v41  ;;  %v2974_v55 = vsel %vm631_vm15, 1.0, %v3578_v27  ;;  %v3038_v9 = vsel %vm889_vm1, 1.0, %v3578_v27  ;;  %vm1147_vm2 = vcmp.eq.s32.totalorder %v3745_v19, %v5055_v61 }
 0x142   : > { %v1565_v45 = vadd.f32 %v3134_v36, %v1307_v42  ;;  %v3262_v48 = vsel %vm1889_vm12, 1.0, %v3578_v27  ;;  %v823_v12 = vadd.f32 %v2974_v55, %v2910_v54  ;;  %vm1405_vm3 = vcmp.eq.s32.totalorder %v3750_v21, %v5055_v61 }
 0x143   : > { %2620 = vmatpush.msra.mxu1 %v2376_v44  ;;  %v3326_v4 = vsel %vm2147_vm13, 1.0, %v3578_v27  ;;  %v3102_v49 = vsel %vm1147_vm2, 1.0, %v3578_v27  ;;  %vm1663_vm4 = vcmp.eq.s32.totalorder %v3755_v23, %v5055_v61  ;;  %vm1921_vm5 = vcmp.eq.s32.totalorder %v3760_v25, %v5055_v61 }
 0x144   : > { %v1823_v50 = vadd.f32 %v3198_v40, %v1565_v45  ;;  %v1081_v63 = vadd.f32 %v3038_v9, %v823_v12  ;;  %v3166_v52 = vsel %vm1405_vm3, 1.0, %v3578_v27  ;;  %vm2179_vm0 = vcmp.eq.s32.totalorder %v3764_v26, %v5055_v61 }
 0x145   : > { %v3230_v5 = vsel %vm1663_vm4, 1.0, %v3578_v27  ;;  %v3294_v51 = vsel %vm1921_vm5, 1.0, %v3578_v27  ;;  %vm344_vm6 = vcmp.eq.s32.totalorder %v3721_v10, %v4816_v43  ;;  %vm602_vm7 = vcmp.eq.s32.totalorder %v3732_v14, %v4816_v43 }
 0x146   : > { %v2081_v6 = vadd.f32 %v3262_v48, %v1823_v50  ;;  %v1339_v53 = vadd.f32 %v3102_v49, %v1081_v63  ;;  %vm2435_vm8 = vcmp.eq.s32.totalorder %v5055_v61, %v3712_v7  ;;  %v2881_v56 = vsel %vm344_vm6, 1.0, %v3578_v27 }
 0x147   : > { %v2945_v8 = vsel %vm602_vm7, 1.0, %v3578_v27  ;;  %vm860_vm9 = vcmp.eq.s32.totalorder %v3737_v16, %v4816_v43  ;;  %vm1118_vm10 = vcmp.eq.s32.totalorder %v3743_v18, %v4816_v43  ;;  %vm1376_vm11 = vcmp.eq.s32.totalorder %v3748_v20, %v4816_v43 }
 0x148   : > { %v2339_v57 = vadd.f32 %v3326_v4, %v2081_v6  ;;  %v1597_v59 = vadd.f32 %v3166_v52, %v1339_v53  ;;  %v794_v37 = vadd.f32 %v2945_v8, %v2881_v56  ;;  %v3009_v3 = vsel %vm860_vm9, 1.0, %v3578_v27 }
 0x149   : > { %v3358_v60 = vsel %vm2179_vm0, 1.0, %v3578_v27  ;;  %v3073_v0 = vsel %vm1118_vm10, 1.0, %v3578_v27  ;;  %vm1634_vm12 = vcmp.eq.s32.totalorder %v3753_v22, %v4816_v43  ;;  %vm1892_vm13 = vcmp.eq.s32.totalorder %v3758_v24, %v4816_v43 }
 0x14a   : > { %2643 = vmatpush.msra.mxu2 %v2339_v57  ;;  %v1855_v62 = vadd.f32 %v3230_v5, %v1597_v59  ;;  %v2500_v28 = vsel %vm2435_vm8, %v3777_v31, 0.0  ;;  %v1052_v29 = vadd.f32 %v3009_v3, %v794_v37  ;;  %v3137_v30 = vsel %vm1376_vm11, 1.0, %v3578_v27 }
 0x14b   : > { %v3201_v33 = vsel %vm1634_vm12, 1.0, %v3578_v27  ;;  %v3265_v47 = vsel %vm1892_vm13, 1.0, %v3578_v27  ;;  %vm376_vm14 = vcmp.eq.s32.totalorder %v3721_v10, %v4821_v46  ;;  %vm634_vm15 = vcmp.eq.s32.totalorder %v3732_v14, %v4821_v46 }
 0x14c   : > { %v2113_v13 = vadd.f32 %v3294_v51, %v1855_v62  ;;  %v1310_v34 = vadd.f32 %v3073_v0, %v1052_v29  ;;  %vm2150_vm1 = vcmp.eq.s32.totalorder %v3865_v39, %v4816_v43  ;;  %vm2406_vm2 = vcmp.eq.s32.totalorder %v4816_v43, %v3701_v2 }
 0x14d   : > { %v2913_v38 = vsel %vm376_vm14, 1.0, %v3578_v27  ;;  %v2977_v36 = vsel %vm634_vm15, 1.0, %v3578_v27  ;;  %vm892_vm3 = vcmp.eq.s32.totalorder %v3737_v16, %v4821_v46  ;;  %vm1150_vm4 = vcmp.eq.s32.totalorder %v3743_v18, %v4821_v46 }
 0x14e   : > { %v2371_v40 = vadd.f32 %v3358_v60, %v2113_v13  ;;  %v1568_v41 = vadd.f32 %v3137_v30, %v1310_v34  ;;  %v826_v42 = vadd.f32 %v2977_v36, %v2913_v38  ;;  %v3041_v54 = vsel %vm892_vm3, 1.0, %v3578_v27 }
 0x14f   : > { %v3329_v44 = vsel %vm2150_vm1, 1.0, %v3578_v27  ;;  %v3105_v55 = vsel %vm1150_vm4, 1.0, %v3578_v27  ;;  %vm1408_vm5 = vcmp.eq.s32.totalorder %v3748_v20, %v4821_v46  ;;  %vm1666_vm0 = vcmp.eq.s32.totalorder %v3753_v22, %v4821_v46 }
 0x150   : > { %v2564_v43 = vadd.f32 %v2500_v28, %v2371_v40  ;;  %v1826_v9 = vadd.f32 %v3201_v33, %v1568_v41  ;;  %v2471_v45 = vsel %vm2406_vm2, %v3777_v31, 0.0  ;;  %v1084_v48 = vadd.f32 %v3041_v54, %v826_v42 }
 0x151   : > { %v3169_v12 = vsel %vm1408_vm5, 1.0, %v3578_v27  ;;  %v3233_v4 = vsel %vm1666_vm0, 1.0, %v3578_v27  ;;  %vm1924_vm6 = vcmp.eq.s32.totalorder %v3758_v24, %v4821_v46  ;;  %v5167_v49 = vadd.s32 16, %v3699_v1 }
 0x152   : > { %2663 = vmatpush.msra.mxu3 %v2564_v43  ;;  %v2084_v50 = vadd.f32 %v3265_v47, %v1826_v9  ;;  %v1342_v63 = vadd.f32 %v3105_v55, %v1084_v48  ;;  %vm2182_vm7 = vcmp.eq.s32.totalorder %v3865_v39, %v4821_v46  ;;  %v5172_v52 = vadd.s32 144, %v3699_v1 }
 0x153   : > { %vm339_vm8 = vcmp.eq.s32.totalorder %v3723_v11, %v5167_v49  ;;  %vm597_vm9 = vcmp.eq.s32.totalorder %v3734_v15, %v5167_v49  ;;  %vm855_vm10 = vcmp.eq.s32.totalorder %v3739_v17, %v5167_v49  ;;  %vm1113_vm11 = vcmp.eq.s32.totalorder %v3745_v19, %v5167_v49 }
 0x154   : > { %v2342_v5 = vadd.f32 %v3329_v44, %v2084_v50  ;;  %v1600_v51 = vadd.f32 %v3169_v12, %v1342_v63  ;;  %v2876_v6 = vsel %vm339_vm8, 1.0, %v3578_v27  ;;  %v2940_v53 = vsel %vm597_vm9, 1.0, %v3578_v27 }
 0x155   : > { %v3297_v56 = vsel %vm1924_vm6, 1.0, %v3578_v27  ;;  %v789_v8 = vadd.f32 %v2940_v53, %v2876_v6  ;;  %v3004_v57 = vsel %vm855_vm10, 1.0, %v3578_v27  ;;  %vm1371_vm12 = vcmp.eq.s32.totalorder %v3750_v21, %v5167_v49 }
 0x156   : > { %v2535_v59 = vadd.f32 %v2471_v45, %v2342_v5  ;;  %v1858_v37 = vadd.f32 %v3233_v4, %v1600_v51  ;;  %v3068_v3 = vsel %vm1113_vm11, 1.0, %v3578_v27  ;;  %vm1629_vm13 = vcmp.eq.s32.totalorder %v3755_v23, %v5167_v49 }
 0x157   : > { %v3361_v60 = vsel %vm2182_vm7, 1.0, %v3578_v27  ;;  %v1047_v0 = vadd.f32 %v3004_v57, %v789_v8  ;;  %v3132_v62 = vsel %vm1371_vm12, 1.0, %v3578_v27  ;;  %v3196_v28 = vsel %vm1629_vm13, 1.0, %v3578_v27 }
 0x158   : > { %2601 = vmatpush.msra.mxu0 %v2535_v59  ;;  %v2116_v29 = vadd.f32 %v3297_v56, %v1858_v37  ;;  %vm1887_vm14 = vcmp.eq.s32.totalorder %v3760_v25, %v5167_v49  ;;  %vm2145_vm15 = vcmp.eq.s32.totalorder %v3764_v26, %v5167_v49  ;;  %vm371_vm1 = vcmp.eq.s32.totalorder %v3723_v11, %v5172_v52 }
 0x159   : > { %v1305_v30 = vadd.f32 %v3068_v3, %v1047_v0  ;;  %v2908_v46 = vsel %vm371_vm1, 1.0, %v3578_v27  ;;  %vm629_vm2 = vcmp.eq.s32.totalorder %v3734_v15, %v5172_v52  ;;  %vm887_vm3 = vcmp.eq.s32.totalorder %v3739_v17, %v5172_v52 }
 0x15a   : > { %v2374_v33 = vadd.f32 %v3361_v60, %v2116_v29  ;;  %v2972_v47 = vsel %vm629_vm2, 1.0, %v3578_v27  ;;  %v3036_v13 = vsel %vm887_vm3, 1.0, %v3578_v27  ;;  %vm1145_vm4 = vcmp.eq.s32.totalorder %v3745_v19, %v5172_v52 }
 0x15b   : > { %v1563_v34 = vadd.f32 %v3132_v62, %v1305_v30  ;;  %v3260_v38 = vsel %vm1887_vm14, 1.0, %v3578_v27  ;;  %v821_v36 = vadd.f32 %v2972_v47, %v2908_v46  ;;  %vm1403_vm5 = vcmp.eq.s32.totalorder %v3750_v21, %v5172_v52 }
 0x15c   : > { %2621 = vmatpush.msra.mxu1 %v2374_v33  ;;  %v3324_v40 = vsel %vm2145_vm15, 1.0, %v3578_v27  ;;  %v3100_v41 = vsel %vm1145_vm4, 1.0, %v3578_v27  ;;  %vm1661_vm0 = vcmp.eq.s32.totalorder %v3755_v23, %v5172_v52  ;;  %vm1919_vm6 = vcmp.eq.s32.totalorder %v3760_v25, %v5172_v52 }
 0x15d   : > { %v1821_v42 = vadd.f32 %v3196_v28, %v1563_v34  ;;  %v1079_v54 = vadd.f32 %v3036_v13, %v821_v36  ;;  %v3164_v44 = vsel %vm1403_vm5, 1.0, %v3578_v27  ;;  %vm2177_vm7 = vcmp.eq.s32.totalorder %v3764_v26, %v5172_v52 }
 0x15e   : > { %v3228_v55 = vsel %vm1661_vm0, 1.0, %v3578_v27  ;;  %v3292_v43 = vsel %vm1919_vm6, 1.0, %v3578_v27  ;;  %vm342_vm8 = vcmp.eq.s32.totalorder %v3721_v10, %v4933_v32  ;;  %vm600_vm9 = vcmp.eq.s32.totalorder %v3732_v14, %v4933_v32 }
 0x15f   : > { %v2079_v9 = vadd.f32 %v3260_v38, %v1821_v42  ;;  %v1337_v45 = vadd.f32 %v3100_v41, %v1079_v54  ;;  %vm2433_vm10 = vcmp.eq.s32.totalorder %v5172_v52, %v3712_v7  ;;  %v2879_v48 = vsel %vm342_vm8, 1.0, %v3578_v27 }
 0x160   : > { %v2943_v12 = vsel %vm600_vm9, 1.0, %v3578_v27  ;;  %vm858_vm11 = vcmp.eq.s32.totalorder %v3737_v16, %v4933_v32  ;;  %vm1116_vm12 = vcmp.eq.s32.totalorder %v3743_v18, %v4933_v32  ;;  %vm1374_vm13 = vcmp.eq.s32.totalorder %v3748_v20, %v4933_v32 }
 0x161   : > { %v2337_v4 = vadd.f32 %v3324_v40, %v2079_v9  ;;  %v1595_v50 = vadd.f32 %v3164_v44, %v1337_v45  ;;  %v792_v63 = vadd.f32 %v2943_v12, %v2879_v48  ;;  %v3007_v5 = vsel %vm858_vm11, 1.0, %v3578_v27 }
 0x162   : > { %v3356_v51 = vsel %vm2177_vm7, 1.0, %v3578_v27  ;;  %v3071_v6 = vsel %vm1116_vm12, 1.0, %v3578_v27  ;;  %vm1632_vm14 = vcmp.eq.s32.totalorder %v3753_v22, %v4933_v32  ;;  %vm1890_vm15 = vcmp.eq.s32.totalorder %v3758_v24, %v4933_v32 }
 0x163   : > { %2644 = vmatpush.msra.mxu2 %v2337_v4  ;;  %v1853_v53 = vadd.f32 %v3228_v55, %v1595_v50  ;;  %v2498_v56 = vsel %vm2433_vm10, %v3777_v31, 0.0  ;;  %v1050_v8 = vadd.f32 %v3007_v5, %v792_v63  ;;  %v3135_v57 = vsel %vm1374_vm13, 1.0, %v3578_v27 }
 0x164   : > { %v3199_v59 = vsel %vm1632_vm14, 1.0, %v3578_v27  ;;  %v3263_v37 = vsel %vm1890_vm15, 1.0, %v3578_v27  ;;  %vm374_vm1 = vcmp.eq.s32.totalorder %v3721_v10, %v4938_v35  ;;  %vm632_vm2 = vcmp.eq.s32.totalorder %v3732_v14, %v4938_v35 }
 0x165   : > { %v2111_v3 = vadd.f32 %v3292_v43, %v1853_v53  ;;  %v1308_v60 = vadd.f32 %v3071_v6, %v1050_v8  ;;  %vm2148_vm3 = vcmp.eq.s32.totalorder %v3865_v39, %v4933_v32  ;;  %vm2404_vm4 = vcmp.eq.s32.totalorder %v4933_v32, %v3701_v2 }
 0x166   : > { %v2911_v0 = vsel %vm374_vm1, 1.0, %v3578_v27  ;;  %v2975_v62 = vsel %vm632_vm2, 1.0, %v3578_v27  ;;  %vm890_vm5 = vcmp.eq.s32.totalorder %v3737_v16, %v4938_v35  ;;  %vm1148_vm0 = vcmp.eq.s32.totalorder %v3743_v18, %v4938_v35 }
 0x167   : > { %v2369_v28 = vadd.f32 %v3356_v51, %v2111_v3  ;;  %v1566_v29 = vadd.f32 %v3135_v57, %v1308_v60  ;;  %v824_v30 = vadd.f32 %v2975_v62, %v2911_v0  ;;  %v3039_v46 = vsel %vm890_vm5, 1.0, %v3578_v27 }
 0x168   : > { %v3327_v33 = vsel %vm2148_vm3, 1.0, %v3578_v27  ;;  %v3103_v47 = vsel %vm1148_vm0, 1.0, %v3578_v27  ;;  %vm1406_vm6 = vcmp.eq.s32.totalorder %v3748_v20, %v4938_v35  ;;  %vm1664_vm7 = vcmp.eq.s32.totalorder %v3753_v22, %v4938_v35 }
 0x169   : > { %v2562_v32 = vadd.f32 %v2498_v56, %v2369_v28  ;;  %v1824_v13 = vadd.f32 %v3199_v59, %v1566_v29  ;;  %v2469_v34 = vsel %vm2404_vm4, %v3777_v31, 0.0  ;;  %v1082_v38 = vadd.f32 %v3039_v46, %v824_v30 }
 0x16a   : > { %v3167_v36 = vsel %vm1406_vm6, 1.0, %v3578_v27  ;;  %v3231_v40 = vsel %vm1664_vm7, 1.0, %v3578_v27  ;;  %vm1922_vm8 = vcmp.eq.s32.totalorder %v3758_v24, %v4938_v35  ;;  %v5284_v41 = vadd.s32 8, %v3699_v1 }
 0x16b   : > { %2664 = vmatpush.msra.mxu3 %v2562_v32  ;;  %v2082_v42 = vadd.f32 %v3263_v37, %v1824_v13  ;;  %v1340_v54 = vadd.f32 %v3103_v47, %v1082_v38  ;;  %vm2180_vm9 = vcmp.eq.s32.totalorder %v3865_v39, %v4938_v35  ;;  %v5289_v44 = vadd.s32 136, %v3699_v1 }
 0x16c   : > { %vm337_vm10 = vcmp.eq.s32.totalorder %v3723_v11, %v5284_v41  ;;  %vm595_vm11 = vcmp.eq.s32.totalorder %v3734_v15, %v5284_v41  ;;  %vm853_vm12 = vcmp.eq.s32.totalorder %v3739_v17, %v5284_v41  ;;  %vm1111_vm13 = vcmp.eq.s32.totalorder %v3745_v19, %v5284_v41 }
 0x16d   : > { %v2340_v55 = vadd.f32 %v3327_v33, %v2082_v42  ;;  %v1598_v43 = vadd.f32 %v3167_v36, %v1340_v54  ;;  %v2874_v9 = vsel %vm337_vm10, 1.0, %v3578_v27  ;;  %v2938_v45 = vsel %vm595_vm11, 1.0, %v3578_v27 }
 0x16e   : > { %v3295_v48 = vsel %vm1922_vm8, 1.0, %v3578_v27  ;;  %v787_v12 = vadd.f32 %v2938_v45, %v2874_v9  ;;  %v3002_v4 = vsel %vm853_vm12, 1.0, %v3578_v27  ;;  %vm1369_vm14 = vcmp.eq.s32.totalorder %v3750_v21, %v5284_v41 }
 0x16f   : > { %v2533_v50 = vadd.f32 %v2469_v34, %v2340_v55  ;;  %v1856_v63 = vadd.f32 %v3231_v40, %v1598_v43  ;;  %v3066_v5 = vsel %vm1111_vm13, 1.0, %v3578_v27  ;;  %vm1627_vm15 = vcmp.eq.s32.totalorder %v3755_v23, %v5284_v41 }
 0x170   : > { %v3359_v51 = vsel %vm2180_vm9, 1.0, %v3578_v27  ;;  %v1045_v6 = vadd.f32 %v3002_v4, %v787_v12  ;;  %v3130_v53 = vsel %vm1369_vm14, 1.0, %v3578_v27  ;;  %v3194_v56 = vsel %vm1627_vm15, 1.0, %v3578_v27 }
 0x171   : > { %2602 = vmatpush.msra.mxu0 %v2533_v50  ;;  %v2114_v8 = vadd.f32 %v3295_v48, %v1856_v63  ;;  %vm1885_vm1 = vcmp.eq.s32.totalorder %v3760_v25, %v5284_v41  ;;  %vm2143_vm2 = vcmp.eq.s32.totalorder %v3764_v26, %v5284_v41  ;;  %vm369_vm3 = vcmp.eq.s32.totalorder %v3723_v11, %v5289_v44 }
 0x172   : > { %v1303_v57 = vadd.f32 %v3066_v5, %v1045_v6  ;;  %v2906_v35 = vsel %vm369_vm3, 1.0, %v3578_v27  ;;  %vm627_vm4 = vcmp.eq.s32.totalorder %v3734_v15, %v5289_v44  ;;  %vm885_vm5 = vcmp.eq.s32.totalorder %v3739_v17, %v5289_v44 }
 0x173   : > { %v2372_v59 = vadd.f32 %v3359_v51, %v2114_v8  ;;  %v2970_v37 = vsel %vm627_vm4, 1.0, %v3578_v27  ;;  %v3034_v3 = vsel %vm885_vm5, 1.0, %v3578_v27  ;;  %vm1143_vm0 = vcmp.eq.s32.totalorder %v3745_v19, %v5289_v44 }
 0x174   : > { %v1561_v60 = vadd.f32 %v3130_v53, %v1303_v57  ;;  %v3258_v0 = vsel %vm1885_vm1, 1.0, %v3578_v27  ;;  %v819_v62 = vadd.f32 %v2970_v37, %v2906_v35  ;;  %vm1401_vm6 = vcmp.eq.s32.totalorder %v3750_v21, %v5289_v44 }
 0x175   : > { %2622 = vmatpush.msra.mxu1 %v2372_v59  ;;  %v3322_v28 = vsel %vm2143_vm2, 1.0, %v3578_v27  ;;  %v3098_v29 = vsel %vm1143_vm0, 1.0, %v3578_v27  ;;  %vm1659_vm7 = vcmp.eq.s32.totalorder %v3755_v23, %v5289_v44  ;;  %vm1917_vm8 = vcmp.eq.s32.totalorder %v3760_v25, %v5289_v44 }
 0x176   : > { %v1819_v30 = vadd.f32 %v3194_v56, %v1561_v60  ;;  %v1077_v46 = vadd.f32 %v3034_v3, %v819_v62  ;;  %v3162_v33 = vsel %vm1401_vm6, 1.0, %v3578_v27  ;;  %vm2175_vm9 = vcmp.eq.s32.totalorder %v3764_v26, %v5289_v44 }
 0x177   : > { %v3226_v47 = vsel %vm1659_vm7, 1.0, %v3578_v27  ;;  %v3290_v32 = vsel %vm1917_vm8, 1.0, %v3578_v27  ;;  %vm340_vm10 = vcmp.eq.s32.totalorder %v3721_v10, %v5050_v58  ;;  %vm598_vm11 = vcmp.eq.s32.totalorder %v3732_v14, %v5050_v58 }
 0x178   : > { %v2077_v13 = vadd.f32 %v3258_v0, %v1819_v30  ;;  %v1335_v34 = vadd.f32 %v3098_v29, %v1077_v46  ;;  %vm2431_vm12 = vcmp.eq.s32.totalorder %v5289_v44, %v3712_v7  ;;  %v2877_v38 = vsel %vm340_vm10, 1.0, %v3578_v27 }
 0x179   : > { %v2941_v36 = vsel %vm598_vm11, 1.0, %v3578_v27  ;;  %vm856_vm13 = vcmp.eq.s32.totalorder %v3737_v16, %v5050_v58  ;;  %vm1114_vm14 = vcmp.eq.s32.totalorder %v3743_v18, %v5050_v58  ;;  %vm1372_vm15 = vcmp.eq.s32.totalorder %v3748_v20, %v5050_v58 }
 0x17a   : > { %v2335_v40 = vadd.f32 %v3322_v28, %v2077_v13  ;;  %v1593_v42 = vadd.f32 %v3162_v33, %v1335_v34  ;;  %v790_v54 = vadd.f32 %v2941_v36, %v2877_v38  ;;  %v3005_v55 = vsel %vm856_vm13, 1.0, %v3578_v27 }
 0x17b   : > { %v3354_v43 = vsel %vm2175_vm9, 1.0, %v3578_v27  ;;  %v3069_v9 = vsel %vm1114_vm14, 1.0, %v3578_v27  ;;  %vm1630_vm1 = vcmp.eq.s32.totalorder %v3753_v22, %v5050_v58  ;;  %vm1888_vm2 = vcmp.eq.s32.totalorder %v3758_v24, %v5050_v58 }
 0x17c   : > { %2645 = vmatpush.msra.mxu2 %v2335_v40  ;;  %v1851_v45 = vadd.f32 %v3226_v47, %v1593_v42  ;;  %v2496_v48 = vsel %vm2431_vm12, %v3777_v31, 0.0  ;;  %v1048_v12 = vadd.f32 %v3005_v55, %v790_v54  ;;  %v3133_v4 = vsel %vm1372_vm15, 1.0, %v3578_v27 }
 0x17d   : > { %v3197_v50 = vsel %vm1630_vm1, 1.0, %v3578_v27  ;;  %v3261_v63 = vsel %vm1888_vm2, 1.0, %v3578_v27  ;;  %vm372_vm3 = vcmp.eq.s32.totalorder %v3721_v10, %v5055_v61  ;;  %vm630_vm4 = vcmp.eq.s32.totalorder %v3732_v14, %v5055_v61 }
 0x17e   : > { %v2109_v5 = vadd.f32 %v3290_v32, %v1851_v45  ;;  %v1306_v51 = vadd.f32 %v3069_v9, %v1048_v12  ;;  %vm2146_vm5 = vcmp.eq.s32.totalorder %v3865_v39, %v5050_v58  ;;  %vm2402_vm0 = vcmp.eq.s32.totalorder %v5050_v58, %v3701_v2 }
 0x17f   : > { %v2909_v6 = vsel %vm372_vm3, 1.0, %v3578_v27  ;;  %v2973_v53 = vsel %vm630_vm4, 1.0, %v3578_v27  ;;  %vm888_vm6 = vcmp.eq.s32.totalorder %v3737_v16, %v5055_v61  ;;  %vm1146_vm7 = vcmp.eq.s32.totalorder %v3743_v18, %v5055_v61 }
 0x180   : > { %v2367_v56 = vadd.f32 %v3354_v43, %v2109_v5  ;;  %v1564_v8 = vadd.f32 %v3133_v4, %v1306_v51  ;;  %v822_v57 = vadd.f32 %v2973_v53, %v2909_v6  ;;  %v3037_v35 = vsel %vm888_vm6, 1.0, %v3578_v27 }
 0x181   : > { %v3325_v59 = vsel %vm2146_vm5, 1.0, %v3578_v27  ;;  %v3101_v37 = vsel %vm1146_vm7, 1.0, %v3578_v27  ;;  %vm1404_vm8 = vcmp.eq.s32.totalorder %v3748_v20, %v5055_v61  ;;  %vm1662_vm9 = vcmp.eq.s32.totalorder %v3753_v22, %v5055_v61 }
 0x182   : > { %v2560_v58 = vadd.f32 %v2496_v48, %v2367_v56  ;;  %v1822_v3 = vadd.f32 %v3197_v50, %v1564_v8  ;;  %v2467_v60 = vsel %vm2402_vm0, %v3777_v31, 0.0  ;;  %v1080_v0 = vadd.f32 %v3037_v35, %v822_v57 }
 0x183   : > { %v3165_v62 = vsel %vm1404_vm8, 1.0, %v3578_v27  ;;  %v3229_v28 = vsel %vm1662_vm9, 1.0, %v3578_v27  ;;  %vm1920_vm10 = vcmp.eq.s32.totalorder %v3758_v24, %v5055_v61  ;;  %vm335_vm11 = vcmp.eq.s32.totalorder %v3723_v11, %v3699_v1 }
 0x184   : > { %2665 = vmatpush.msra.mxu3 %v2560_v58  ;;  %v2080_v29 = vadd.f32 %v3261_v63, %v1822_v3  ;;  %v1338_v30 = vadd.f32 %v3101_v37, %v1080_v0  ;;  %vm2178_vm12 = vcmp.eq.s32.totalorder %v3865_v39, %v5055_v61  ;;  %v2872_v46 = vsel %vm335_vm11, 1.0, %v3578_v27 }
 0x185   : > { %vm593_vm13 = vcmp.eq.s32.totalorder %v3734_v15, %v3699_v1  ;;  %vm851_vm14 = vcmp.eq.s32.totalorder %v3739_v17, %v3699_v1  ;;  %vm1109_vm15 = vcmp.eq.s32.totalorder %v3745_v19, %v3699_v1  ;;  %vm1367_vm1 = vcmp.eq.s32.totalorder %v3750_v21, %v3699_v1 }
 0x186   : > { %v2338_v33 = vadd.f32 %v3325_v59, %v2080_v29  ;;  %v1596_v47 = vadd.f32 %v3165_v62, %v1338_v30  ;;  %v2936_v32 = vsel %vm593_vm13, 1.0, %v3578_v27  ;;  %v3000_v13 = vsel %vm851_vm14, 1.0, %v3578_v27 }
 0x187   : > { %v3293_v34 = vsel %vm1920_vm10, 1.0, %v3578_v27  ;;  %v3357_v38 = vsel %vm2178_vm12, 1.0, %v3578_v27  ;;  %v785_v36 = vadd.f32 %v2936_v32, %v2872_v46  ;;  %vm1625_vm2 = vcmp.eq.s32.totalorder %v3755_v23, %v3699_v1 }
 0x188   : > { %v2531_v40 = vadd.f32 %v2467_v60, %v2338_v33  ;;  %v1854_v42 = vadd.f32 %v3229_v28, %v1596_v47  ;;  %v3064_v54 = vsel %vm1109_vm15, 1.0, %v3578_v27  ;;  %v3128_v55 = vsel %vm1367_vm1, 1.0, %v3578_v27 }
 0x189   : > { %v1043_v43 = vadd.f32 %v3000_v13, %v785_v36  ;;  %v3192_v9 = vsel %vm1625_vm2, 1.0, %v3578_v27  ;;  %vm1883_vm3 = vcmp.eq.s32.totalorder %v3760_v25, %v3699_v1  ;;  %v5429_v61 = vadd.s32 128, %v3699_v1 }
 0x18a   : > { %2603 = vmatpush.msra.mxu0 %v2531_v40  ;;  %v2112_v45 = vadd.f32 %v3293_v34, %v1854_v42  ;;  %vm2141_vm4 = vcmp.eq.s32.totalorder %v3764_v26, %v3699_v1  ;;  %vm338_vm5 = vcmp.eq.s32.totalorder %v3721_v10, %v5167_v49  ;;  %vm596_vm0 = vcmp.eq.s32.totalorder %v3732_v14, %v5167_v49 }
 0x18b   : > { %v1301_v48 = vadd.f32 %v3064_v54, %v1043_v43  ;;  %vm367_vm6 = vcmp.eq.s32.totalorder %v3723_v11, %v5429_v61  ;;  %vm625_vm7 = vcmp.eq.s32.totalorder %v3734_v15, %v5429_v61  ;;  %vm883_vm8 = vcmp.eq.s32.totalorder %v3739_v17, %v5429_v61 }
 0x18c   : > { %v2370_v12 = vadd.f32 %v3357_v38, %v2112_v45  ;;  %v2904_v4 = vsel %vm367_vm6, 1.0, %v3578_v27  ;;  %v2968_v50 = vsel %vm625_vm7, 1.0, %v3578_v27  ;;  %v3032_v63 = vsel %vm883_vm8, 1.0, %v3578_v27  ;;  %v5541_v45 = vld [vmem:[%s5483_s14 + $0x8] sm:$0xff] }
 0x18d   : > { %v1559_v5 = vadd.f32 %v3128_v55, %v1301_v48  ;;  %v817_v51 = vadd.f32 %v2968_v50, %v2904_v4  ;;  %vm1141_vm9 = vcmp.eq.s32.totalorder %v3745_v19, %v5429_v61  ;;  %vm1399_vm10 = vcmp.eq.s32.totalorder %v3750_v21, %v5429_v61 }
 0x18e   : > { %2623 = vmatpush.msra.mxu1 %v2370_v12  ;;  %v3256_v11 = vsel %vm1883_vm3, 1.0, %v3578_v27  ;;  %v3096_v15 = vsel %vm1141_vm9, 1.0, %v3578_v27  ;;  %vm1657_vm11 = vcmp.eq.s32.totalorder %v3755_v23, %v5429_v61  ;;  %vm1915_vm12 = vcmp.eq.s32.totalorder %v3760_v25, %v5429_v61 }
 0x18f   : > { %v1817_v17 = vadd.f32 %v3192_v9, %v1559_v5  ;;  %v3320_v19 = vsel %vm2141_vm4, 1.0, %v3578_v27  ;;  %v1075_v21 = vadd.f32 %v3032_v63, %v817_v51  ;;  %v3160_v6 = vsel %vm1399_vm10, 1.0, %v3578_v27 }
 0x190   : > { %v3224_v53 = vsel %vm1657_vm11, 1.0, %v3578_v27  ;;  %v3288_v56 = vsel %vm1915_vm12, 1.0, %v3578_v27  ;;  %v2875_v23 = vsel %vm338_vm5, 1.0, %v3578_v27  ;;  %v2939_v25 = vsel %vm596_vm0, 1.0, %v3578_v27 }
 0x191   : > { %v2075_v8 = vadd.f32 %v3256_v11, %v1817_v17  ;;  %v1333_v57 = vadd.f32 %v3096_v15, %v1075_v21  ;;  %vm2173_vm13 = vcmp.eq.s32.totalorder %v3764_v26, %v5429_v61  ;;  %vm2429_vm14 = vcmp.eq.s32.totalorder %v5429_v61, %v3712_v7  ;;  %v5498_v26 = vld [vmem:[%s5483_s14] sm:$0xff]  ;;  %s2757_s14 = sshll.u32 %s276_s6, 4  ;;  %s2758_s14 = int_to_ptr.vmem [resolvable:$true] %s2757_s14 }
 0x192   : > { %v788_v35 = vadd.f32 %v2939_v25, %v2875_v23  ;;  %vm854_vm15 = vcmp.eq.s32.totalorder %v3737_v16, %v5167_v49  ;;  %vm1112_vm1 = vcmp.eq.s32.totalorder %v3743_v18, %v5167_v49  ;;  %vm1370_vm2 = vcmp.eq.s32.totalorder %v3748_v20, %v5167_v49 }
 0x193   : > { %v2333_v59 = vadd.f32 %v3320_v19, %v2075_v8  ;;  %v1591_v37 = vadd.f32 %v3160_v6, %v1333_v57  ;;  %v3003_v58 = vsel %vm854_vm15, 1.0, %v3578_v27  ;;  %v3067_v3 = vsel %vm1112_vm1, 1.0, %v3578_v27 }
 0x194   : > { %v3352_v60 = vsel %vm2173_vm13, 1.0, %v3578_v27  ;;  %v1046_v0 = vadd.f32 %v3003_v58, %v788_v35  ;;  %vm1628_vm3 = vcmp.eq.s32.totalorder %v3753_v22, %v5167_v49  ;;  %vm1886_vm4 = vcmp.eq.s32.totalorder %v3758_v24, %v5167_v49 }
 0x195   : > { %2646 = vmatpush.msra.mxu2 %v2333_v59  ;;  %v1849_v62 = vadd.f32 %v3224_v53, %v1591_v37  ;;  %v2494_v28 = vsel %vm2429_vm14, %v3777_v31, 0.0  ;;  %v3131_v29 = vsel %vm1370_vm2, 1.0, %v3578_v27  ;;  %v3195_v30 = vsel %vm1628_vm3, 1.0, %v3578_v27 }
 0x196   : > { %v1304_v46 = vadd.f32 %v3067_v3, %v1046_v0  ;;  %v3259_v33 = vsel %vm1886_vm4, 1.0, %v3578_v27  ;;  %vm2144_vm5 = vcmp.eq.s32.totalorder %v3865_v39, %v5167_v49  ;;  %vm370_vm0 = vcmp.eq.s32.totalorder %v3721_v10, %v5172_v52  ;;  %2647 = vmatmul.f32.vlgmr.msra.gmra.mxu2 %v5498_v26 }
 0x197   : > { %v2107_v47 = vadd.f32 %v3288_v56, %v1849_v62  ;;  %vm2400_vm6 = vcmp.eq.s32.totalorder %v5167_v49, %v3701_v2  ;;  %v2907_v7 = vsel %vm370_vm0, 1.0, %v3578_v27  ;;  %vm628_vm7 = vcmp.eq.s32.totalorder %v3732_v14, %v5172_v52 }
 0x198   : > { %v1562_v32 = vadd.f32 %v3131_v29, %v1304_v46  ;;  %v2971_v13 = vsel %vm628_vm7, 1.0, %v3578_v27  ;;  %vm886_vm8 = vcmp.eq.s32.totalorder %v3737_v16, %v5172_v52  ;;  %vm1144_vm9 = vcmp.eq.s32.totalorder %v3743_v18, %v5172_v52 }
 0x199   : > { %v2365_v34 = vadd.f32 %v3352_v60, %v2107_v47  ;;  %v3323_v38 = vsel %vm2144_vm5, 1.0, %v3578_v27  ;;  %v820_v36 = vadd.f32 %v2971_v13, %v2907_v7  ;;  %v3035_v40 = vsel %vm886_vm8, 1.0, %v3578_v27 }
 0x19a   : > { %v1820_v42 = vadd.f32 %v3195_v30, %v1562_v32  ;;  %v3099_v54 = vsel %vm1144_vm9, 1.0, %v3578_v27  ;;  %vm1402_vm10 = vcmp.eq.s32.totalorder %v3748_v20, %v5172_v52  ;;  %vm1660_vm11 = vcmp.eq.s32.totalorder %v3753_v22, %v5172_v52 }
 0x19b   : > { %v2558_v55 = vadd.f32 %v2494_v28, %v2365_v34  ;;  %v2465_v43 = vsel %vm2400_vm6, %v3777_v31, 0.0  ;;  %v1078_v9 = vadd.f32 %v3035_v40, %v820_v36  ;;  %vm1918_vm12 = vcmp.eq.s32.totalorder %v3758_v24, %v5172_v52 }
 0x19c   : > { %v2078_v48 = vadd.f32 %v3259_v33, %v1820_v42  ;;  %v3163_v12 = vsel %vm1402_vm10, 1.0, %v3578_v27  ;;  %v3227_v4 = vsel %vm1660_vm11, 1.0, %v3578_v27  ;;  %vm336_vm13 = vcmp.eq.s32.totalorder %v3721_v10, %v5284_v41 }
 0x19d   : > { %2666 = vmatpush.msra.mxu3 %v2558_v55  ;;  %v1336_v50 = vadd.f32 %v3099_v54, %v1078_v9  ;;  %vm2176_vm14 = vcmp.eq.s32.totalorder %v3865_v39, %v5172_v52  ;;  %v2873_v49 = vsel %vm336_vm13, 1.0, %v3578_v27  ;;  %vm594_vm15 = vcmp.eq.s32.totalorder %v3732_v14, %v5284_v41 }
 0x19e   : > { %v2336_v63 = vadd.f32 %v3323_v38, %v2078_v48  ;;  %2667 = vmatmul.f32.vlgmr.msra.gmra.mxu3 %v5541_v45  ;;  %v2937_v5 = vsel %vm594_vm15, 1.0, %v3578_v27  ;;  %vm852_vm1 = vcmp.eq.s32.totalorder %v3737_v16, %v5284_v41  ;;  %vm1110_vm2 = vcmp.eq.s32.totalorder %v3743_v18, %v5284_v41 }
 0x19f   : > { %v1594_v51 = vadd.f32 %v3163_v12, %v1336_v50  ;;  %v3291_v11 = vsel %vm1918_vm12, 1.0, %v3578_v27  ;;  %v786_v15 = vadd.f32 %v2937_v5, %v2873_v49  ;;  %v3001_v17 = vsel %vm852_vm1, 1.0, %v3578_v27 }
 0x1a0   : > { %v2529_v19 = vadd.f32 %v2465_v43, %v2336_v63  ;;  %v3065_v21 = vsel %vm1110_vm2, 1.0, %v3578_v27  ;;  %vm1368_vm3 = vcmp.eq.s32.totalorder %v3748_v20, %v5284_v41  ;;  %vm1626_vm4 = vcmp.eq.s32.totalorder %v3753_v22, %v5284_v41 }
 0x1a1   : > { %v1852_v6 = vadd.f32 %v3227_v4, %v1594_v51  ;;  %v3355_v53 = vsel %vm2176_vm14, 1.0, %v3578_v27  ;;  %v1044_v56 = vadd.f32 %v3001_v17, %v786_v15  ;;  %v3129_v23 = vsel %vm1368_vm3, 1.0, %v3578_v27 }
 0x1a2   : > { %2604 = vmatpush.msra.mxu0 %v2529_v19  ;;  %v3193_v25 = vsel %vm1626_vm4, 1.0, %v3578_v27  ;;  %vm1884_vm5 = vcmp.eq.s32.totalorder %v3758_v24, %v5284_v41  ;;  %vm368_vm0 = vcmp.eq.s32.totalorder %v3721_v10, %v5289_v44  ;;  %vm2142_vm6 = vcmp.eq.s32.totalorder %v3865_v39, %v5284_v41 }
 0x1a3   : > { %v2110_v8 = vadd.f32 %v3291_v11, %v1852_v6  ;;  %v1302_v57 = vadd.f32 %v3065_v21, %v1044_v56  ;;  %vm2398_vm7 = vcmp.eq.s32.totalorder %v5284_v41, %v3701_v2  ;;  %v2905_v52 = vsel %vm368_vm0, 1.0, %v3578_v27 }
 0x1a4   : > { %vm626_vm8 = vcmp.eq.s32.totalorder %v3732_v14, %v5289_v44  ;;  %vm884_vm9 = vcmp.eq.s32.totalorder %v3737_v16, %v5289_v44  ;;  %vm1142_vm10 = vcmp.eq.s32.totalorder %v3743_v18, %v5289_v44  ;;  %v3257_v3 = vsel %vm1884_vm5, 1.0, %v3578_v27 }
 0x1a5   : > { %v2368_v35 = vadd.f32 %v3355_v53, %v2110_v8  ;;  %v1560_v59 = vadd.f32 %v3129_v23, %v1302_v57  ;;  %v2969_v37 = vsel %vm626_vm8, 1.0, %v3578_v27  ;;  %v3033_v58 = vsel %vm884_vm9, 1.0, %v3578_v27 }
 0x1a6   : > { %v818_v60 = vadd.f32 %v2969_v37, %v2905_v52  ;;  %vm1400_vm11 = vcmp.eq.s32.totalorder %v3748_v20, %v5289_v44  ;;  %vm1658_vm12 = vcmp.eq.s32.totalorder %v3753_v22, %v5289_v44  ;;  %v3321_v62 = vsel %vm2142_vm6, 1.0, %v3578_v27 }
 0x1a7   : > { %2624 = vmatpush.msra.mxu1 %v2368_v35  ;;  %v1818_v0 = vadd.f32 %v3193_v25, %v1560_v59  ;;  %v2463_v28 = vsel %vm2398_vm7, %v3777_v31, 0.0  ;;  %v3097_v29 = vsel %vm1142_vm10, 1.0, %v3578_v27  ;;  %v3161_v46 = vsel %vm1400_vm11, 1.0, %v3578_v27 }
 0x1a8   : > { %v1076_v30 = vadd.f32 %v3033_v58, %v818_v60  ;;  %v3225_v33 = vsel %vm1658_vm12, 1.0, %v3578_v27  ;;  %vm334_vm13 = vcmp.eq.s32.totalorder %v3721_v10, %v3699_v1  ;;  %vm1916_vm14 = vcmp.eq.s32.totalorder %v3758_v24, %v5289_v44 }
 0x1a9   : > { %v2076_v47 = vadd.f32 %v3257_v3, %v1818_v0  ;;  %v2871_v7 = vsel %vm334_vm13, 1.0, %v3578_v27  ;;  %vm592_vm15 = vcmp.eq.s32.totalorder %v3732_v14, %v3699_v1  ;;  %vm850_vm1 = vcmp.eq.s32.totalorder %v3737_v16, %v3699_v1 }
 0x1aa   : > { %v1334_v41 = vadd.f32 %v3097_v29, %v1076_v30  ;;  %v2935_v32 = vsel %vm592_vm15, 1.0, %v3578_v27  ;;  %vm1108_vm2 = vcmp.eq.s32.totalorder %v3743_v18, %v3699_v1  ;;  %vm2174_vm3 = vcmp.eq.s32.totalorder %v3865_v39, %v5289_v44 }
 0x1ab   : > { %v2334_v13 = vadd.f32 %v3321_v62, %v2076_v47  ;;  %v784_v34 = vadd.f32 %v2935_v32, %v2871_v7  ;;  %v2999_v38 = vsel %vm850_vm1, 1.0, %v3578_v27  ;;  %v3063_v40 = vsel %vm1108_vm2, 1.0, %v3578_v27 }
 0x1ac   : > { %v1592_v36 = vadd.f32 %v3161_v46, %v1334_v41  ;;  %vm1366_vm4 = vcmp.eq.s32.totalorder %v3748_v20, %v3699_v1  ;;  %vm1624_vm5 = vcmp.eq.s32.totalorder %v3753_v22, %v3699_v1  ;;  %v3289_v54 = vsel %vm1916_vm14, 1.0, %v3578_v27 }
 0x1ad   : > { %v2527_v42 = vadd.f32 %v2463_v28, %v2334_v13  ;;  %v1042_v55 = vadd.f32 %v2999_v38, %v784_v34  ;;  %v3353_v9 = vsel %vm2174_vm3, 1.0, %v3578_v27  ;;  %v3127_v48 = vsel %vm1366_vm4, 1.0, %v3578_v27 }
 0x1ae   : > { %v1850_v43 = vadd.f32 %v3225_v33, %v1592_v36  ;;  %vm1882_vm0 = vcmp.eq.s32.totalorder %v3758_v24, %v3699_v1  ;;  %v3191_v4 = vsel %vm1624_vm5, 1.0, %v3578_v27  ;;  %vm2140_vm6 = vcmp.eq.s32.totalorder %v3865_v39, %v3699_v1 }
 0x1af   : > { %2605 = vmatpush.msra.mxu0 %v2527_v42  ;;  %v1300_v12 = vadd.f32 %v3063_v40, %v1042_v55  ;;  %vm366_vm7 = vcmp.eq.s32.totalorder %v3721_v10, %v5429_v61  ;;  %vm624_vm8 = vcmp.eq.s32.totalorder %v3732_v14, %v5429_v61  ;;  %vm882_vm9 = vcmp.eq.s32.totalorder %v3737_v16, %v5429_v61 }
 0x1b0   : > { %v2108_v44 = vadd.f32 %v3289_v54, %v1850_v43  ;;  %v2903_v50 = vsel %vm366_vm7, 1.0, %v3578_v27  ;;  %v2967_v63 = vsel %vm624_vm8, 1.0, %v3578_v27  ;;  %v3031_v5 = vsel %vm882_vm9, 1.0, %v3578_v27 }
 0x1b1   : > { %v1558_v49 = vadd.f32 %v3127_v48, %v1300_v12  ;;  %vm1140_vm10 = vcmp.eq.s32.totalorder %v3743_v18, %v5429_v61  ;;  %v3255_v10 = vsel %vm1882_vm0, 1.0, %v3578_v27  ;;  %v816_v11 = vadd.f32 %v2967_v63, %v2903_v50 }
 0x1b2   : > { %v2366_v51 = vadd.f32 %v3353_v9, %v2108_v44  ;;  %vm1398_vm11 = vcmp.eq.s32.totalorder %v3748_v20, %v5429_v61  ;;  %vm2396_vm12 = vcmp.eq.s32.totalorder %v3699_v1, %v3701_v2  ;;  %v3095_v14 = vsel %vm1140_vm10, 1.0, %v3578_v27 }
 0x1b3   : > { %v1816_v15 = vadd.f32 %v3191_v4, %v1558_v49  ;;  %v3319_v16 = vsel %vm2140_vm6, 1.0, %v3578_v27  ;;  %v1074_v18 = vadd.f32 %v3031_v5, %v816_v11  ;;  %vm1656_vm13 = vcmp.eq.s32.totalorder %v3753_v22, %v5429_v61 }
 0x1b4   : > { %2625 = vmatpush.msra.mxu1 %v2366_v51  ;;  %v3159_v19 = vsel %vm1398_vm11, 1.0, %v3578_v27  ;;  %v2461_v20 = vsel %vm2396_vm12, %v3777_v31, 0.0  ;;  %vm1914_vm14 = vcmp.eq.s32.totalorder %v3758_v24, %v5429_v61  ;;  %v3223_v6 = vsel %vm1656_vm13, 1.0, %v3578_v27 }
 0x1b5   : > { %v2074_v17 = vadd.f32 %v3255_v10, %v1816_v15  ;;  %v1332_v21 = vadd.f32 %v3095_v14, %v1074_v18  ;;  %vm2172_vm15 = vcmp.eq.s32.totalorder %v3865_v39, %v5429_v61  ;;  %v3287_v56 = vsel %vm1914_vm14, 1.0, %v3578_v27  ;;  %v288_v39 = vld [vmem:[%s5727_s4] sm:$0xff] }
 0x1b6   : > { %v3351_v23 = vsel %vm2172_vm15, 1.0, %v3578_v27  ;;  %v3579_v52 = vmov 0   ;;  %v287_v27 = vld [vmem:[%s5726_s3 + $0x8] sm:$0xff]  ;;  %vm2681_vm1 = vcmask 64512   ;;  %v286_v61 = vld [vmem:[%s5726_s3] sm:$0xff] }
 0x1b7   : > { %v2332_v2 = vadd.f32 %v3319_v16, %v2074_v17  ;;  %v1590_v53 = vadd.f32 %v3159_v19, %v1332_v21  ;;  %3463 = vset.pattern.permute.xlu0 %v3579_v52 }
 0x1b8   : > { %2673 = vperm.xlu0 %3463, %v288_v39  }
 0x1b9   : > { %v2525_v1 = vadd.f32 %v2461_v20, %v2332_v2  ;;  %v1848_v22 = vadd.f32 %v3223_v6, %v1590_v53 }
 0x1bb   : > { %2606 = vmatpush.msra.mxu0 %v2525_v1  ;;  %v2106_v25 = vadd.f32 %v3287_v56, %v1848_v22 }
 0x1bc   : > { %2607 = vmatmul.f32.vlgmr.msra.gmra.mxu0 %v5498_v26  ;;  %v289_v26 = vld [vmem:[%s5727_s4 + $0x8] sm:$0xff] }
 0x1bd   : > { %v2364_v31 = vadd.f32 %v3351_v23, %v2106_v25 }
 0x1bf   : > { %2626 = vmatpush.msra.mxu1 %v2364_v31 }
 0x1c0   : > { %2627 = vmatmul.f32.vlgmr.msra.gmra.mxu1 %v5541_v45  ;;  %2678 = vperm.xlu0 %3463, %v289_v26  }
 0x219   : > { %v2648_v24 = vpop.f32.mrf.mxu2 }
 0x221   : > { %v2668_v8 = vpop.f32.mrf.mxu3 }
 0x222   : > { %v2669_v57 = vadd.f32 %v2668_v8, %v2648_v24 }
 0x224   : > { %2726 = vmatpush.msrb.mxu1 %v2669_v57  ;;  %3396 = vmatpush.msrb.mxu3 %v2669_v57 }
 0x225   : > { %3386 = vmatmul.msk.f32.vlgmr.msrb.gmra.mxu3 %vm2681_vm1, %v287_v27  ;;  %3385 = vmatmul.msk.f32.vlgmr.msrb.gmra.mxu1 %vm2681_vm1, %v286_v61 }
 0x22a   : > { %v2674_v37 = vpop.permute.xlu0 %2673 }
 0x232   : > { %v2679_v0 = vpop.permute.xlu0 %2678 }
 0x239   : > { %v2608_v45 = vpop.f32.mrf.mxu0 }
 0x23d   : > { %v2628_v35 = vpop.f32.mrf.mxu1 }
 0x23e   : > { %v2629_v59 = vadd.f32 %v2628_v35, %v2608_v45 }
 0x240   : > { %3395 = vmatpush.msrb.mxu2 %v2629_v59  ;;  %2703 = vmatpush.msrb.mxu0 %v2629_v59 }
 0x241   : > { %3384 = vmatmul.msk.f32.vlgmr.msrb.gmra.mxu2 %vm2681_vm1, %v287_v27  ;;  %3383 = vmatmul.msk.f32.vlgmr.msrb.gmra.mxu0 %vm2681_vm1, %v286_v61 }
 0x2a2   : > { %v2728_v58 = vpop.f32.mrf.mxu1 }
 0x2a3   : > { %v2729_v3 = vadd.f32 %v2728_v58, %v2674_v37 }
 0x2a5   : > { %v2735_v60 = vmax.f32 %v2729_v3, 0.0 }
 0x2a7   : > { %2739 = vst [vmem:[%s276_s6 + $0x8] sm:$0xff] %v2735_v60 }
 0x2a8   : > { %v2731_v62 = vpop.f32.mrf.mxu3 }
 0x2a9   : > { %v2732_v28 = vadd.f32 %v2731_v62, %v2679_v0 }
 0x2ab   : > { %v2737_v29 = vmax.f32 %v2732_v28, 0.0 }
 0x2ad   : > { %2741 = vst [vmem:[%s276_s6 + $0x18] sm:$0xff] %v2737_v29 }
 0x2be   : > { %v2705_v30 = vpop.f32.mrf.mxu0 }
 0x2bf   : > { %v2706_v46 = vadd.f32 %v2705_v30, %v2674_v37 }
 0x2c1   : > { %v2734_v33 = vmax.f32 %v2706_v46, 0.0 }
 0x2c3   : > { %2738 = vst [vmem:[%s276_s6] sm:$0xff] %v2734_v33 }
 0x2c4   : > { %v2708_v47 = vpop.f32.mrf.mxu2 }
 0x2c5   : > { %v2709_v7 = vadd.f32 %v2708_v47, %v2679_v0 }
 0x2c7   : > { %v2736_v41 = vmax.f32 %v2709_v7, 0.0 }
 0x2c9   : > { %2740 = vst [vmem:[%s276_s6 + $0x10] sm:$0xff] %v2736_v41 }
 0x2ca   : > { %3521 = shalt.err (!%p3518_p0)
}
 0x2cb   : > { %s3580_s0 = smov 256   ;;  %s3581_s29 = smov 16  }
 0x2cc   : > { %3399 = dma.vmem_to_hbm [thread:$0]  (%p3666_p9), %s2758_s14, 512, %s2760_s15, %s2743_s16, %s3580_s0, %s3580_s0, %s3581_s29  }
 0x2cd PF: > { %s2774_s6 = sand.u32 1, %s3556_s20   ;;  %p3406_p1 = pnand %p2862_p12, %p3673_p11 }
 0x2ce   : > { %s2775_s10 = scalar_lea.sflag [#allocation5], %s2774_s6 }
 0x2cf   : > { %p3407_p2 = pneg %p3406_p1 }
 0x2d1   : > { %3551 = dma.done.wait (%p3407_p2), %s2775_s10, 512  }
 0x2d2   : > { %3553 = vsyncadd (%p3407_p2), %s2775_s10, 4294966784  ;;  %s22_s25 = sadd.s32 1, %s3576_s25   ;;  %s5733_s20 = smov %s3560_s21 }
 0x2d3   : > { %p19_p3 = scmp.ge.s32.totalorder %s22_s25, 4   ;;  %s5734_s21 = smov %s3564_s22 }
 0x2d4   : > { %s5735_s22 = smov %s3671_s8  ;;  %s5736_s23 = smov %s3572_s24 }
 0x2d5   : > { %s5737_s24 = smov %s5739_s27  ;;  %21 = sbr.rel (!%p19_p3) target bundleno = 8 (0x8), region = 88 }
 0x2da   :  { %2781 = vsyncpa [#allocation4], 1 }
 0x2db   :  { %2783 = vsyncpa [#allocation4 + $0x1], 1 }
 0x2dc   :  { %2784 = vsyncpa [#allocation5], 1 }
 0x2dd   :  { %2786 = vsyncpa [#allocation5 + $0x1], 1 }

</bundles_post_ra>
